<compile_context>
chip_gen: v7x
topology: tpu7x:2x2x1
jax: 0.10.0
libtpu: 0.0.40
codegen_flags: <defaults>
</compile_context>

<pallas_src>
import functools
import math

import jax
import jax.numpy as jnp
from jax.experimental import pallas as pl
from jax.experimental.pallas import tpu as pltpu

# ----------------------- small synthetic model config -----------------------
N_EMBD = 32
N_HEAD = 4
HEAD_DIM = N_EMBD // N_HEAD
N_LAYER = 2
VOCAB_SIZE = 16
SQUARES_SIZE = 16          # board sequence length T
SPECIAL_SIZE = 2
N_POSSIBLE_MOVES = 128
N_MOVES_REEVALUATE = 3
SEQ = SQUARES_SIZE + SPECIAL_SIZE + N_MOVES_REEVALUATE   # 21
LN_EPS = 1e-5
BF16 = jnp.bfloat16


# ----------------------- in-kernel math helpers -----------------------
def _layernorm(x, w, b):
    mu = jnp.mean(x, axis=-1, keepdims=True)
    xc = x - mu
    var = jnp.mean(xc * xc, axis=-1, keepdims=True)
    return xc * jax.lax.rsqrt(var + LN_EPS) * w + b


def _gelu_tanh(x):
    # tanh-GELU (EUP) per perf feedback; ~1e-3 abs deviation from nn.GELU()'s exact erf form.
    c = math.sqrt(2.0 / math.pi)
    return 0.5 * x * (1.0 + jnp.tanh(c * (x + 0.044715 * x * x * x)))


# ----------------------- fully fused forward kernel (one batch shard per grid step) ---------------
def fused_forward_kernel(board_ref, special_ref, te_ref, pe_ref, me_ref,
                         ln1w_ref, ln1b_ref, wqkv_ref, bqkv_ref, wo_ref, bo_ref,
                         ln2w_ref, ln2b_ref, wfc_ref, bfc_ref, wcp_ref, bcp_ref,
                         lnfw_ref, lnfb_ref, wpol_ref, bpol_ref,
                         logits_ref,
                         *, n_layer, n_head, bb):
    f32 = jnp.float32
    C = N_EMBD
    D = C // n_head
    T = SQUARES_SIZE
    SP = SPECIAL_SIZE
    MV = N_MOVES_REEVALUATE
    S = SEQ

    # ---- embedding glue, fully in-kernel ----
    # token gather as ONE one-hot matmul for all bb*T board tokens (exact: one-hot rows select
    # te rows exactly even through the MXU's f32 multi-pass).
    ids = board_ref[0]                                                    # (bb*T, 1) int32
    onehot = (ids == jax.lax.broadcasted_iota(
        jnp.int32, (bb * T, VOCAB_SIZE), 1)).astype(f32)                  # (bb*T, VOCAB)
    tok_all = jnp.dot(onehot, te_ref[...],
                      preferred_element_type=f32)                         # (bb*T, C)
    spec_all = jnp.broadcast_to(special_ref[0], (bb * SP, C))             # (bb*SP, C)
    mv_rows = jnp.broadcast_to(
        me_ref[N_POSSIBLE_MOVES:N_POSSIBLE_MOVES + 1, :], (MV, C))        # (MV, C), me row 128
    pe = pe_ref[...]                                                      # (T, C)

    pieces = []
    for b in range(bb):                                                   # static unroll
        pieces += [tok_all[b * T:(b + 1) * T, :] + pe,
                   spec_all[b * SP:(b + 1) * SP, :],
                   mv_rows]
    x = jnp.concatenate(pieces, axis=0)                                   # (bb*S, C) f32

    # ---- transformer blocks (batch flattened for all projection / FFN matmuls) ----
    for l in range(n_layer):                                              # static unroll
        # x = x + c_proj(attn(ln_1(x)))   (dropout p=0 -> identity)
        h = _layernorm(x, ln1w_ref[l], ln1b_ref[l])
        # packed QKV projection: one (bb*S, C) @ (C, 3C) bf16 matmul; 1/sqrt(D) pre-folded into Q.
        qkv = (jnp.dot(h.astype(BF16), wqkv_ref[l],
                       preferred_element_type=f32) + bqkv_ref[l])         # (bb*S, 3C) f32

        y_blocks = []
        for b in range(bb):                                               # static: bb*n_head tiny dots
            qkv_b = qkv[b * S:(b + 1) * S, :]                             # (S, 3C)
            heads = []
            for hd in range(n_head):
                q = qkv_b[:, hd * D:(hd + 1) * D].astype(BF16)            # (S, D) bf16
                k = qkv_b[:, C + hd * D:C + (hd + 1) * D].astype(BF16)
                v = qkv_b[:, 2 * C + hd * D:2 * C + (hd + 1) * D].astype(BF16)
                s = jax.lax.dot_general(q, k, (((1,), (1,)), ((), ())),
                                        preferred_element_type=f32)       # (S, S) f32
                s = s - jnp.max(s, axis=-1, keepdims=True)
                p = jnp.exp(s)
                p = p * pl.reciprocal(jnp.sum(p, axis=-1, keepdims=True), approx=True)
                heads.append(jnp.dot(p.astype(BF16), v,
                                     preferred_element_type=f32))         # (S, D) f32
            y_blocks.append(jnp.concatenate(heads, axis=1))               # (S, C)
        y = jnp.concatenate(y_blocks, axis=0)                             # (bb*S, C), SSA (no scratch)

        x = x + jnp.dot(y.astype(BF16), wo_ref[l],
                        preferred_element_type=f32) + bo_ref[l]

        # x = x + c_proj(gelu(c_fc(ln_2(x))))
        h2 = _layernorm(x, ln2w_ref[l], ln2b_ref[l])
        ff = _gelu_tanh(jnp.dot(h2.astype(BF16), wfc_ref[l],
                                preferred_element_type=f32) + bfc_ref[l]) # (bb*S, 4C)
        x = x + jnp.dot(ff.astype(BF16), wcp_ref[l],
                        preferred_element_type=f32) + bcp_ref[l]

    # ---- ln_f + policy_head.fc on position 0 of every batch element ----
    x0 = jnp.concatenate([x[b * S:b * S + 1, :] for b in range(bb)], axis=0)   # (bb, C)
    h0 = _layernorm(x0, lnfw_ref[...], lnfb_ref[...])
    logits_ref[0] = (jnp.dot(h0.astype(BF16), wpol_ref[...],
                             preferred_element_type=f32)
                     + bpol_ref[...]).astype(logits_ref.dtype)            # (bb, 128), lane-dense


def fused_forward(board, special, p, *, n_shards=None):
    B, T = board.shape
    assert T == SQUARES_SIZE
    C, P = N_EMBD, N_POSSIBLE_MOVES
    if n_shards is None:
        # v7x: keep a 2-way "parallel" axis when the batch is big enough to keep the flattened
        # matmuls wide; otherwise collapse to a single grid step (v5e/v6e: grid is serial anyway).
        n_shards = 2 if (B >= 4 and B % 2 == 0) else 1
    assert B % n_shards == 0
    Bb = B // n_shards

    # per-shard, flat, trailing-dim-1 layouts so in-kernel one-hot / broadcasts stay 2-D.
    board3 = board.astype(jnp.int32).reshape(n_shards, Bb * T, 1)
    special3 = special.astype(jnp.float32).reshape(n_shards, Bb * SPECIAL_SIZE, 1)

    def const(shape):
        n = len(shape)
        return pl.BlockSpec(tuple(shape), lambda i, _n=n: (0,) * _n)      # full array, VMEM-resident

    in_specs = [
        pl.BlockSpec((1, Bb * T, 1), lambda i: (i, 0, 0)),
        pl.BlockSpec((1, Bb * SPECIAL_SIZE, 1), lambda i: (i, 0, 0)),
        const(p["te"].shape), const(p["pe"].shape), const(p["me"].shape),
        const(p["ln1w"].shape), const(p["ln1b"].shape),
        const(p["wqkv"].shape), const(p["bqkv"].shape),
        const(p["wo"].shape), const(p["bo"].shape),
        const(p["ln2w"].shape), const(p["ln2b"].shape),
        const(p["wfc"].shape), const(p["bfc"].shape),
        const(p["wcp"].shape), const(p["bcp"].shape),
        const(p["lnfw"].shape), const(p["lnfb"].shape),
        const(p["wpol"].shape), const(p["bpol"].shape),
    ]
    out_spec = pl.BlockSpec((1, Bb, P), lambda i: (i, 0, 0))              # 128-lane-dense block
    kernel = functools.partial(fused_forward_kernel,
                               n_layer=N_LAYER, n_head=N_HEAD, bb=Bb)
    logits3 = pl.pallas_call(
        kernel,
        grid_spec=pltpu.PrefetchScalarGridSpec(
            num_scalar_prefetch=0,
            grid=(n_shards,),
            in_specs=in_specs,
            out_specs=out_spec),
        out_shape=jax.ShapeDtypeStruct((n_shards, Bb, P), jnp.float32),
        compiler_params=pltpu.CompilerParams(dimension_semantics=("parallel",)),
    )(board3, special3, p["te"], p["pe"], p["me"],
      p["ln1w"], p["ln1b"], p["wqkv"], p["bqkv"], p["wo"], p["bo"],
      p["ln2w"], p["ln2b"], p["wfc"], p["bfc"], p["wcp"], p["bcp"],
      p["lnfw"], p["lnfb"], p["wpol"], p["bpol"])
    return logits3.reshape(B, P)                                          # (B, 128)


# ----------------------- deterministic parameter init (packed / stacked layout) -----------------------
def init_params(key):
    C, L, D, P = N_EMBD, N_LAYER, HEAD_DIM, N_POSSIBLE_MOVES
    keys = iter(jax.random.split(key, 64))
    a = 1.0 / math.sqrt(C)
    a4 = 1.0 / math.sqrt(4 * C)

    def u(shape, bound):
        return jax.random.uniform(next(keys), shape, jnp.float32, -bound, bound)

    # fold the 1/sqrt(D) attention scale into the Q columns of c_attn (weight AND bias)
    qkv_scale = jnp.concatenate([jnp.full((C,), 1.0 / math.sqrt(D), jnp.float32),
                                 jnp.ones((2 * C,), jnp.float32)])

    ln1w, ln1b, wqkv, bqkv, wo, bo = [], [], [], [], [], []
    ln2w, ln2b, wfc, bfc, wcp, bcp = [], [], [], [], [], []
    for _ in range(L):
        ln1w.append(jnp.ones((1, C), jnp.float32)); ln1b.append(jnp.zeros((1, C), jnp.float32))
        wqkv.append(u((C, 3 * C), a) * qkv_scale[None, :])
        bqkv.append(u((1, 3 * C), a) * qkv_scale[None, :])
        wo.append(u((C, C), a)); bo.append(u((1, C), a))
        ln2w.append(jnp.ones((1, C), jnp.float32)); ln2b.append(jnp.zeros((1, C), jnp.float32))
        wfc.append(u((C, 4 * C), a)); bfc.append(u((1, 4 * C), a))
        wcp.append(u((4 * C, C), a4)); bcp.append(u((1, C), a4))

    return dict(
        te=u((VOCAB_SIZE, C), a),
        pe=u((SQUARES_SIZE, C), a),
        me=u((N_POSSIBLE_MOVES + 1, C), a),
        # mre / se / policy_head.fc2 unused in this path (reevaluation_moves_tensor=None, 'first' pass).
        ln1w=jnp.stack(ln1w), ln1b=jnp.stack(ln1b),
        wqkv=jnp.stack(wqkv).astype(BF16), bqkv=jnp.stack(bqkv),
        wo=jnp.stack(wo).astype(BF16), bo=jnp.stack(bo),
        ln2w=jnp.stack(ln2w), ln2b=jnp.stack(ln2b),
        wfc=jnp.stack(wfc).astype(BF16), bfc=jnp.stack(bfc),
        wcp=jnp.stack(wcp).astype(BF16), bcp=jnp.stack(bcp),
        lnfw=jnp.ones((1, C), jnp.float32), lnfb=jnp.zeros((1, C), jnp.float32),
        wpol=u((C, P), a).astype(BF16), bpol=jnp.zeros((1, P), jnp.float32),
    )


# ----------------------- Chess.forward -----------------------
@functools.partial(jax.jit, static_argnums=(1,))
def chess_forward(params, top_k, board, special, target):
    # embeddings + 2 transformer blocks + ln_f + policy fc: one pallas_call
    logits = fused_forward(board, special, params)                        # (B, 128)

    # TODO(synk): torch.topk has no Pallas primitive; selection done with jax.lax.top_k outside the kernel.
    _, top_idx = jax.lax.top_k(logits, top_k)
    matches = (target[:, None] == top_idx).any(axis=1)
    return jnp.sum(matches.astype(jnp.int32))                             # num_matches


if __name__ == "__main__":
    key = jax.random.PRNGKey(0)
    kp, kb, ks, kt = jax.random.split(key, 4)
    params = init_params(kp)

    B = 2
    top_k = 5
    board_state_tensor = jax.random.randint(kb, (B, SQUARES_SIZE), 0, VOCAB_SIZE, jnp.int32)
    special_token_tensor = jax.random.uniform(ks, (B, SPECIAL_SIZE), jnp.float32)
    target_p_tensor = jax.random.randint(kt, (B,), 0, N_POSSIBLE_MOVES, jnp.int32)

    num_matches = chess_forward(params, top_k, board_state_tensor,
                                special_token_tensor, target_p_tensor)
    num_matches = jax.block_until_ready(num_matches)
    _ = int(num_matches)  # .item() equivalent
    print("KERNEL_OK")
</pallas_src>

<mosaic_0001>
module attributes {stable_mosaic.version = 11 : i64} {
  func.func @fused_forward_kernel(%arg0: i32, %arg1: memref<1x32x1xi32, #tpu.memory_space<vmem>>, %arg2: memref<1x4x1xf32, #tpu.memory_space<vmem>>, %arg3: memref<16x32xf32, #tpu.memory_space<vmem>>, %arg4: memref<16x32xf32, #tpu.memory_space<vmem>>, %arg5: memref<129x32xf32, #tpu.memory_space<vmem>>, %arg6: memref<2x1x32xf32, #tpu.memory_space<vmem>>, %arg7: memref<2x1x32xf32, #tpu.memory_space<vmem>>, %arg8: memref<2x32x96xbf16, #tpu.memory_space<vmem>>, %arg9: memref<2x1x96xf32, #tpu.memory_space<vmem>>, %arg10: memref<2x32x32xbf16, #tpu.memory_space<vmem>>, %arg11: memref<2x1x32xf32, #tpu.memory_space<vmem>>, %arg12: memref<2x1x32xf32, #tpu.memory_space<vmem>>, %arg13: memref<2x1x32xf32, #tpu.memory_space<vmem>>, %arg14: memref<2x32x128xbf16, #tpu.memory_space<vmem>>, %arg15: memref<2x1x128xf32, #tpu.memory_space<vmem>>, %arg16: memref<2x128x32xbf16, #tpu.memory_space<vmem>>, %arg17: memref<2x1x32xf32, #tpu.memory_space<vmem>>, %arg18: memref<1x32xf32, #tpu.memory_space<vmem>>, %arg19: memref<1x32xf32, #tpu.memory_space<vmem>>, %arg20: memref<32x128xbf16, #tpu.memory_space<vmem>>, %arg21: memref<1x128xf32, #tpu.memory_space<vmem>>, %arg22: memref<1x2x128xf32, #tpu.memory_space<vmem>>) attributes {dimension_semantics = [#tpu.dimension_semantics<parallel>], iteration_bounds = array<i64: 1>, scalar_prefetch = 0 : i64, scratch_operands = 0 : i64, tpu.core_type = #tpu.core_type<tc>, window_params = [{transform_indices = @transform_0, window_bounds = array<i64: 1, 32, 1>}, {transform_indices = @transform_1, window_bounds = array<i64: 1, 4, 1>}, {pipeline_mode = #tpu.pipeline_mode<synchronous>, transform_indices = @transform_2, window_bounds = array<i64: 16, 32>}, {pipeline_mode = #tpu.pipeline_mode<synchronous>, transform_indices = @transform_3, window_bounds = array<i64: 16, 32>}, {pipeline_mode = #tpu.pipeline_mode<synchronous>, transform_indices = @transform_4, window_bounds = array<i64: 129, 32>}, {pipeline_mode = #tpu.pipeline_mode<synchronous>, transform_indices = @transform_5, window_bounds = array<i64: 2, 1, 32>}, {pipeline_mode = #tpu.pipeline_mode<synchronous>, transform_indices = @transform_6, window_bounds = array<i64: 2, 1, 32>}, {pipeline_mode = #tpu.pipeline_mode<synchronous>, transform_indices = @transform_7, window_bounds = array<i64: 2, 32, 96>}, {pipeline_mode = #tpu.pipeline_mode<synchronous>, transform_indices = @transform_8, window_bounds = array<i64: 2, 1, 96>}, {pipeline_mode = #tpu.pipeline_mode<synchronous>, transform_indices = @transform_9, window_bounds = array<i64: 2, 32, 32>}, {pipeline_mode = #tpu.pipeline_mode<synchronous>, transform_indices = @transform_10, window_bounds = array<i64: 2, 1, 32>}, {pipeline_mode = #tpu.pipeline_mode<synchronous>, transform_indices = @transform_11, window_bounds = array<i64: 2, 1, 32>}, {pipeline_mode = #tpu.pipeline_mode<synchronous>, transform_indices = @transform_12, window_bounds = array<i64: 2, 1, 32>}, {pipeline_mode = #tpu.pipeline_mode<synchronous>, transform_indices = @transform_13, window_bounds = array<i64: 2, 32, 128>}, {pipeline_mode = #tpu.pipeline_mode<synchronous>, transform_indices = @transform_14, window_bounds = array<i64: 2, 1, 128>}, {pipeline_mode = #tpu.pipeline_mode<synchronous>, transform_indices = @transform_15, window_bounds = array<i64: 2, 128, 32>}, {pipeline_mode = #tpu.pipeline_mode<synchronous>, transform_indices = @transform_16, window_bounds = array<i64: 2, 1, 32>}, {pipeline_mode = #tpu.pipeline_mode<synchronous>, transform_indices = @transform_17, window_bounds = array<i64: 1, 32>}, {pipeline_mode = #tpu.pipeline_mode<synchronous>, transform_indices = @transform_18, window_bounds = array<i64: 1, 32>}, {pipeline_mode = #tpu.pipeline_mode<synchronous>, transform_indices = @transform_19, window_bounds = array<i64: 32, 128>}, {pipeline_mode = #tpu.pipeline_mode<synchronous>, transform_indices = @transform_20, window_bounds = array<i64: 1, 128>}, {transform_indices = @transform_21, window_bounds = array<i64: 1, 2, 128>}]} {
    %c0 = arith.constant 0 : index
    %c0_0 = arith.constant 0 : index
    %c0_1 = arith.constant 0 : index
    %0 = vector.load %arg1[%c0, %c0_0, %c0_1] : memref<1x32x1xi32, #tpu.memory_space<vmem>>, vector<1x32x1xi32>
    %1 = vector.shape_cast %0 : vector<1x32x1xi32> to vector<32x1xi32>
    %2 = tpu.iota {dimensions = array<i32: 1>} : vector<32x16xi32>
    %3 = vector.broadcast %1 : vector<32x1xi32> to vector<32x16xi32>
    %4 = arith.cmpi eq, %3, %2 : vector<32x16xi32>
    %5 = arith.extui %4 : vector<32x16xi1> to vector<32x16xi32>
    %6 = arith.sitofp %5 : vector<32x16xi32> to vector<32x16xf32>
    %c0_2 = arith.constant 0 : index
    %c0_3 = arith.constant 0 : index
    %7 = vector.load %arg3[%c0_2, %c0_3] : memref<16x32xf32, #tpu.memory_space<vmem>>, vector<16x32xf32>
    %cst = arith.constant dense<0.000000e+00> : vector<32x32xf32>
    %8 = tpu.matmul %6, %7, %cst {dimension_numbers = #tpu.dot_dimension_numbers<[1], [0], [0], [1], [0, 0, 1, 1], [], []>} : vector<32x16xf32>, vector<16x32xf32>, vector<32x32xf32> -> vector<32x32xf32>
    %c0_4 = arith.constant 0 : index
    %c0_5 = arith.constant 0 : index
    %c0_6 = arith.constant 0 : index
    %9 = vector.load %arg2[%c0_4, %c0_5, %c0_6] : memref<1x4x1xf32, #tpu.memory_space<vmem>>, vector<1x4x1xf32>
    %10 = vector.shape_cast %9 : vector<1x4x1xf32> to vector<4x1xf32>
    %11 = vector.shape_cast %10 : vector<4x1xf32> to vector<4x1xf32>
    %12 = vector.broadcast %11 : vector<4x1xf32> to vector<4x32xf32>
    %c128 = arith.constant 128 : index
    %c0_7 = arith.constant 0 : index
    %13 = vector.load %arg5[%c128, %c0_7] : memref<129x32xf32, #tpu.memory_space<vmem>>, vector<1x32xf32>
    %14 = vector.shape_cast %13 : vector<1x32xf32> to vector<1x32xf32>
    %15 = vector.broadcast %14 : vector<1x32xf32> to vector<3x32xf32>
    %c0_8 = arith.constant 0 : index
    %c0_9 = arith.constant 0 : index
    %16 = vector.load %arg4[%c0_8, %c0_9] : memref<16x32xf32, #tpu.memory_space<vmem>>, vector<16x32xf32>
    %17 = vector.extract_strided_slice %8 {offsets = [0, 0], sizes = [16, 32], strides = [1, 1]} : vector<32x32xf32> to vector<16x32xf32>
    %18 = arith.addf %17, %16 : vector<16x32xf32>
    %19 = vector.extract_strided_slice %12 {offsets = [0, 0], sizes = [2, 32], strides = [1, 1]} : vector<4x32xf32> to vector<2x32xf32>
    %20 = vector.extract_strided_slice %8 {offsets = [16, 0], sizes = [16, 32], strides = [1, 1]} : vector<32x32xf32> to vector<16x32xf32>
    %21 = arith.addf %20, %16 : vector<16x32xf32>
    %22 = vector.extract_strided_slice %12 {offsets = [2, 0], sizes = [2, 32], strides = [1, 1]} : vector<4x32xf32> to vector<2x32xf32>
    %23 = tpu.concatenate %18, %19, %15, %21, %22, %15 in 0 : vector<16x32xf32>, vector<2x32xf32>, vector<3x32xf32>, vector<16x32xf32>, vector<2x32xf32>, vector<3x32xf32> -> vector<42x32xf32>
    %c0_10 = arith.constant 0 : index
    %c0_11 = arith.constant 0 : index
    %c0_12 = arith.constant 0 : index
    %24 = vector.load %arg6[%c0_10, %c0_11, %c0_12] : memref<2x1x32xf32, #tpu.memory_space<vmem>>, vector<1x1x32xf32>
    %25 = vector.shape_cast %24 : vector<1x1x32xf32> to vector<1x32xf32>
    %c0_13 = arith.constant 0 : index
    %c0_14 = arith.constant 0 : index
    %c0_15 = arith.constant 0 : index
    %26 = vector.load %arg7[%c0_13, %c0_14, %c0_15] : memref<2x1x32xf32, #tpu.memory_space<vmem>>, vector<1x1x32xf32>
    %27 = vector.shape_cast %26 : vector<1x1x32xf32> to vector<1x32xf32>
    %cst_16 = arith.constant dense<0.000000e+00> : vector<42xf32>
    %28 = vector.multi_reduction <add>, %23, %cst_16 [1] : vector<42x32xf32> to vector<42xf32>
    %29 = vector.shape_cast %28 : vector<42xf32> to vector<42x1xf32>
    %cst_17 = arith.constant 3.200000e+01 : f32
    %30 = vector.broadcast %cst_17 : f32 to vector<42x1xf32>
    %31 = arith.divf %29, %30 : vector<42x1xf32>
    %32 = vector.broadcast %31 : vector<42x1xf32> to vector<42x32xf32>
    %33 = arith.subf %23, %32 : vector<42x32xf32>
    %34 = arith.mulf %33, %33 : vector<42x32xf32>
    %cst_18 = arith.constant dense<0.000000e+00> : vector<42xf32>
    %35 = vector.multi_reduction <add>, %34, %cst_18 [1] : vector<42x32xf32> to vector<42xf32>
    %36 = vector.shape_cast %35 : vector<42xf32> to vector<42x1xf32>
    %cst_19 = arith.constant 3.200000e+01 : f32
    %37 = vector.broadcast %cst_19 : f32 to vector<42x1xf32>
    %38 = arith.divf %36, %37 : vector<42x1xf32>
    %cst_20 = arith.constant 9.99999974E-6 : f32
    %39 = vector.broadcast %cst_20 : f32 to vector<42x1xf32>
    %40 = arith.addf %38, %39 : vector<42x1xf32>
    %41 = math.rsqrt %40 : vector<42x1xf32>
    %42 = vector.broadcast %41 : vector<42x1xf32> to vector<42x32xf32>
    %43 = arith.mulf %33, %42 : vector<42x32xf32>
    %44 = vector.broadcast %25 : vector<1x32xf32> to vector<42x32xf32>
    %45 = arith.mulf %43, %44 : vector<42x32xf32>
    %46 = vector.broadcast %27 : vector<1x32xf32> to vector<42x32xf32>
    %47 = arith.addf %45, %46 : vector<42x32xf32>
    %48 = arith.truncf %47 : vector<42x32xf32> to vector<42x32xbf16>
    %c0_21 = arith.constant 0 : index
    %c0_22 = arith.constant 0 : index
    %c0_23 = arith.constant 0 : index
    %49 = vector.load %arg8[%c0_21, %c0_22, %c0_23] : memref<2x32x96xbf16, #tpu.memory_space<vmem>>, vector<1x32x96xbf16>
    %50 = vector.shape_cast %49 : vector<1x32x96xbf16> to vector<32x96xbf16>
    %cst_24 = arith.constant dense<0.000000e+00> : vector<42x96xf32>
    %51 = tpu.matmul %48, %50, %cst_24 {dimension_numbers = #tpu.dot_dimension_numbers<[1], [0], [0], [1], [0, 0, 1, 1], [], []>} : vector<42x32xbf16>, vector<32x96xbf16>, vector<42x96xf32> -> vector<42x96xf32>
    %c0_25 = arith.constant 0 : index
    %c0_26 = arith.constant 0 : index
    %c0_27 = arith.constant 0 : index
    %52 = vector.load %arg9[%c0_25, %c0_26, %c0_27] : memref<2x1x96xf32, #tpu.memory_space<vmem>>, vector<1x1x96xf32>
    %53 = vector.shape_cast %52 : vector<1x1x96xf32> to vector<1x96xf32>
    %54 = vector.broadcast %53 : vector<1x96xf32> to vector<42x96xf32>
    %55 = arith.addf %51, %54 : vector<42x96xf32>
    %56 = vector.extract_strided_slice %55 {offsets = [0, 0], sizes = [21, 96], strides = [1, 1]} : vector<42x96xf32> to vector<21x96xf32>
    %57 = vector.extract_strided_slice %56 {offsets = [0, 0], sizes = [21, 8], strides = [1, 1]} : vector<21x96xf32> to vector<21x8xf32>
    %58 = arith.truncf %57 : vector<21x8xf32> to vector<21x8xbf16>
    %59 = vector.extract_strided_slice %56 {offsets = [0, 32], sizes = [21, 8], strides = [1, 1]} : vector<21x96xf32> to vector<21x8xf32>
    %60 = arith.truncf %59 : vector<21x8xf32> to vector<21x8xbf16>
    %61 = vector.extract_strided_slice %56 {offsets = [0, 64], sizes = [21, 8], strides = [1, 1]} : vector<21x96xf32> to vector<21x8xf32>
    %62 = arith.truncf %61 : vector<21x8xf32> to vector<21x8xbf16>
    %cst_28 = arith.constant dense<0.000000e+00> : vector<21x21xf32>
    %63 = tpu.matmul %58, %60, %cst_28 {dimension_numbers = #tpu.dot_dimension_numbers<[1], [1], [0], [0], [0, 0, 1, 0], [], []>} : vector<21x8xbf16>, vector<21x8xbf16>, vector<21x21xf32> -> vector<21x21xf32>
    %cst_29 = arith.constant dense<0xFF800000> : vector<21xf32>
    %64 = vector.multi_reduction <maximumf>, %63, %cst_29 [1] : vector<21x21xf32> to vector<21xf32>
    %65 = vector.shape_cast %64 : vector<21xf32> to vector<21x1xf32>
    %66 = vector.broadcast %65 : vector<21x1xf32> to vector<21x21xf32>
    %67 = arith.subf %63, %66 : vector<21x21xf32>
    %68 = math.exp %67 : vector<21x21xf32>
    %cst_30 = arith.constant dense<0.000000e+00> : vector<21xf32>
    %69 = vector.multi_reduction <add>, %68, %cst_30 [1] : vector<21x21xf32> to vector<21xf32>
    %70 = vector.shape_cast %69 : vector<21xf32> to vector<21x1xf32>
    %71 = tpu.reciprocal %70 {approx = true} : vector<21x1xf32> -> vector<21x1xf32>
    %72 = vector.broadcast %71 : vector<21x1xf32> to vector<21x21xf32>
    %73 = arith.mulf %68, %72 : vector<21x21xf32>
    %74 = arith.truncf %73 : vector<21x21xf32> to vector<21x21xbf16>
    %cst_31 = arith.constant dense<0.000000e+00> : vector<21x8xf32>
    %75 = tpu.matmul %74, %62, %cst_31 {dimension_numbers = #tpu.dot_dimension_numbers<[1], [0], [0], [1], [0, 0, 1, 1], [], []>} : vector<21x21xbf16>, vector<21x8xbf16>, vector<21x8xf32> -> vector<21x8xf32>
    %76 = vector.extract_strided_slice %56 {offsets = [0, 8], sizes = [21, 8], strides = [1, 1]} : vector<21x96xf32> to vector<21x8xf32>
    %77 = arith.truncf %76 : vector<21x8xf32> to vector<21x8xbf16>
    %78 = vector.extract_strided_slice %56 {offsets = [0, 40], sizes = [21, 8], strides = [1, 1]} : vector<21x96xf32> to vector<21x8xf32>
    %79 = arith.truncf %78 : vector<21x8xf32> to vector<21x8xbf16>
    %80 = vector.extract_strided_slice %56 {offsets = [0, 72], sizes = [21, 8], strides = [1, 1]} : vector<21x96xf32> to vector<21x8xf32>
    %81 = arith.truncf %80 : vector<21x8xf32> to vector<21x8xbf16>
    %cst_32 = arith.constant dense<0.000000e+00> : vector<21x21xf32>
    %82 = tpu.matmul %77, %79, %cst_32 {dimension_numbers = #tpu.dot_dimension_numbers<[1], [1], [0], [0], [0, 0, 1, 0], [], []>} : vector<21x8xbf16>, vector<21x8xbf16>, vector<21x21xf32> -> vector<21x21xf32>
    %cst_33 = arith.constant dense<0xFF800000> : vector<21xf32>
    %83 = vector.multi_reduction <maximumf>, %82, %cst_33 [1] : vector<21x21xf32> to vector<21xf32>
    %84 = vector.shape_cast %83 : vector<21xf32> to vector<21x1xf32>
    %85 = vector.broadcast %84 : vector<21x1xf32> to vector<21x21xf32>
    %86 = arith.subf %82, %85 : vector<21x21xf32>
    %87 = math.exp %86 : vector<21x21xf32>
    %cst_34 = arith.constant dense<0.000000e+00> : vector<21xf32>
    %88 = vector.multi_reduction <add>, %87, %cst_34 [1] : vector<21x21xf32> to vector<21xf32>
    %89 = vector.shape_cast %88 : vector<21xf32> to vector<21x1xf32>
    %90 = tpu.reciprocal %89 {approx = true} : vector<21x1xf32> -> vector<21x1xf32>
    %91 = vector.broadcast %90 : vector<21x1xf32> to vector<21x21xf32>
    %92 = arith.mulf %87, %91 : vector<21x21xf32>
    %93 = arith.truncf %92 : vector<21x21xf32> to vector<21x21xbf16>
    %cst_35 = arith.constant dense<0.000000e+00> : vector<21x8xf32>
    %94 = tpu.matmul %93, %81, %cst_35 {dimension_numbers = #tpu.dot_dimension_numbers<[1], [0], [0], [1], [0, 0, 1, 1], [], []>} : vector<21x21xbf16>, vector<21x8xbf16>, vector<21x8xf32> -> vector<21x8xf32>
    %95 = vector.extract_strided_slice %56 {offsets = [0, 16], sizes = [21, 8], strides = [1, 1]} : vector<21x96xf32> to vector<21x8xf32>
    %96 = arith.truncf %95 : vector<21x8xf32> to vector<21x8xbf16>
    %97 = vector.extract_strided_slice %56 {offsets = [0, 48], sizes = [21, 8], strides = [1, 1]} : vector<21x96xf32> to vector<21x8xf32>
    %98 = arith.truncf %97 : vector<21x8xf32> to vector<21x8xbf16>
    %99 = vector.extract_strided_slice %56 {offsets = [0, 80], sizes = [21, 8], strides = [1, 1]} : vector<21x96xf32> to vector<21x8xf32>
    %100 = arith.truncf %99 : vector<21x8xf32> to vector<21x8xbf16>
    %cst_36 = arith.constant dense<0.000000e+00> : vector<21x21xf32>
    %101 = tpu.matmul %96, %98, %cst_36 {dimension_numbers = #tpu.dot_dimension_numbers<[1], [1], [0], [0], [0, 0, 1, 0], [], []>} : vector<21x8xbf16>, vector<21x8xbf16>, vector<21x21xf32> -> vector<21x21xf32>
    %cst_37 = arith.constant dense<0xFF800000> : vector<21xf32>
    %102 = vector.multi_reduction <maximumf>, %101, %cst_37 [1] : vector<21x21xf32> to vector<21xf32>
    %103 = vector.shape_cast %102 : vector<21xf32> to vector<21x1xf32>
    %104 = vector.broadcast %103 : vector<21x1xf32> to vector<21x21xf32>
    %105 = arith.subf %101, %104 : vector<21x21xf32>
    %106 = math.exp %105 : vector<21x21xf32>
    %cst_38 = arith.constant dense<0.000000e+00> : vector<21xf32>
    %107 = vector.multi_reduction <add>, %106, %cst_38 [1] : vector<21x21xf32> to vector<21xf32>
    %108 = vector.shape_cast %107 : vector<21xf32> to vector<21x1xf32>
    %109 = tpu.reciprocal %108 {approx = true} : vector<21x1xf32> -> vector<21x1xf32>
    %110 = vector.broadcast %109 : vector<21x1xf32> to vector<21x21xf32>
    %111 = arith.mulf %106, %110 : vector<21x21xf32>
    %112 = arith.truncf %111 : vector<21x21xf32> to vector<21x21xbf16>
    %cst_39 = arith.constant dense<0.000000e+00> : vector<21x8xf32>
    %113 = tpu.matmul %112, %100, %cst_39 {dimension_numbers = #tpu.dot_dimension_numbers<[1], [0], [0], [1], [0, 0, 1, 1], [], []>} : vector<21x21xbf16>, vector<21x8xbf16>, vector<21x8xf32> -> vector<21x8xf32>
    %114 = vector.extract_strided_slice %56 {offsets = [0, 24], sizes = [21, 8], strides = [1, 1]} : vector<21x96xf32> to vector<21x8xf32>
    %115 = arith.truncf %114 : vector<21x8xf32> to vector<21x8xbf16>
    %116 = vector.extract_strided_slice %56 {offsets = [0, 56], sizes = [21, 8], strides = [1, 1]} : vector<21x96xf32> to vector<21x8xf32>
    %117 = arith.truncf %116 : vector<21x8xf32> to vector<21x8xbf16>
    %118 = vector.extract_strided_slice %56 {offsets = [0, 88], sizes = [21, 8], strides = [1, 1]} : vector<21x96xf32> to vector<21x8xf32>
    %119 = arith.truncf %118 : vector<21x8xf32> to vector<21x8xbf16>
    %cst_40 = arith.constant dense<0.000000e+00> : vector<21x21xf32>
    %120 = tpu.matmul %115, %117, %cst_40 {dimension_numbers = #tpu.dot_dimension_numbers<[1], [1], [0], [0], [0, 0, 1, 0], [], []>} : vector<21x8xbf16>, vector<21x8xbf16>, vector<21x21xf32> -> vector<21x21xf32>
    %cst_41 = arith.constant dense<0xFF800000> : vector<21xf32>
    %121 = vector.multi_reduction <maximumf>, %120, %cst_41 [1] : vector<21x21xf32> to vector<21xf32>
    %122 = vector.shape_cast %121 : vector<21xf32> to vector<21x1xf32>
    %123 = vector.broadcast %122 : vector<21x1xf32> to vector<21x21xf32>
    %124 = arith.subf %120, %123 : vector<21x21xf32>
    %125 = math.exp %124 : vector<21x21xf32>
    %cst_42 = arith.constant dense<0.000000e+00> : vector<21xf32>
    %126 = vector.multi_reduction <add>, %125, %cst_42 [1] : vector<21x21xf32> to vector<21xf32>
    %127 = vector.shape_cast %126 : vector<21xf32> to vector<21x1xf32>
    %128 = tpu.reciprocal %127 {approx = true} : vector<21x1xf32> -> vector<21x1xf32>
    %129 = vector.broadcast %128 : vector<21x1xf32> to vector<21x21xf32>
    %130 = arith.mulf %125, %129 : vector<21x21xf32>
    %131 = arith.truncf %130 : vector<21x21xf32> to vector<21x21xbf16>
    %cst_43 = arith.constant dense<0.000000e+00> : vector<21x8xf32>
    %132 = tpu.matmul %131, %119, %cst_43 {dimension_numbers = #tpu.dot_dimension_numbers<[1], [0], [0], [1], [0, 0, 1, 1], [], []>} : vector<21x21xbf16>, vector<21x8xbf16>, vector<21x8xf32> -> vector<21x8xf32>
    %133 = tpu.concatenate %75, %94, %113, %132 in 1 : vector<21x8xf32>, vector<21x8xf32>, vector<21x8xf32>, vector<21x8xf32> -> vector<21x32xf32>
    %134 = vector.extract_strided_slice %55 {offsets = [21, 0], sizes = [21, 96], strides = [1, 1]} : vector<42x96xf32> to vector<21x96xf32>
    %135 = vector.extract_strided_slice %134 {offsets = [0, 0], sizes = [21, 8], strides = [1, 1]} : vector<21x96xf32> to vector<21x8xf32>
    %136 = arith.truncf %135 : vector<21x8xf32> to vector<21x8xbf16>
    %137 = vector.extract_strided_slice %134 {offsets = [0, 32], sizes = [21, 8], strides = [1, 1]} : vector<21x96xf32> to vector<21x8xf32>
    %138 = arith.truncf %137 : vector<21x8xf32> to vector<21x8xbf16>
    %139 = vector.extract_strided_slice %134 {offsets = [0, 64], sizes = [21, 8], strides = [1, 1]} : vector<21x96xf32> to vector<21x8xf32>
    %140 = arith.truncf %139 : vector<21x8xf32> to vector<21x8xbf16>
    %cst_44 = arith.constant dense<0.000000e+00> : vector<21x21xf32>
    %141 = tpu.matmul %136, %138, %cst_44 {dimension_numbers = #tpu.dot_dimension_numbers<[1], [1], [0], [0], [0, 0, 1, 0], [], []>} : vector<21x8xbf16>, vector<21x8xbf16>, vector<21x21xf32> -> vector<21x21xf32>
    %cst_45 = arith.constant dense<0xFF800000> : vector<21xf32>
    %142 = vector.multi_reduction <maximumf>, %141, %cst_45 [1] : vector<21x21xf32> to vector<21xf32>
    %143 = vector.shape_cast %142 : vector<21xf32> to vector<21x1xf32>
    %144 = vector.broadcast %143 : vector<21x1xf32> to vector<21x21xf32>
    %145 = arith.subf %141, %144 : vector<21x21xf32>
    %146 = math.exp %145 : vector<21x21xf32>
    %cst_46 = arith.constant dense<0.000000e+00> : vector<21xf32>
    %147 = vector.multi_reduction <add>, %146, %cst_46 [1] : vector<21x21xf32> to vector<21xf32>
    %148 = vector.shape_cast %147 : vector<21xf32> to vector<21x1xf32>
    %149 = tpu.reciprocal %148 {approx = true} : vector<21x1xf32> -> vector<21x1xf32>
    %150 = vector.broadcast %149 : vector<21x1xf32> to vector<21x21xf32>
    %151 = arith.mulf %146, %150 : vector<21x21xf32>
    %152 = arith.truncf %151 : vector<21x21xf32> to vector<21x21xbf16>
    %cst_47 = arith.constant dense<0.000000e+00> : vector<21x8xf32>
    %153 = tpu.matmul %152, %140, %cst_47 {dimension_numbers = #tpu.dot_dimension_numbers<[1], [0], [0], [1], [0, 0, 1, 1], [], []>} : vector<21x21xbf16>, vector<21x8xbf16>, vector<21x8xf32> -> vector<21x8xf32>
    %154 = vector.extract_strided_slice %134 {offsets = [0, 8], sizes = [21, 8], strides = [1, 1]} : vector<21x96xf32> to vector<21x8xf32>
    %155 = arith.truncf %154 : vector<21x8xf32> to vector<21x8xbf16>
    %156 = vector.extract_strided_slice %134 {offsets = [0, 40], sizes = [21, 8], strides = [1, 1]} : vector<21x96xf32> to vector<21x8xf32>
    %157 = arith.truncf %156 : vector<21x8xf32> to vector<21x8xbf16>
    %158 = vector.extract_strided_slice %134 {offsets = [0, 72], sizes = [21, 8], strides = [1, 1]} : vector<21x96xf32> to vector<21x8xf32>
    %159 = arith.truncf %158 : vector<21x8xf32> to vector<21x8xbf16>
    %cst_48 = arith.constant dense<0.000000e+00> : vector<21x21xf32>
    %160 = tpu.matmul %155, %157, %cst_48 {dimension_numbers = #tpu.dot_dimension_numbers<[1], [1], [0], [0], [0, 0, 1, 0], [], []>} : vector<21x8xbf16>, vector<21x8xbf16>, vector<21x21xf32> -> vector<21x21xf32>
    %cst_49 = arith.constant dense<0xFF800000> : vector<21xf32>
    %161 = vector.multi_reduction <maximumf>, %160, %cst_49 [1] : vector<21x21xf32> to vector<21xf32>
    %162 = vector.shape_cast %161 : vector<21xf32> to vector<21x1xf32>
    %163 = vector.broadcast %162 : vector<21x1xf32> to vector<21x21xf32>
    %164 = arith.subf %160, %163 : vector<21x21xf32>
    %165 = math.exp %164 : vector<21x21xf32>
    %cst_50 = arith.constant dense<0.000000e+00> : vector<21xf32>
    %166 = vector.multi_reduction <add>, %165, %cst_50 [1] : vector<21x21xf32> to vector<21xf32>
    %167 = vector.shape_cast %166 : vector<21xf32> to vector<21x1xf32>
    %168 = tpu.reciprocal %167 {approx = true} : vector<21x1xf32> -> vector<21x1xf32>
    %169 = vector.broadcast %168 : vector<21x1xf32> to vector<21x21xf32>
    %170 = arith.mulf %165, %169 : vector<21x21xf32>
    %171 = arith.truncf %170 : vector<21x21xf32> to vector<21x21xbf16>
    %cst_51 = arith.constant dense<0.000000e+00> : vector<21x8xf32>
    %172 = tpu.matmul %171, %159, %cst_51 {dimension_numbers = #tpu.dot_dimension_numbers<[1], [0], [0], [1], [0, 0, 1, 1], [], []>} : vector<21x21xbf16>, vector<21x8xbf16>, vector<21x8xf32> -> vector<21x8xf32>
    %173 = vector.extract_strided_slice %134 {offsets = [0, 16], sizes = [21, 8], strides = [1, 1]} : vector<21x96xf32> to vector<21x8xf32>
    %174 = arith.truncf %173 : vector<21x8xf32> to vector<21x8xbf16>
    %175 = vector.extract_strided_slice %134 {offsets = [0, 48], sizes = [21, 8], strides = [1, 1]} : vector<21x96xf32> to vector<21x8xf32>
    %176 = arith.truncf %175 : vector<21x8xf32> to vector<21x8xbf16>
    %177 = vector.extract_strided_slice %134 {offsets = [0, 80], sizes = [21, 8], strides = [1, 1]} : vector<21x96xf32> to vector<21x8xf32>
    %178 = arith.truncf %177 : vector<21x8xf32> to vector<21x8xbf16>
    %cst_52 = arith.constant dense<0.000000e+00> : vector<21x21xf32>
    %179 = tpu.matmul %174, %176, %cst_52 {dimension_numbers = #tpu.dot_dimension_numbers<[1], [1], [0], [0], [0, 0, 1, 0], [], []>} : vector<21x8xbf16>, vector<21x8xbf16>, vector<21x21xf32> -> vector<21x21xf32>
    %cst_53 = arith.constant dense<0xFF800000> : vector<21xf32>
    %180 = vector.multi_reduction <maximumf>, %179, %cst_53 [1] : vector<21x21xf32> to vector<21xf32>
    %181 = vector.shape_cast %180 : vector<21xf32> to vector<21x1xf32>
    %182 = vector.broadcast %181 : vector<21x1xf32> to vector<21x21xf32>
    %183 = arith.subf %179, %182 : vector<21x21xf32>
    %184 = math.exp %183 : vector<21x21xf32>
    %cst_54 = arith.constant dense<0.000000e+00> : vector<21xf32>
    %185 = vector.multi_reduction <add>, %184, %cst_54 [1] : vector<21x21xf32> to vector<21xf32>
    %186 = vector.shape_cast %185 : vector<21xf32> to vector<21x1xf32>
    %187 = tpu.reciprocal %186 {approx = true} : vector<21x1xf32> -> vector<21x1xf32>
    %188 = vector.broadcast %187 : vector<21x1xf32> to vector<21x21xf32>
    %189 = arith.mulf %184, %188 : vector<21x21xf32>
    %190 = arith.truncf %189 : vector<21x21xf32> to vector<21x21xbf16>
    %cst_55 = arith.constant dense<0.000000e+00> : vector<21x8xf32>
    %191 = tpu.matmul %190, %178, %cst_55 {dimension_numbers = #tpu.dot_dimension_numbers<[1], [0], [0], [1], [0, 0, 1, 1], [], []>} : vector<21x21xbf16>, vector<21x8xbf16>, vector<21x8xf32> -> vector<21x8xf32>
    %192 = vector.extract_strided_slice %134 {offsets = [0, 24], sizes = [21, 8], strides = [1, 1]} : vector<21x96xf32> to vector<21x8xf32>
    %193 = arith.truncf %192 : vector<21x8xf32> to vector<21x8xbf16>
    %194 = vector.extract_strided_slice %134 {offsets = [0, 56], sizes = [21, 8], strides = [1, 1]} : vector<21x96xf32> to vector<21x8xf32>
    %195 = arith.truncf %194 : vector<21x8xf32> to vector<21x8xbf16>
    %196 = vector.extract_strided_slice %134 {offsets = [0, 88], sizes = [21, 8], strides = [1, 1]} : vector<21x96xf32> to vector<21x8xf32>
    %197 = arith.truncf %196 : vector<21x8xf32> to vector<21x8xbf16>
    %cst_56 = arith.constant dense<0.000000e+00> : vector<21x21xf32>
    %198 = tpu.matmul %193, %195, %cst_56 {dimension_numbers = #tpu.dot_dimension_numbers<[1], [1], [0], [0], [0, 0, 1, 0], [], []>} : vector<21x8xbf16>, vector<21x8xbf16>, vector<21x21xf32> -> vector<21x21xf32>
    %cst_57 = arith.constant dense<0xFF800000> : vector<21xf32>
    %199 = vector.multi_reduction <maximumf>, %198, %cst_57 [1] : vector<21x21xf32> to vector<21xf32>
    %200 = vector.shape_cast %199 : vector<21xf32> to vector<21x1xf32>
    %201 = vector.broadcast %200 : vector<21x1xf32> to vector<21x21xf32>
    %202 = arith.subf %198, %201 : vector<21x21xf32>
    %203 = math.exp %202 : vector<21x21xf32>
    %cst_58 = arith.constant dense<0.000000e+00> : vector<21xf32>
    %204 = vector.multi_reduction <add>, %203, %cst_58 [1] : vector<21x21xf32> to vector<21xf32>
    %205 = vector.shape_cast %204 : vector<21xf32> to vector<21x1xf32>
    %206 = tpu.reciprocal %205 {approx = true} : vector<21x1xf32> -> vector<21x1xf32>
    %207 = vector.broadcast %206 : vector<21x1xf32> to vector<21x21xf32>
    %208 = arith.mulf %203, %207 : vector<21x21xf32>
    %209 = arith.truncf %208 : vector<21x21xf32> to vector<21x21xbf16>
    %cst_59 = arith.constant dense<0.000000e+00> : vector<21x8xf32>
    %210 = tpu.matmul %209, %197, %cst_59 {dimension_numbers = #tpu.dot_dimension_numbers<[1], [0], [0], [1], [0, 0, 1, 1], [], []>} : vector<21x21xbf16>, vector<21x8xbf16>, vector<21x8xf32> -> vector<21x8xf32>
    %211 = tpu.concatenate %153, %172, %191, %210 in 1 : vector<21x8xf32>, vector<21x8xf32>, vector<21x8xf32>, vector<21x8xf32> -> vector<21x32xf32>
    %212 = tpu.concatenate %133, %211 in 0 : vector<21x32xf32>, vector<21x32xf32> -> vector<42x32xf32>
    %213 = arith.truncf %212 : vector<42x32xf32> to vector<42x32xbf16>
    %c0_60 = arith.constant 0 : index
    %c0_61 = arith.constant 0 : index
    %c0_62 = arith.constant 0 : index
    %214 = vector.load %arg10[%c0_60, %c0_61, %c0_62] : memref<2x32x32xbf16, #tpu.memory_space<vmem>>, vector<1x32x32xbf16>
    %215 = vector.shape_cast %214 : vector<1x32x32xbf16> to vector<32x32xbf16>
    %cst_63 = arith.constant dense<0.000000e+00> : vector<42x32xf32>
    %216 = tpu.matmul %213, %215, %cst_63 {dimension_numbers = #tpu.dot_dimension_numbers<[1], [0], [0], [1], [0, 0, 1, 1], [], []>} : vector<42x32xbf16>, vector<32x32xbf16>, vector<42x32xf32> -> vector<42x32xf32>
    %217 = arith.addf %23, %216 : vector<42x32xf32>
    %c0_64 = arith.constant 0 : index
    %c0_65 = arith.constant 0 : index
    %c0_66 = arith.constant 0 : index
    %218 = vector.load %arg11[%c0_64, %c0_65, %c0_66] : memref<2x1x32xf32, #tpu.memory_space<vmem>>, vector<1x1x32xf32>
    %219 = vector.shape_cast %218 : vector<1x1x32xf32> to vector<1x32xf32>
    %220 = vector.broadcast %219 : vector<1x32xf32> to vector<42x32xf32>
    %221 = arith.addf %217, %220 : vector<42x32xf32>
    %c0_67 = arith.constant 0 : index
    %c0_68 = arith.constant 0 : index
    %c0_69 = arith.constant 0 : index
    %222 = vector.load %arg12[%c0_67, %c0_68, %c0_69] : memref<2x1x32xf32, #tpu.memory_space<vmem>>, vector<1x1x32xf32>
    %223 = vector.shape_cast %222 : vector<1x1x32xf32> to vector<1x32xf32>
    %c0_70 = arith.constant 0 : index
    %c0_71 = arith.constant 0 : index
    %c0_72 = arith.constant 0 : index
    %224 = vector.load %arg13[%c0_70, %c0_71, %c0_72] : memref<2x1x32xf32, #tpu.memory_space<vmem>>, vector<1x1x32xf32>
    %225 = vector.shape_cast %224 : vector<1x1x32xf32> to vector<1x32xf32>
    %cst_73 = arith.constant dense<0.000000e+00> : vector<42xf32>
    %226 = vector.multi_reduction <add>, %221, %cst_73 [1] : vector<42x32xf32> to vector<42xf32>
    %227 = vector.shape_cast %226 : vector<42xf32> to vector<42x1xf32>
    %cst_74 = arith.constant 3.200000e+01 : f32
    %228 = vector.broadcast %cst_74 : f32 to vector<42x1xf32>
    %229 = arith.divf %227, %228 : vector<42x1xf32>
    %230 = vector.broadcast %229 : vector<42x1xf32> to vector<42x32xf32>
    %231 = arith.subf %221, %230 : vector<42x32xf32>
    %232 = arith.mulf %231, %231 : vector<42x32xf32>
    %cst_75 = arith.constant dense<0.000000e+00> : vector<42xf32>
    %233 = vector.multi_reduction <add>, %232, %cst_75 [1] : vector<42x32xf32> to vector<42xf32>
    %234 = vector.shape_cast %233 : vector<42xf32> to vector<42x1xf32>
    %cst_76 = arith.constant 3.200000e+01 : f32
    %235 = vector.broadcast %cst_76 : f32 to vector<42x1xf32>
    %236 = arith.divf %234, %235 : vector<42x1xf32>
    %cst_77 = arith.constant 9.99999974E-6 : f32
    %237 = vector.broadcast %cst_77 : f32 to vector<42x1xf32>
    %238 = arith.addf %236, %237 : vector<42x1xf32>
    %239 = math.rsqrt %238 : vector<42x1xf32>
    %240 = vector.broadcast %239 : vector<42x1xf32> to vector<42x32xf32>
    %241 = arith.mulf %231, %240 : vector<42x32xf32>
    %242 = vector.broadcast %223 : vector<1x32xf32> to vector<42x32xf32>
    %243 = arith.mulf %241, %242 : vector<42x32xf32>
    %244 = vector.broadcast %225 : vector<1x32xf32> to vector<42x32xf32>
    %245 = arith.addf %243, %244 : vector<42x32xf32>
    %246 = arith.truncf %245 : vector<42x32xf32> to vector<42x32xbf16>
    %c0_78 = arith.constant 0 : index
    %c0_79 = arith.constant 0 : index
    %c0_80 = arith.constant 0 : index
    %247 = vector.load %arg14[%c0_78, %c0_79, %c0_80] : memref<2x32x128xbf16, #tpu.memory_space<vmem>>, vector<1x32x128xbf16>
    %248 = vector.shape_cast %247 : vector<1x32x128xbf16> to vector<32x128xbf16>
    %cst_81 = arith.constant dense<0.000000e+00> : vector<42x128xf32>
    %249 = tpu.matmul %246, %248, %cst_81 {dimension_numbers = #tpu.dot_dimension_numbers<[1], [0], [0], [1], [0, 0, 1, 1], [], []>} : vector<42x32xbf16>, vector<32x128xbf16>, vector<42x128xf32> -> vector<42x128xf32>
    %c0_82 = arith.constant 0 : index
    %c0_83 = arith.constant 0 : index
    %c0_84 = arith.constant 0 : index
    %250 = vector.load %arg15[%c0_82, %c0_83, %c0_84] : memref<2x1x128xf32, #tpu.memory_space<vmem>>, vector<1x1x128xf32>
    %251 = vector.shape_cast %250 : vector<1x1x128xf32> to vector<1x128xf32>
    %252 = vector.broadcast %251 : vector<1x128xf32> to vector<42x128xf32>
    %253 = arith.addf %249, %252 : vector<42x128xf32>
    %cst_85 = arith.constant 5.000000e-01 : f32
    %254 = vector.broadcast %cst_85 : f32 to vector<42x128xf32>
    %255 = arith.mulf %254, %253 : vector<42x128xf32>
    %cst_86 = arith.constant 4.471500e-02 : f32
    %256 = vector.broadcast %cst_86 : f32 to vector<42x128xf32>
    %257 = arith.mulf %256, %253 : vector<42x128xf32>
    %258 = arith.mulf %257, %253 : vector<42x128xf32>
    %259 = arith.mulf %258, %253 : vector<42x128xf32>
    %260 = arith.addf %253, %259 : vector<42x128xf32>
    %cst_87 = arith.constant 0.797884583 : f32
    %261 = vector.broadcast %cst_87 : f32 to vector<42x128xf32>
    %262 = arith.mulf %261, %260 : vector<42x128xf32>
    %263 = math.tanh %262 : vector<42x128xf32>
    %cst_88 = arith.constant 1.000000e+00 : f32
    %264 = vector.broadcast %cst_88 : f32 to vector<42x128xf32>
    %265 = arith.addf %264, %263 : vector<42x128xf32>
    %266 = arith.mulf %255, %265 : vector<42x128xf32>
    %267 = arith.truncf %266 : vector<42x128xf32> to vector<42x128xbf16>
    %c0_89 = arith.constant 0 : index
    %c0_90 = arith.constant 0 : index
    %c0_91 = arith.constant 0 : index
    %268 = vector.load %arg16[%c0_89, %c0_90, %c0_91] : memref<2x128x32xbf16, #tpu.memory_space<vmem>>, vector<1x128x32xbf16>
    %269 = vector.shape_cast %268 : vector<1x128x32xbf16> to vector<128x32xbf16>
    %cst_92 = arith.constant dense<0.000000e+00> : vector<42x32xf32>
    %270 = tpu.matmul %267, %269, %cst_92 {dimension_numbers = #tpu.dot_dimension_numbers<[1], [0], [0], [1], [0, 0, 1, 1], [], []>} : vector<42x128xbf16>, vector<128x32xbf16>, vector<42x32xf32> -> vector<42x32xf32>
    %271 = arith.addf %221, %270 : vector<42x32xf32>
    %c0_93 = arith.constant 0 : index
    %c0_94 = arith.constant 0 : index
    %c0_95 = arith.constant 0 : index
    %272 = vector.load %arg17[%c0_93, %c0_94, %c0_95] : memref<2x1x32xf32, #tpu.memory_space<vmem>>, vector<1x1x32xf32>
    %273 = vector.shape_cast %272 : vector<1x1x32xf32> to vector<1x32xf32>
    %274 = vector.broadcast %273 : vector<1x32xf32> to vector<42x32xf32>
    %275 = arith.addf %271, %274 : vector<42x32xf32>
    %c1 = arith.constant 1 : index
    %c0_96 = arith.constant 0 : index
    %c0_97 = arith.constant 0 : index
    %276 = vector.load %arg6[%c1, %c0_96, %c0_97] : memref<2x1x32xf32, #tpu.memory_space<vmem>>, vector<1x1x32xf32>
    %277 = vector.shape_cast %276 : vector<1x1x32xf32> to vector<1x32xf32>
    %c1_98 = arith.constant 1 : index
    %c0_99 = arith.constant 0 : index
    %c0_100 = arith.constant 0 : index
    %278 = vector.load %arg7[%c1_98, %c0_99, %c0_100] : memref<2x1x32xf32, #tpu.memory_space<vmem>>, vector<1x1x32xf32>
    %279 = vector.shape_cast %278 : vector<1x1x32xf32> to vector<1x32xf32>
    %cst_101 = arith.constant dense<0.000000e+00> : vector<42xf32>
    %280 = vector.multi_reduction <add>, %275, %cst_101 [1] : vector<42x32xf32> to vector<42xf32>
    %281 = vector.shape_cast %280 : vector<42xf32> to vector<42x1xf32>
    %cst_102 = arith.constant 3.200000e+01 : f32
    %282 = vector.broadcast %cst_102 : f32 to vector<42x1xf32>
    %283 = arith.divf %281, %282 : vector<42x1xf32>
    %284 = vector.broadcast %283 : vector<42x1xf32> to vector<42x32xf32>
    %285 = arith.subf %275, %284 : vector<42x32xf32>
    %286 = arith.mulf %285, %285 : vector<42x32xf32>
    %cst_103 = arith.constant dense<0.000000e+00> : vector<42xf32>
    %287 = vector.multi_reduction <add>, %286, %cst_103 [1] : vector<42x32xf32> to vector<42xf32>
    %288 = vector.shape_cast %287 : vector<42xf32> to vector<42x1xf32>
    %cst_104 = arith.constant 3.200000e+01 : f32
    %289 = vector.broadcast %cst_104 : f32 to vector<42x1xf32>
    %290 = arith.divf %288, %289 : vector<42x1xf32>
    %cst_105 = arith.constant 9.99999974E-6 : f32
    %291 = vector.broadcast %cst_105 : f32 to vector<42x1xf32>
    %292 = arith.addf %290, %291 : vector<42x1xf32>
    %293 = math.rsqrt %292 : vector<42x1xf32>
    %294 = vector.broadcast %293 : vector<42x1xf32> to vector<42x32xf32>
    %295 = arith.mulf %285, %294 : vector<42x32xf32>
    %296 = vector.broadcast %277 : vector<1x32xf32> to vector<42x32xf32>
    %297 = arith.mulf %295, %296 : vector<42x32xf32>
    %298 = vector.broadcast %279 : vector<1x32xf32> to vector<42x32xf32>
    %299 = arith.addf %297, %298 : vector<42x32xf32>
    %300 = arith.truncf %299 : vector<42x32xf32> to vector<42x32xbf16>
    %c1_106 = arith.constant 1 : index
    %c0_107 = arith.constant 0 : index
    %c0_108 = arith.constant 0 : index
    %301 = vector.load %arg8[%c1_106, %c0_107, %c0_108] : memref<2x32x96xbf16, #tpu.memory_space<vmem>>, vector<1x32x96xbf16>
    %302 = vector.shape_cast %301 : vector<1x32x96xbf16> to vector<32x96xbf16>
    %cst_109 = arith.constant dense<0.000000e+00> : vector<42x96xf32>
    %303 = tpu.matmul %300, %302, %cst_109 {dimension_numbers = #tpu.dot_dimension_numbers<[1], [0], [0], [1], [0, 0, 1, 1], [], []>} : vector<42x32xbf16>, vector<32x96xbf16>, vector<42x96xf32> -> vector<42x96xf32>
    %c1_110 = arith.constant 1 : index
    %c0_111 = arith.constant 0 : index
    %c0_112 = arith.constant 0 : index
    %304 = vector.load %arg9[%c1_110, %c0_111, %c0_112] : memref<2x1x96xf32, #tpu.memory_space<vmem>>, vector<1x1x96xf32>
    %305 = vector.shape_cast %304 : vector<1x1x96xf32> to vector<1x96xf32>
    %306 = vector.broadcast %305 : vector<1x96xf32> to vector<42x96xf32>
    %307 = arith.addf %303, %306 : vector<42x96xf32>
    %308 = vector.extract_strided_slice %307 {offsets = [0, 0], sizes = [21, 96], strides = [1, 1]} : vector<42x96xf32> to vector<21x96xf32>
    %309 = vector.extract_strided_slice %308 {offsets = [0, 0], sizes = [21, 8], strides = [1, 1]} : vector<21x96xf32> to vector<21x8xf32>
    %310 = arith.truncf %309 : vector<21x8xf32> to vector<21x8xbf16>
    %311 = vector.extract_strided_slice %308 {offsets = [0, 32], sizes = [21, 8], strides = [1, 1]} : vector<21x96xf32> to vector<21x8xf32>
    %312 = arith.truncf %311 : vector<21x8xf32> to vector<21x8xbf16>
    %313 = vector.extract_strided_slice %308 {offsets = [0, 64], sizes = [21, 8], strides = [1, 1]} : vector<21x96xf32> to vector<21x8xf32>
    %314 = arith.truncf %313 : vector<21x8xf32> to vector<21x8xbf16>
    %cst_113 = arith.constant dense<0.000000e+00> : vector<21x21xf32>
    %315 = tpu.matmul %310, %312, %cst_113 {dimension_numbers = #tpu.dot_dimension_numbers<[1], [1], [0], [0], [0, 0, 1, 0], [], []>} : vector<21x8xbf16>, vector<21x8xbf16>, vector<21x21xf32> -> vector<21x21xf32>
    %cst_114 = arith.constant dense<0xFF800000> : vector<21xf32>
    %316 = vector.multi_reduction <maximumf>, %315, %cst_114 [1] : vector<21x21xf32> to vector<21xf32>
    %317 = vector.shape_cast %316 : vector<21xf32> to vector<21x1xf32>
    %318 = vector.broadcast %317 : vector<21x1xf32> to vector<21x21xf32>
    %319 = arith.subf %315, %318 : vector<21x21xf32>
    %320 = math.exp %319 : vector<21x21xf32>
    %cst_115 = arith.constant dense<0.000000e+00> : vector<21xf32>
    %321 = vector.multi_reduction <add>, %320, %cst_115 [1] : vector<21x21xf32> to vector<21xf32>
    %322 = vector.shape_cast %321 : vector<21xf32> to vector<21x1xf32>
    %323 = tpu.reciprocal %322 {approx = true} : vector<21x1xf32> -> vector<21x1xf32>
    %324 = vector.broadcast %323 : vector<21x1xf32> to vector<21x21xf32>
    %325 = arith.mulf %320, %324 : vector<21x21xf32>
    %326 = arith.truncf %325 : vector<21x21xf32> to vector<21x21xbf16>
    %cst_116 = arith.constant dense<0.000000e+00> : vector<21x8xf32>
    %327 = tpu.matmul %326, %314, %cst_116 {dimension_numbers = #tpu.dot_dimension_numbers<[1], [0], [0], [1], [0, 0, 1, 1], [], []>} : vector<21x21xbf16>, vector<21x8xbf16>, vector<21x8xf32> -> vector<21x8xf32>
    %328 = vector.extract_strided_slice %308 {offsets = [0, 8], sizes = [21, 8], strides = [1, 1]} : vector<21x96xf32> to vector<21x8xf32>
    %329 = arith.truncf %328 : vector<21x8xf32> to vector<21x8xbf16>
    %330 = vector.extract_strided_slice %308 {offsets = [0, 40], sizes = [21, 8], strides = [1, 1]} : vector<21x96xf32> to vector<21x8xf32>
    %331 = arith.truncf %330 : vector<21x8xf32> to vector<21x8xbf16>
    %332 = vector.extract_strided_slice %308 {offsets = [0, 72], sizes = [21, 8], strides = [1, 1]} : vector<21x96xf32> to vector<21x8xf32>
    %333 = arith.truncf %332 : vector<21x8xf32> to vector<21x8xbf16>
    %cst_117 = arith.constant dense<0.000000e+00> : vector<21x21xf32>
    %334 = tpu.matmul %329, %331, %cst_117 {dimension_numbers = #tpu.dot_dimension_numbers<[1], [1], [0], [0], [0, 0, 1, 0], [], []>} : vector<21x8xbf16>, vector<21x8xbf16>, vector<21x21xf32> -> vector<21x21xf32>
    %cst_118 = arith.constant dense<0xFF800000> : vector<21xf32>
    %335 = vector.multi_reduction <maximumf>, %334, %cst_118 [1] : vector<21x21xf32> to vector<21xf32>
    %336 = vector.shape_cast %335 : vector<21xf32> to vector<21x1xf32>
    %337 = vector.broadcast %336 : vector<21x1xf32> to vector<21x21xf32>
    %338 = arith.subf %334, %337 : vector<21x21xf32>
    %339 = math.exp %338 : vector<21x21xf32>
    %cst_119 = arith.constant dense<0.000000e+00> : vector<21xf32>
    %340 = vector.multi_reduction <add>, %339, %cst_119 [1] : vector<21x21xf32> to vector<21xf32>
    %341 = vector.shape_cast %340 : vector<21xf32> to vector<21x1xf32>
    %342 = tpu.reciprocal %341 {approx = true} : vector<21x1xf32> -> vector<21x1xf32>
    %343 = vector.broadcast %342 : vector<21x1xf32> to vector<21x21xf32>
    %344 = arith.mulf %339, %343 : vector<21x21xf32>
    %345 = arith.truncf %344 : vector<21x21xf32> to vector<21x21xbf16>
    %cst_120 = arith.constant dense<0.000000e+00> : vector<21x8xf32>
    %346 = tpu.matmul %345, %333, %cst_120 {dimension_numbers = #tpu.dot_dimension_numbers<[1], [0], [0], [1], [0, 0, 1, 1], [], []>} : vector<21x21xbf16>, vector<21x8xbf16>, vector<21x8xf32> -> vector<21x8xf32>
    %347 = vector.extract_strided_slice %308 {offsets = [0, 16], sizes = [21, 8], strides = [1, 1]} : vector<21x96xf32> to vector<21x8xf32>
    %348 = arith.truncf %347 : vector<21x8xf32> to vector<21x8xbf16>
    %349 = vector.extract_strided_slice %308 {offsets = [0, 48], sizes = [21, 8], strides = [1, 1]} : vector<21x96xf32> to vector<21x8xf32>
    %350 = arith.truncf %349 : vector<21x8xf32> to vector<21x8xbf16>
    %351 = vector.extract_strided_slice %308 {offsets = [0, 80], sizes = [21, 8], strides = [1, 1]} : vector<21x96xf32> to vector<21x8xf32>
    %352 = arith.truncf %351 : vector<21x8xf32> to vector<21x8xbf16>
    %cst_121 = arith.constant dense<0.000000e+00> : vector<21x21xf32>
    %353 = tpu.matmul %348, %350, %cst_121 {dimension_numbers = #tpu.dot_dimension_numbers<[1], [1], [0], [0], [0, 0, 1, 0], [], []>} : vector<21x8xbf16>, vector<21x8xbf16>, vector<21x21xf32> -> vector<21x21xf32>
    %cst_122 = arith.constant dense<0xFF800000> : vector<21xf32>
    %354 = vector.multi_reduction <maximumf>, %353, %cst_122 [1] : vector<21x21xf32> to vector<21xf32>
    %355 = vector.shape_cast %354 : vector<21xf32> to vector<21x1xf32>
    %356 = vector.broadcast %355 : vector<21x1xf32> to vector<21x21xf32>
    %357 = arith.subf %353, %356 : vector<21x21xf32>
    %358 = math.exp %357 : vector<21x21xf32>
    %cst_123 = arith.constant dense<0.000000e+00> : vector<21xf32>
    %359 = vector.multi_reduction <add>, %358, %cst_123 [1] : vector<21x21xf32> to vector<21xf32>
    %360 = vector.shape_cast %359 : vector<21xf32> to vector<21x1xf32>
    %361 = tpu.reciprocal %360 {approx = true} : vector<21x1xf32> -> vector<21x1xf32>
    %362 = vector.broadcast %361 : vector<21x1xf32> to vector<21x21xf32>
    %363 = arith.mulf %358, %362 : vector<21x21xf32>
    %364 = arith.truncf %363 : vector<21x21xf32> to vector<21x21xbf16>
    %cst_124 = arith.constant dense<0.000000e+00> : vector<21x8xf32>
    %365 = tpu.matmul %364, %352, %cst_124 {dimension_numbers = #tpu.dot_dimension_numbers<[1], [0], [0], [1], [0, 0, 1, 1], [], []>} : vector<21x21xbf16>, vector<21x8xbf16>, vector<21x8xf32> -> vector<21x8xf32>
    %366 = vector.extract_strided_slice %308 {offsets = [0, 24], sizes = [21, 8], strides = [1, 1]} : vector<21x96xf32> to vector<21x8xf32>
    %367 = arith.truncf %366 : vector<21x8xf32> to vector<21x8xbf16>
    %368 = vector.extract_strided_slice %308 {offsets = [0, 56], sizes = [21, 8], strides = [1, 1]} : vector<21x96xf32> to vector<21x8xf32>
    %369 = arith.truncf %368 : vector<21x8xf32> to vector<21x8xbf16>
    %370 = vector.extract_strided_slice %308 {offsets = [0, 88], sizes = [21, 8], strides = [1, 1]} : vector<21x96xf32> to vector<21x8xf32>
    %371 = arith.truncf %370 : vector<21x8xf32> to vector<21x8xbf16>
    %cst_125 = arith.constant dense<0.000000e+00> : vector<21x21xf32>
    %372 = tpu.matmul %367, %369, %cst_125 {dimension_numbers = #tpu.dot_dimension_numbers<[1], [1], [0], [0], [0, 0, 1, 0], [], []>} : vector<21x8xbf16>, vector<21x8xbf16>, vector<21x21xf32> -> vector<21x21xf32>
    %cst_126 = arith.constant dense<0xFF800000> : vector<21xf32>
    %373 = vector.multi_reduction <maximumf>, %372, %cst_126 [1] : vector<21x21xf32> to vector<21xf32>
    %374 = vector.shape_cast %373 : vector<21xf32> to vector<21x1xf32>
    %375 = vector.broadcast %374 : vector<21x1xf32> to vector<21x21xf32>
    %376 = arith.subf %372, %375 : vector<21x21xf32>
    %377 = math.exp %376 : vector<21x21xf32>
    %cst_127 = arith.constant dense<0.000000e+00> : vector<21xf32>
    %378 = vector.multi_reduction <add>, %377, %cst_127 [1] : vector<21x21xf32> to vector<21xf32>
    %379 = vector.shape_cast %378 : vector<21xf32> to vector<21x1xf32>
    %380 = tpu.reciprocal %379 {approx = true} : vector<21x1xf32> -> vector<21x1xf32>
    %381 = vector.broadcast %380 : vector<21x1xf32> to vector<21x21xf32>
    %382 = arith.mulf %377, %381 : vector<21x21xf32>
    %383 = arith.truncf %382 : vector<21x21xf32> to vector<21x21xbf16>
    %cst_128 = arith.constant dense<0.000000e+00> : vector<21x8xf32>
    %384 = tpu.matmul %383, %371, %cst_128 {dimension_numbers = #tpu.dot_dimension_numbers<[1], [0], [0], [1], [0, 0, 1, 1], [], []>} : vector<21x21xbf16>, vector<21x8xbf16>, vector<21x8xf32> -> vector<21x8xf32>
    %385 = tpu.concatenate %327, %346, %365, %384 in 1 : vector<21x8xf32>, vector<21x8xf32>, vector<21x8xf32>, vector<21x8xf32> -> vector<21x32xf32>
    %386 = vector.extract_strided_slice %307 {offsets = [21, 0], sizes = [21, 96], strides = [1, 1]} : vector<42x96xf32> to vector<21x96xf32>
    %387 = vector.extract_strided_slice %386 {offsets = [0, 0], sizes = [21, 8], strides = [1, 1]} : vector<21x96xf32> to vector<21x8xf32>
    %388 = arith.truncf %387 : vector<21x8xf32> to vector<21x8xbf16>
    %389 = vector.extract_strided_slice %386 {offsets = [0, 32], sizes = [21, 8], strides = [1, 1]} : vector<21x96xf32> to vector<21x8xf32>
    %390 = arith.truncf %389 : vector<21x8xf32> to vector<21x8xbf16>
    %391 = vector.extract_strided_slice %386 {offsets = [0, 64], sizes = [21, 8], strides = [1, 1]} : vector<21x96xf32> to vector<21x8xf32>
    %392 = arith.truncf %391 : vector<21x8xf32> to vector<21x8xbf16>
    %cst_129 = arith.constant dense<0.000000e+00> : vector<21x21xf32>
    %393 = tpu.matmul %388, %390, %cst_129 {dimension_numbers = #tpu.dot_dimension_numbers<[1], [1], [0], [0], [0, 0, 1, 0], [], []>} : vector<21x8xbf16>, vector<21x8xbf16>, vector<21x21xf32> -> vector<21x21xf32>
    %cst_130 = arith.constant dense<0xFF800000> : vector<21xf32>
    %394 = vector.multi_reduction <maximumf>, %393, %cst_130 [1] : vector<21x21xf32> to vector<21xf32>
    %395 = vector.shape_cast %394 : vector<21xf32> to vector<21x1xf32>
    %396 = vector.broadcast %395 : vector<21x1xf32> to vector<21x21xf32>
    %397 = arith.subf %393, %396 : vector<21x21xf32>
    %398 = math.exp %397 : vector<21x21xf32>
    %cst_131 = arith.constant dense<0.000000e+00> : vector<21xf32>
    %399 = vector.multi_reduction <add>, %398, %cst_131 [1] : vector<21x21xf32> to vector<21xf32>
    %400 = vector.shape_cast %399 : vector<21xf32> to vector<21x1xf32>
    %401 = tpu.reciprocal %400 {approx = true} : vector<21x1xf32> -> vector<21x1xf32>
    %402 = vector.broadcast %401 : vector<21x1xf32> to vector<21x21xf32>
    %403 = arith.mulf %398, %402 : vector<21x21xf32>
    %404 = arith.truncf %403 : vector<21x21xf32> to vector<21x21xbf16>
    %cst_132 = arith.constant dense<0.000000e+00> : vector<21x8xf32>
    %405 = tpu.matmul %404, %392, %cst_132 {dimension_numbers = #tpu.dot_dimension_numbers<[1], [0], [0], [1], [0, 0, 1, 1], [], []>} : vector<21x21xbf16>, vector<21x8xbf16>, vector<21x8xf32> -> vector<21x8xf32>
    %406 = vector.extract_strided_slice %386 {offsets = [0, 8], sizes = [21, 8], strides = [1, 1]} : vector<21x96xf32> to vector<21x8xf32>
    %407 = arith.truncf %406 : vector<21x8xf32> to vector<21x8xbf16>
    %408 = vector.extract_strided_slice %386 {offsets = [0, 40], sizes = [21, 8], strides = [1, 1]} : vector<21x96xf32> to vector<21x8xf32>
    %409 = arith.truncf %408 : vector<21x8xf32> to vector<21x8xbf16>
    %410 = vector.extract_strided_slice %386 {offsets = [0, 72], sizes = [21, 8], strides = [1, 1]} : vector<21x96xf32> to vector<21x8xf32>
    %411 = arith.truncf %410 : vector<21x8xf32> to vector<21x8xbf16>
    %cst_133 = arith.constant dense<0.000000e+00> : vector<21x21xf32>
    %412 = tpu.matmul %407, %409, %cst_133 {dimension_numbers = #tpu.dot_dimension_numbers<[1], [1], [0], [0], [0, 0, 1, 0], [], []>} : vector<21x8xbf16>, vector<21x8xbf16>, vector<21x21xf32> -> vector<21x21xf32>
    %cst_134 = arith.constant dense<0xFF800000> : vector<21xf32>
    %413 = vector.multi_reduction <maximumf>, %412, %cst_134 [1] : vector<21x21xf32> to vector<21xf32>
    %414 = vector.shape_cast %413 : vector<21xf32> to vector<21x1xf32>
    %415 = vector.broadcast %414 : vector<21x1xf32> to vector<21x21xf32>
    %416 = arith.subf %412, %415 : vector<21x21xf32>
    %417 = math.exp %416 : vector<21x21xf32>
    %cst_135 = arith.constant dense<0.000000e+00> : vector<21xf32>
    %418 = vector.multi_reduction <add>, %417, %cst_135 [1] : vector<21x21xf32> to vector<21xf32>
    %419 = vector.shape_cast %418 : vector<21xf32> to vector<21x1xf32>
    %420 = tpu.reciprocal %419 {approx = true} : vector<21x1xf32> -> vector<21x1xf32>
    %421 = vector.broadcast %420 : vector<21x1xf32> to vector<21x21xf32>
    %422 = arith.mulf %417, %421 : vector<21x21xf32>
    %423 = arith.truncf %422 : vector<21x21xf32> to vector<21x21xbf16>
    %cst_136 = arith.constant dense<0.000000e+00> : vector<21x8xf32>
    %424 = tpu.matmul %423, %411, %cst_136 {dimension_numbers = #tpu.dot_dimension_numbers<[1], [0], [0], [1], [0, 0, 1, 1], [], []>} : vector<21x21xbf16>, vector<21x8xbf16>, vector<21x8xf32> -> vector<21x8xf32>
    %425 = vector.extract_strided_slice %386 {offsets = [0, 16], sizes = [21, 8], strides = [1, 1]} : vector<21x96xf32> to vector<21x8xf32>
    %426 = arith.truncf %425 : vector<21x8xf32> to vector<21x8xbf16>
    %427 = vector.extract_strided_slice %386 {offsets = [0, 48], sizes = [21, 8], strides = [1, 1]} : vector<21x96xf32> to vector<21x8xf32>
    %428 = arith.truncf %427 : vector<21x8xf32> to vector<21x8xbf16>
    %429 = vector.extract_strided_slice %386 {offsets = [0, 80], sizes = [21, 8], strides = [1, 1]} : vector<21x96xf32> to vector<21x8xf32>
    %430 = arith.truncf %429 : vector<21x8xf32> to vector<21x8xbf16>
    %cst_137 = arith.constant dense<0.000000e+00> : vector<21x21xf32>
    %431 = tpu.matmul %426, %428, %cst_137 {dimension_numbers = #tpu.dot_dimension_numbers<[1], [1], [0], [0], [0, 0, 1, 0], [], []>} : vector<21x8xbf16>, vector<21x8xbf16>, vector<21x21xf32> -> vector<21x21xf32>
    %cst_138 = arith.constant dense<0xFF800000> : vector<21xf32>
    %432 = vector.multi_reduction <maximumf>, %431, %cst_138 [1] : vector<21x21xf32> to vector<21xf32>
    %433 = vector.shape_cast %432 : vector<21xf32> to vector<21x1xf32>
    %434 = vector.broadcast %433 : vector<21x1xf32> to vector<21x21xf32>
    %435 = arith.subf %431, %434 : vector<21x21xf32>
    %436 = math.exp %435 : vector<21x21xf32>
    %cst_139 = arith.constant dense<0.000000e+00> : vector<21xf32>
    %437 = vector.multi_reduction <add>, %436, %cst_139 [1] : vector<21x21xf32> to vector<21xf32>
    %438 = vector.shape_cast %437 : vector<21xf32> to vector<21x1xf32>
    %439 = tpu.reciprocal %438 {approx = true} : vector<21x1xf32> -> vector<21x1xf32>
    %440 = vector.broadcast %439 : vector<21x1xf32> to vector<21x21xf32>
    %441 = arith.mulf %436, %440 : vector<21x21xf32>
    %442 = arith.truncf %441 : vector<21x21xf32> to vector<21x21xbf16>
    %cst_140 = arith.constant dense<0.000000e+00> : vector<21x8xf32>
    %443 = tpu.matmul %442, %430, %cst_140 {dimension_numbers = #tpu.dot_dimension_numbers<[1], [0], [0], [1], [0, 0, 1, 1], [], []>} : vector<21x21xbf16>, vector<21x8xbf16>, vector<21x8xf32> -> vector<21x8xf32>
    %444 = vector.extract_strided_slice %386 {offsets = [0, 24], sizes = [21, 8], strides = [1, 1]} : vector<21x96xf32> to vector<21x8xf32>
    %445 = arith.truncf %444 : vector<21x8xf32> to vector<21x8xbf16>
    %446 = vector.extract_strided_slice %386 {offsets = [0, 56], sizes = [21, 8], strides = [1, 1]} : vector<21x96xf32> to vector<21x8xf32>
    %447 = arith.truncf %446 : vector<21x8xf32> to vector<21x8xbf16>
    %448 = vector.extract_strided_slice %386 {offsets = [0, 88], sizes = [21, 8], strides = [1, 1]} : vector<21x96xf32> to vector<21x8xf32>
    %449 = arith.truncf %448 : vector<21x8xf32> to vector<21x8xbf16>
    %cst_141 = arith.constant dense<0.000000e+00> : vector<21x21xf32>
    %450 = tpu.matmul %445, %447, %cst_141 {dimension_numbers = #tpu.dot_dimension_numbers<[1], [1], [0], [0], [0, 0, 1, 0], [], []>} : vector<21x8xbf16>, vector<21x8xbf16>, vector<21x21xf32> -> vector<21x21xf32>
    %cst_142 = arith.constant dense<0xFF800000> : vector<21xf32>
    %451 = vector.multi_reduction <maximumf>, %450, %cst_142 [1] : vector<21x21xf32> to vector<21xf32>
    %452 = vector.shape_cast %451 : vector<21xf32> to vector<21x1xf32>
    %453 = vector.broadcast %452 : vector<21x1xf32> to vector<21x21xf32>
    %454 = arith.subf %450, %453 : vector<21x21xf32>
    %455 = math.exp %454 : vector<21x21xf32>
    %cst_143 = arith.constant dense<0.000000e+00> : vector<21xf32>
    %456 = vector.multi_reduction <add>, %455, %cst_143 [1] : vector<21x21xf32> to vector<21xf32>
    %457 = vector.shape_cast %456 : vector<21xf32> to vector<21x1xf32>
    %458 = tpu.reciprocal %457 {approx = true} : vector<21x1xf32> -> vector<21x1xf32>
    %459 = vector.broadcast %458 : vector<21x1xf32> to vector<21x21xf32>
    %460 = arith.mulf %455, %459 : vector<21x21xf32>
    %461 = arith.truncf %460 : vector<21x21xf32> to vector<21x21xbf16>
    %cst_144 = arith.constant dense<0.000000e+00> : vector<21x8xf32>
    %462 = tpu.matmul %461, %449, %cst_144 {dimension_numbers = #tpu.dot_dimension_numbers<[1], [0], [0], [1], [0, 0, 1, 1], [], []>} : vector<21x21xbf16>, vector<21x8xbf16>, vector<21x8xf32> -> vector<21x8xf32>
    %463 = tpu.concatenate %405, %424, %443, %462 in 1 : vector<21x8xf32>, vector<21x8xf32>, vector<21x8xf32>, vector<21x8xf32> -> vector<21x32xf32>
    %464 = tpu.concatenate %385, %463 in 0 : vector<21x32xf32>, vector<21x32xf32> -> vector<42x32xf32>
    %465 = arith.truncf %464 : vector<42x32xf32> to vector<42x32xbf16>
    %c1_145 = arith.constant 1 : index
    %c0_146 = arith.constant 0 : index
    %c0_147 = arith.constant 0 : index
    %466 = vector.load %arg10[%c1_145, %c0_146, %c0_147] : memref<2x32x32xbf16, #tpu.memory_space<vmem>>, vector<1x32x32xbf16>
    %467 = vector.shape_cast %466 : vector<1x32x32xbf16> to vector<32x32xbf16>
    %cst_148 = arith.constant dense<0.000000e+00> : vector<42x32xf32>
    %468 = tpu.matmul %465, %467, %cst_148 {dimension_numbers = #tpu.dot_dimension_numbers<[1], [0], [0], [1], [0, 0, 1, 1], [], []>} : vector<42x32xbf16>, vector<32x32xbf16>, vector<42x32xf32> -> vector<42x32xf32>
    %469 = arith.addf %275, %468 : vector<42x32xf32>
    %c1_149 = arith.constant 1 : index
    %c0_150 = arith.constant 0 : index
    %c0_151 = arith.constant 0 : index
    %470 = vector.load %arg11[%c1_149, %c0_150, %c0_151] : memref<2x1x32xf32, #tpu.memory_space<vmem>>, vector<1x1x32xf32>
    %471 = vector.shape_cast %470 : vector<1x1x32xf32> to vector<1x32xf32>
    %472 = vector.broadcast %471 : vector<1x32xf32> to vector<42x32xf32>
    %473 = arith.addf %469, %472 : vector<42x32xf32>
    %c1_152 = arith.constant 1 : index
    %c0_153 = arith.constant 0 : index
    %c0_154 = arith.constant 0 : index
    %474 = vector.load %arg12[%c1_152, %c0_153, %c0_154] : memref<2x1x32xf32, #tpu.memory_space<vmem>>, vector<1x1x32xf32>
    %475 = vector.shape_cast %474 : vector<1x1x32xf32> to vector<1x32xf32>
    %c1_155 = arith.constant 1 : index
    %c0_156 = arith.constant 0 : index
    %c0_157 = arith.constant 0 : index
    %476 = vector.load %arg13[%c1_155, %c0_156, %c0_157] : memref<2x1x32xf32, #tpu.memory_space<vmem>>, vector<1x1x32xf32>
    %477 = vector.shape_cast %476 : vector<1x1x32xf32> to vector<1x32xf32>
    %cst_158 = arith.constant dense<0.000000e+00> : vector<42xf32>
    %478 = vector.multi_reduction <add>, %473, %cst_158 [1] : vector<42x32xf32> to vector<42xf32>
    %479 = vector.shape_cast %478 : vector<42xf32> to vector<42x1xf32>
    %cst_159 = arith.constant 3.200000e+01 : f32
    %480 = vector.broadcast %cst_159 : f32 to vector<42x1xf32>
    %481 = arith.divf %479, %480 : vector<42x1xf32>
    %482 = vector.broadcast %481 : vector<42x1xf32> to vector<42x32xf32>
    %483 = arith.subf %473, %482 : vector<42x32xf32>
    %484 = arith.mulf %483, %483 : vector<42x32xf32>
    %cst_160 = arith.constant dense<0.000000e+00> : vector<42xf32>
    %485 = vector.multi_reduction <add>, %484, %cst_160 [1] : vector<42x32xf32> to vector<42xf32>
    %486 = vector.shape_cast %485 : vector<42xf32> to vector<42x1xf32>
    %cst_161 = arith.constant 3.200000e+01 : f32
    %487 = vector.broadcast %cst_161 : f32 to vector<42x1xf32>
    %488 = arith.divf %486, %487 : vector<42x1xf32>
    %cst_162 = arith.constant 9.99999974E-6 : f32
    %489 = vector.broadcast %cst_162 : f32 to vector<42x1xf32>
    %490 = arith.addf %488, %489 : vector<42x1xf32>
    %491 = math.rsqrt %490 : vector<42x1xf32>
    %492 = vector.broadcast %491 : vector<42x1xf32> to vector<42x32xf32>
    %493 = arith.mulf %483, %492 : vector<42x32xf32>
    %494 = vector.broadcast %475 : vector<1x32xf32> to vector<42x32xf32>
    %495 = arith.mulf %493, %494 : vector<42x32xf32>
    %496 = vector.broadcast %477 : vector<1x32xf32> to vector<42x32xf32>
    %497 = arith.addf %495, %496 : vector<42x32xf32>
    %498 = arith.truncf %497 : vector<42x32xf32> to vector<42x32xbf16>
    %c1_163 = arith.constant 1 : index
    %c0_164 = arith.constant 0 : index
    %c0_165 = arith.constant 0 : index
    %499 = vector.load %arg14[%c1_163, %c0_164, %c0_165] : memref<2x32x128xbf16, #tpu.memory_space<vmem>>, vector<1x32x128xbf16>
    %500 = vector.shape_cast %499 : vector<1x32x128xbf16> to vector<32x128xbf16>
    %cst_166 = arith.constant dense<0.000000e+00> : vector<42x128xf32>
    %501 = tpu.matmul %498, %500, %cst_166 {dimension_numbers = #tpu.dot_dimension_numbers<[1], [0], [0], [1], [0, 0, 1, 1], [], []>} : vector<42x32xbf16>, vector<32x128xbf16>, vector<42x128xf32> -> vector<42x128xf32>
    %c1_167 = arith.constant 1 : index
    %c0_168 = arith.constant 0 : index
    %c0_169 = arith.constant 0 : index
    %502 = vector.load %arg15[%c1_167, %c0_168, %c0_169] : memref<2x1x128xf32, #tpu.memory_space<vmem>>, vector<1x1x128xf32>
    %503 = vector.shape_cast %502 : vector<1x1x128xf32> to vector<1x128xf32>
    %504 = vector.broadcast %503 : vector<1x128xf32> to vector<42x128xf32>
    %505 = arith.addf %501, %504 : vector<42x128xf32>
    %cst_170 = arith.constant 5.000000e-01 : f32
    %506 = vector.broadcast %cst_170 : f32 to vector<42x128xf32>
    %507 = arith.mulf %506, %505 : vector<42x128xf32>
    %cst_171 = arith.constant 4.471500e-02 : f32
    %508 = vector.broadcast %cst_171 : f32 to vector<42x128xf32>
    %509 = arith.mulf %508, %505 : vector<42x128xf32>
    %510 = arith.mulf %509, %505 : vector<42x128xf32>
    %511 = arith.mulf %510, %505 : vector<42x128xf32>
    %512 = arith.addf %505, %511 : vector<42x128xf32>
    %cst_172 = arith.constant 0.797884583 : f32
    %513 = vector.broadcast %cst_172 : f32 to vector<42x128xf32>
    %514 = arith.mulf %513, %512 : vector<42x128xf32>
    %515 = math.tanh %514 : vector<42x128xf32>
    %cst_173 = arith.constant 1.000000e+00 : f32
    %516 = vector.broadcast %cst_173 : f32 to vector<42x128xf32>
    %517 = arith.addf %516, %515 : vector<42x128xf32>
    %518 = arith.mulf %507, %517 : vector<42x128xf32>
    %519 = arith.truncf %518 : vector<42x128xf32> to vector<42x128xbf16>
    %c1_174 = arith.constant 1 : index
    %c0_175 = arith.constant 0 : index
    %c0_176 = arith.constant 0 : index
    %520 = vector.load %arg16[%c1_174, %c0_175, %c0_176] : memref<2x128x32xbf16, #tpu.memory_space<vmem>>, vector<1x128x32xbf16>
    %521 = vector.shape_cast %520 : vector<1x128x32xbf16> to vector<128x32xbf16>
    %cst_177 = arith.constant dense<0.000000e+00> : vector<42x32xf32>
    %522 = tpu.matmul %519, %521, %cst_177 {dimension_numbers = #tpu.dot_dimension_numbers<[1], [0], [0], [1], [0, 0, 1, 1], [], []>} : vector<42x128xbf16>, vector<128x32xbf16>, vector<42x32xf32> -> vector<42x32xf32>
    %523 = arith.addf %473, %522 : vector<42x32xf32>
    %c1_178 = arith.constant 1 : index
    %c0_179 = arith.constant 0 : index
    %c0_180 = arith.constant 0 : index
    %524 = vector.load %arg17[%c1_178, %c0_179, %c0_180] : memref<2x1x32xf32, #tpu.memory_space<vmem>>, vector<1x1x32xf32>
    %525 = vector.shape_cast %524 : vector<1x1x32xf32> to vector<1x32xf32>
    %526 = vector.broadcast %525 : vector<1x32xf32> to vector<42x32xf32>
    %527 = arith.addf %523, %526 : vector<42x32xf32>
    %528 = vector.extract_strided_slice %527 {offsets = [0, 0], sizes = [1, 32], strides = [1, 1]} : vector<42x32xf32> to vector<1x32xf32>
    %529 = vector.extract_strided_slice %527 {offsets = [21, 0], sizes = [1, 32], strides = [1, 1]} : vector<42x32xf32> to vector<1x32xf32>
    %530 = tpu.concatenate %528, %529 in 0 : vector<1x32xf32>, vector<1x32xf32> -> vector<2x32xf32>
    %c0_181 = arith.constant 0 : index
    %c0_182 = arith.constant 0 : index
    %531 = vector.load %arg18[%c0_181, %c0_182] : memref<1x32xf32, #tpu.memory_space<vmem>>, vector<1x32xf32>
    %c0_183 = arith.constant 0 : index
    %c0_184 = arith.constant 0 : index
    %532 = vector.load %arg19[%c0_183, %c0_184] : memref<1x32xf32, #tpu.memory_space<vmem>>, vector<1x32xf32>
    %cst_185 = arith.constant dense<0.000000e+00> : vector<2xf32>
    %533 = vector.multi_reduction <add>, %530, %cst_185 [1] : vector<2x32xf32> to vector<2xf32>
    %534 = vector.shape_cast %533 : vector<2xf32> to vector<2x1xf32>
    %cst_186 = arith.constant 3.200000e+01 : f32
    %535 = vector.broadcast %cst_186 : f32 to vector<2x1xf32>
    %536 = arith.divf %534, %535 : vector<2x1xf32>
    %537 = vector.broadcast %536 : vector<2x1xf32> to vector<2x32xf32>
    %538 = arith.subf %530, %537 : vector<2x32xf32>
    %539 = arith.mulf %538, %538 : vector<2x32xf32>
    %cst_187 = arith.constant dense<0.000000e+00> : vector<2xf32>
    %540 = vector.multi_reduction <add>, %539, %cst_187 [1] : vector<2x32xf32> to vector<2xf32>
    %541 = vector.shape_cast %540 : vector<2xf32> to vector<2x1xf32>
    %cst_188 = arith.constant 3.200000e+01 : f32
    %542 = vector.broadcast %cst_188 : f32 to vector<2x1xf32>
    %543 = arith.divf %541, %542 : vector<2x1xf32>
    %cst_189 = arith.constant 9.99999974E-6 : f32
    %544 = vector.broadcast %cst_189 : f32 to vector<2x1xf32>
    %545 = arith.addf %543, %544 : vector<2x1xf32>
    %546 = math.rsqrt %545 : vector<2x1xf32>
    %547 = vector.broadcast %546 : vector<2x1xf32> to vector<2x32xf32>
    %548 = arith.mulf %538, %547 : vector<2x32xf32>
    %549 = vector.broadcast %531 : vector<1x32xf32> to vector<2x32xf32>
    %550 = arith.mulf %548, %549 : vector<2x32xf32>
    %551 = vector.broadcast %532 : vector<1x32xf32> to vector<2x32xf32>
    %552 = arith.addf %550, %551 : vector<2x32xf32>
    %553 = arith.truncf %552 : vector<2x32xf32> to vector<2x32xbf16>
    %c0_190 = arith.constant 0 : index
    %c0_191 = arith.constant 0 : index
    %554 = vector.load %arg20[%c0_190, %c0_191] : memref<32x128xbf16, #tpu.memory_space<vmem>>, vector<32x128xbf16>
    %cst_192 = arith.constant dense<0.000000e+00> : vector<2x128xf32>
    %555 = tpu.matmul %553, %554, %cst_192 {dimension_numbers = #tpu.dot_dimension_numbers<[1], [0], [0], [1], [0, 0, 1, 1], [], []>} : vector<2x32xbf16>, vector<32x128xbf16>, vector<2x128xf32> -> vector<2x128xf32>
    %c0_193 = arith.constant 0 : index
    %c0_194 = arith.constant 0 : index
    %556 = vector.load %arg21[%c0_193, %c0_194] : memref<1x128xf32, #tpu.memory_space<vmem>>, vector<1x128xf32>
    %557 = vector.broadcast %556 : vector<1x128xf32> to vector<2x128xf32>
    %558 = arith.addf %555, %557 : vector<2x128xf32>
    %c0_195 = arith.constant 0 : index
    %c0_196 = arith.constant 0 : index
    %c0_197 = arith.constant 0 : index
    %559 = vector.load %arg22[%c0_195, %c0_196, %c0_197] : memref<1x2x128xf32, #tpu.memory_space<vmem>>, vector<1x2x128xf32>
    %560 = vector.shape_cast %559 : vector<1x2x128xf32> to vector<2x128xf32>
    %561 = vector.shape_cast %558 : vector<2x128xf32> to vector<1x2x128xf32>
    tpu.vector_store %arg22[%c0_195, %c0_196, %c0_197], %561 {strides = array<i32>} : memref<1x2x128xf32, #tpu.memory_space<vmem>>, vector<1x2x128xf32>,
    return
  }
  func.func @transform_0(%arg0: i32) -> (i32, i32, i32) {
    %c0_i32 = arith.constant 0 : i32
    %c0_i32_0 = arith.constant 0 : i32
    %c0_i32_1 = arith.constant 0 : i32
    return %arg0, %c0_i32, %c0_i32_0 : i32, i32, i32
  }
  func.func @transform_1(%arg0: i32) -> (i32, i32, i32) {
    %c0_i32 = arith.constant 0 : i32
    %c0_i32_0 = arith.constant 0 : i32
    %c0_i32_1 = arith.constant 0 : i32
    return %arg0, %c0_i32, %c0_i32_0 : i32, i32, i32
  }
  func.func @transform_2(%arg0: i32) -> (i32, i32) {
    %c0_i32 = arith.constant 0 : i32
    %c0_i32_0 = arith.constant 0 : i32
    %c0_i32_1 = arith.constant 0 : i32
    return %c0_i32, %c0_i32_0 : i32, i32
  }
  func.func @transform_3(%arg0: i32) -> (i32, i32) {
    %c0_i32 = arith.constant 0 : i32
    %c0_i32_0 = arith.constant 0 : i32
    %c0_i32_1 = arith.constant 0 : i32
    return %c0_i32, %c0_i32_0 : i32, i32
  }
  func.func @transform_4(%arg0: i32) -> (i32, i32) {
    %c0_i32 = arith.constant 0 : i32
    %c0_i32_0 = arith.constant 0 : i32
    %c0_i32_1 = arith.constant 0 : i32
    return %c0_i32, %c0_i32_0 : i32, i32
  }
  func.func @transform_5(%arg0: i32) -> (i32, i32, i32) {
    %c0_i32 = arith.constant 0 : i32
    %c0_i32_0 = arith.constant 0 : i32
    %c0_i32_1 = arith.constant 0 : i32
    %c0_i32_2 = arith.constant 0 : i32
    return %c0_i32, %c0_i32_0, %c0_i32_1 : i32, i32, i32
  }
  func.func @transform_6(%arg0: i32) -> (i32, i32, i32) {
    %c0_i32 = arith.constant 0 : i32
    %c0_i32_0 = arith.constant 0 : i32
    %c0_i32_1 = arith.constant 0 : i32
    %c0_i32_2 = arith.constant 0 : i32
    return %c0_i32, %c0_i32_0, %c0_i32_1 : i32, i32, i32
  }
  func.func @transform_7(%arg0: i32) -> (i32, i32, i32) {
    %c0_i32 = arith.constant 0 : i32
    %c0_i32_0 = arith.constant 0 : i32
    %c0_i32_1 = arith.constant 0 : i32
    %c0_i32_2 = arith.constant 0 : i32
    return %c0_i32, %c0_i32_0, %c0_i32_1 : i32, i32, i32
  }
  func.func @transform_8(%arg0: i32) -> (i32, i32, i32) {
    %c0_i32 = arith.constant 0 : i32
    %c0_i32_0 = arith.constant 0 : i32
    %c0_i32_1 = arith.constant 0 : i32
    %c0_i32_2 = arith.constant 0 : i32
    return %c0_i32, %c0_i32_0, %c0_i32_1 : i32, i32, i32
  }
  func.func @transform_9(%arg0: i32) -> (i32, i32, i32) {
    %c0_i32 = arith.constant 0 : i32
    %c0_i32_0 = arith.constant 0 : i32
    %c0_i32_1 = arith.constant 0 : i32
    %c0_i32_2 = arith.constant 0 : i32
    return %c0_i32, %c0_i32_0, %c0_i32_1 : i32, i32, i32
  }
  func.func @transform_10(%arg0: i32) -> (i32, i32, i32) {
    %c0_i32 = arith.constant 0 : i32
    %c0_i32_0 = arith.constant 0 : i32
    %c0_i32_1 = arith.constant 0 : i32
    %c0_i32_2 = arith.constant 0 : i32
    return %c0_i32, %c0_i32_0, %c0_i32_1 : i32, i32, i32
  }
  func.func @transform_11(%arg0: i32) -> (i32, i32, i32) {
    %c0_i32 = arith.constant 0 : i32
    %c0_i32_0 = arith.constant 0 : i32
    %c0_i32_1 = arith.constant 0 : i32
    %c0_i32_2 = arith.constant 0 : i32
    return %c0_i32, %c0_i32_0, %c0_i32_1 : i32, i32, i32
  }
  func.func @transform_12(%arg0: i32) -> (i32, i32, i32) {
    %c0_i32 = arith.constant 0 : i32
    %c0_i32_0 = arith.constant 0 : i32
    %c0_i32_1 = arith.constant 0 : i32
    %c0_i32_2 = arith.constant 0 : i32
    return %c0_i32, %c0_i32_0, %c0_i32_1 : i32, i32, i32
  }
  func.func @transform_13(%arg0: i32) -> (i32, i32, i32) {
    %c0_i32 = arith.constant 0 : i32
    %c0_i32_0 = arith.constant 0 : i32
    %c0_i32_1 = arith.constant 0 : i32
    %c0_i32_2 = arith.constant 0 : i32
    return %c0_i32, %c0_i32_0, %c0_i32_1 : i32, i32, i32
  }
  func.func @transform_14(%arg0: i32) -> (i32, i32, i32) {
    %c0_i32 = arith.constant 0 : i32
    %c0_i32_0 = arith.constant 0 : i32
    %c0_i32_1 = arith.constant 0 : i32
    %c0_i32_2 = arith.constant 0 : i32
    return %c0_i32, %c0_i32_0, %c0_i32_1 : i32, i32, i32
  }
  func.func @transform_15(%arg0: i32) -> (i32, i32, i32) {
    %c0_i32 = arith.constant 0 : i32
    %c0_i32_0 = arith.constant 0 : i32
    %c0_i32_1 = arith.constant 0 : i32
    %c0_i32_2 = arith.constant 0 : i32
    return %c0_i32, %c0_i32_0, %c0_i32_1 : i32, i32, i32
  }
  func.func @transform_16(%arg0: i32) -> (i32, i32, i32) {
    %c0_i32 = arith.constant 0 : i32
    %c0_i32_0 = arith.constant 0 : i32
    %c0_i32_1 = arith.constant 0 : i32
    %c0_i32_2 = arith.constant 0 : i32
    return %c0_i32, %c0_i32_0, %c0_i32_1 : i32, i32, i32
  }
  func.func @transform_17(%arg0: i32) -> (i32, i32) {
    %c0_i32 = arith.constant 0 : i32
    %c0_i32_0 = arith.constant 0 : i32
    %c0_i32_1 = arith.constant 0 : i32
    return %c0_i32, %c0_i32_0 : i32, i32
  }
  func.func @transform_18(%arg0: i32) -> (i32, i32) {
    %c0_i32 = arith.constant 0 : i32
    %c0_i32_0 = arith.constant 0 : i32
    %c0_i32_1 = arith.constant 0 : i32
    return %c0_i32, %c0_i32_0 : i32, i32
  }
  func.func @transform_19(%arg0: i32) -> (i32, i32) {
    %c0_i32 = arith.constant 0 : i32
    %c0_i32_0 = arith.constant 0 : i32
    %c0_i32_1 = arith.constant 0 : i32
    return %c0_i32, %c0_i32_0 : i32, i32
  }
  func.func @transform_20(%arg0: i32) -> (i32, i32) {
    %c0_i32 = arith.constant 0 : i32
    %c0_i32_0 = arith.constant 0 : i32
    %c0_i32_1 = arith.constant 0 : i32
    return %c0_i32, %c0_i32_0 : i32, i32
  }
  func.func @transform_21(%arg0: i32) -> (i32, i32, i32) {
    %c0_i32 = arith.constant 0 : i32
    %c0_i32_0 = arith.constant 0 : i32
    %c0_i32_1 = arith.constant 0 : i32
    return %arg0, %c0_i32, %c0_i32_0 : i32, i32, i32
  }
}

</mosaic_0001>

<bundles_post_ra>
// kernel: chess_forward.1
= control target key start
LH: loop header
LB: loop body
LE: loop exit
PB: predicated region body
PF: predicated region fallthrough
CT: control target
= control target key end

     0   :  { %v5821_v0 = vmov 0   ;;  %v5822_v7 = vmov 0.0   ;;  %v73_v10 = vlaneseq  ;;  %vm101_vm0 = vcmask 130048   ;;  %s5824_s29 = smov 88   ;;  %s7287_s22 = smov 112   ;;  %s7246_s0 = inlined_call_operand.vmem [shape: s32[1,32,1], index: 0, kind: input, shape index: {}]   ;;  %s7247_s2 = inlined_call_operand.vmem [shape: f32[16,32], index: 2, kind: input, shape index: {}]   ;;  %s7248_s1 = inlined_call_operand.vmem [shape: f32[1,4,1], index: 1, kind: input, shape index: {}]   ;;  %s7249_s3 = inlined_call_operand.vmem [shape: f32[16,32], index: 3, kind: input, shape index: {}]   ;;  %s7250_s4 = inlined_call_operand.vmem [shape: f32[129,32], index: 4, kind: input, shape index: {}]   ;;  %s7251_s7 = inlined_call_operand.vmem [shape: bf16[2,32,96], index: 7, kind: input, shape index: {}]   ;;  %s7252_s5 = inlined_call_operand.vmem [shape: f32[2,1,32], index: 5, kind: input, shape index: {}]   ;;  %s7253_s6 = inlined_call_operand.vmem [shape: f32[2,1,32], index: 6, kind: input, shape index: {}]   ;;  %s7254_s8 = inlined_call_operand.vmem [shape: f32[2,1,96], index: 8, kind: input, shape index: {}]   ;;  %s7255_s9 = inlined_call_operand.vmem [shape: bf16[2,32,32], index: 9, kind: input, shape index: {}]   ;;  %s7256_s10 = inlined_call_operand.vmem [shape: f32[2,1,32], index: 10, kind: input, shape index: {}]   ;;  %s7257_s13 = inlined_call_operand.vmem [shape: bf16[2,32,128], index: 13, kind: input, shape index: {}]   ;;  %s7258_s11 = inlined_call_operand.vmem [shape: f32[2,1,32], index: 11, kind: input, shape index: {}]   ;;  %s7259_s12 = inlined_call_operand.vmem [shape: f32[2,1,32], index: 12, kind: input, shape index: {}]   ;;  %s7260_s15 = inlined_call_operand.vmem [shape: bf16[2,128,32], index: 15, kind: input, shape index: {}]   ;;  %s7261_s14 = inlined_call_operand.vmem [shape: f32[2,1,128], index: 14, kind: input, shape index: {}]   ;;  %s7262_s16 = inlined_call_operand.vmem [shape: f32[2,1,32], index: 16, kind: input, shape index: {}]   ;;  %s7263_s19 = inlined_call_operand.vmem [shape: bf16[32,128], index: 19, kind: input, shape index: {}]   ;;  %s7264_s17 = inlined_call_operand.vmem [shape: f32[1,32], index: 17, kind: input, shape index: {}]   ;;  %s7265_s18 = inlined_call_operand.vmem [shape: f32[1,32], index: 18, kind: input, shape index: {}]   ;;  %s7266_s20 = inlined_call_operand.vmem [shape: f32[1,128], index: 20, kind: input, shape index: {}]   ;;  %s7267_s21 = inlined_call_operand.vmem [shape: f32[1,2,128], index: 21, kind: output, shape index: {}]  }
   0x1   :  { %7289 = sst [smem:[#allocation2_spill]] %s7246_s0  ;;  %5462 = vset.pattern.permute.xlu0 %v5821_v0  ;;  %5463 = vset.pattern.permute.xlu1 %v5821_v0  ;;  %vm235_vm5 = vcmask 261120   ;;  %vm227_vm6 = vcmask 1041408   ;;  %vm218_vm7 = vcmask 1044480   ;;  %vm231_vm8 = vcmask 1046528   ;;  %s5830_s24 = smov 56  }
   0x2   :  { %7290 = sst [smem:[#allocation3_spill]] %s7247_s2  ;;  %s7295_s26 = sld [smem:[#allocation2_spill]]  ;;  %5408 = vmatprep.subr.bf16.mxu1 %v5822_v7  ;;  %v74_v11 = vand.u32 127, %v73_v10  ;;  %vm251_vm9 = vcmask 254976   ;;  %vm5823_vm10 = vmmov 0   ;;  %vm440_vm11 = vcmask 64512  }
   0x3   :  { %7291 = sst [smem:[#allocation4_spill]] %s7248_s1  ;;  %s7296_s0 = sld [smem:[#allocation3_spill]]  ;;  %4996 = vmatprep.mubr.msk.bf16.mxu1 %vm5823_vm10, %v5822_v7  ;;  %vm501_vm12 = vcmask 171008   ;;  %vm508_vm13 = vcmask 167936   ;;  %vm549_vm14 = vcmask 1042432  }
   0x4   :  { %7292 = sst [smem:[#allocation5_spill]] %s7249_s3  ;;  %s7297_s25 = sld [smem:[#allocation4_spill]]  ;;  %vm1146_vm15 = vsmask.f32 5376 }
   0x5   :  { %7293 = sst [smem:[#allocation6_spill]] %s7250_s4  ;;  %s7298_s3 = sld [smem:[#allocation5_spill]] }
   0x6   :  { %7294 = sst [smem:[#allocation7_spill]] %s7251_s7  ;;  %s7299_s30 = sld [smem:[#allocation6_spill]] }
   0x7   :  { %s7300_s23 = sld [smem:[#allocation7_spill]]  ;;  %s5826_s4 = smov 120  }
   0x8   :  { %v69_v1 = vld [vmem:[%s7295_s26] sm:$0xff]  ;;  %v71_v2 = vld [vmem:[%s7295_s26 + $0x10] sm:$0xff]  ;;  %v70_v4 = vld [vmem:[%s7295_s26 + $0x8] sm:$0xff]  ;;  %s5827_s7 = smov 80   ;;  %s5829_s2 = smov 64  }
   0x9   :  { %76 = vperm.xlu0 %5462, %v69_v1   ;;  %82 = vperm.xlu1 %5463, %v71_v2   ;;  %v99_v3 = vld [vmem:[%s7296_s0] sm:$0xff]  ;;  %v72_v5 = vld [vmem:[%s7295_s26 + $0x18] sm:$0xff]  ;;  %v100_v6 = vld [vmem:[%s7296_s0 + $0x8] sm:$0xff]  ;;  %s5825_s0 = smov 96   ;;  %s7281_s1 = smov 48  }
   0xa   :  { %v5404_v8 = vpack.c.bf16 %v100_v6, %v99_v3  ;;  %v199_v9 = vld [vmem:[%s7297_s25] sm:$0xf]  ;;  %s7279_s25 = smov 72   ;;  %s7273_s26 = smov 104  }
   0xb   :  { %v206_v20 = vld [vmem:[%s7298_s3 + $0x8] sm:$0xff]  ;;  %v205_v21 = vld [vmem:[%s7298_s3] sm:$0xff]  ;;  %s7277_s27 = smov 40   ;;  %s7285_s3 = smov 16  }
   0xc   :  { %5405 = vmatprep.subr.bf16.mxu0 %v5404_v8  ;;  %v5997_v31 = vld [vmem:[%s7299_s30 + $0x80] ss:$0 sm:$0xff]  ;;  %s7275_s28 = smov 8  }
   0xd   :  { %79 = vperm.xlu0 %5462, %v70_v4   ;;  %85 = vperm.xlu1 %5463, %v72_v5   ;;  %v252_v0 = vsel %vm251_vm9, %v5997_v31, 0.0  ;;  %v5524_v2 = vld [vmem:[%s7300_s23] sm:$0xff]   ;;  %v5525_v3 = vld [vmem:[%s7300_s23 + $0x8] sm:$0xff]  }
   0xe   :  { %5407 = vmatpush3.bf16.msra.mxu0 %v5404_v8  ;;  %5410 = vmatpush3.bf16.msra.mxu1 %v5524_v2 }
   0xf   :  { %4988 = vmatprep.subr.bf16.mxu0 %v5822_v7  ;;  %5409 = vmatprep.subr.bf16.mxu1 %v5822_v7 }
  0x11   :  { %211 = vperm.xlu0 %5462, %v199_v9  }
  0x12   :  { %5411 = vmatpush3.bf16.msra.mxu1 %v5525_v3 }
  0x88   :  { %v77_v12 = vpop.permute.xlu0 %76  ;;  %v83_v13 = vpop.permute.xlu1 %82 }
  0x89   :  { %vm87_vm1 = vcmp.eq.s32.totalorder %v77_v12, %v74_v11  ;;  %vm89_vm2 = vcmp.eq.s32.totalorder %v83_v13, %v74_v11 }
  0x8a   :  { %v4612_v14 = vsel %vm87_vm1, 1.0, %v5822_v7  ;;  %v4614_v17 = vsel %vm89_vm2, 1.0, %v5822_v7  ;;  %vm1140_vm1 = vcmask 195584  }
  0x8b   :  { %4982 = vmatprep.mubr.msk.f32.mxu0 %vm101_vm0, %v4612_v14 }
  0x8c   :  { %v80_v15 = vpop.permute.xlu0 %79  ;;  %v86_v16 = vpop.permute.xlu1 %85 }
  0x8d   :  { %vm88_vm3 = vcmp.eq.s32.totalorder %v80_v15, %v74_v11  ;;  %vm90_vm4 = vcmp.eq.s32.totalorder %v86_v16, %v74_v11 }
  0x8e   :  { %v4613_v18 = vsel %vm88_vm3, 1.0, %v5822_v7  ;;  %v4615_v19 = vsel %vm90_vm4, 1.0, %v5822_v7 }
  0x8f   :  { %4983 = vmatmul.mubr.msk.f32.vlgmr.msra.gmra.mrb[0].mxu0 %vm101_vm0, %v4613_v18 }
  0x90   :  { %4985 = vmatprep.mubr.msk.f32.mxu0 %vm101_vm0, %v4614_v17  ;;  %v212_v32 = vpop.permute.xlu0 %211  ;;  %4989 = vmatpush3.bf16.msra.mxu0 %v5524_v2 }
  0x91   :  { %v228_v36 = vsel %vm227_vm6, %v212_v32, %v5997_v31  ;;  %v225_v55 = vrot.slane %v212_v32, 5  ;;  %4990 = vmatprep.subr.bf16.mxu0 %v5822_v7 }
  0x93   :  { %4986 = vmatmul.mubr.msk.f32.gmra.mrb[2].mxu0 %vm101_vm0, %v4615_v19 }
  0x94   :  { %4992 = vmatprep.mubr.msk.bf16.mxu0 %vm5823_vm10, %v5822_v7  ;;  %4991 = vmatpush3.bf16.msra.mxu0 %v5525_v3  ;;  %v6077_v3 = vld [vmem:[%s7254_s8] ss:$0 sm:$0xff] }
 0x162   :  { %v4984_v22 = vpop.f32.mrb[0].mxu0 }
 0x163   :  { %v5986_v23 = vadd.f32 %v4984_v22, %v206_v20  ;;  %v180_v24 = vpop.f32.mrb[1].mxu0  ;;  %v4621_v22 = vld [vmem:[%s7252_s5] ss:$0 sm:$0xff] }
 0x164   :  { %v5988_v25 = vadd.f32 %v205_v21, %v180_v24 }
 0x165   :  { %v239_v26 = vsel %vm235_vm5, %v5986_v23, 0.0 }
 0x166   :  { %240 = vadd.xlane.f32.xlu0 %v239_v26  ;;  %v4987_v27 = vpop.f32.mrb[2].mxu0  ;;  %v236_v28 = vsel %vm235_vm5, %v5988_v25, 0.0 }
 0x167   :  { %v215_v29 = vadd.f32 %v4987_v27, %v206_v20  ;;  %237 = vadd.xlane.f32.xlu1 %v236_v28  ;;  %v190_v30 = vpop.f32.mrb[3].mxu0 }
 0x168   :  { %v214_v33 = vadd.f32 %v205_v21, %v190_v30 }
 0x169   :  { %v220_v34 = vrot.slane %v215_v29, 3  ;;  %v4622_v29 = vld [vmem:[%s7253_s6] ss:$0 sm:$0xff] }
 0x16a   :  { %v219_v35 = vrot.slane %v214_v33, 3 }
 0x16b   :  { %v230_v60 = vsel %vm218_vm7, %v220_v34, %v225_v55 }
 0x16c   :  { %v6002_v37 = vsel %vm218_vm7, %v219_v35, %v220_v34  ;;  %v6005_v38 = vsel %vm218_vm7, %v228_v36, %v219_v35  ;;  %v6037_v63 = vsel %vm231_vm8, %v230_v60, %v5997_v31 }
 0x16d   :  { %v245_v39 = vsel %vm235_vm5, %v6002_v37, 0.0  ;;  %v242_v40 = vsel %vm235_vm5, %v6005_v38, 0.0  ;;  %v248_v1 = vsel %vm235_vm5, %v6037_v63, 0.0 }
 0x16e   :  { %246 = vadd.xlane.f32.xlu1 %v245_v39  ;;  %243 = vadd.xlane.f32.xlu0 %v242_v40 }
 0x1f3   :  { %v241_v41 = vpop.xlane.xlu0 %240 }
 0x1f4   :  { %v257_v42 = vmul.f32 0.03125, %v241_v41  ;;  %v238_v43 = vpop.xlane.xlu1 %237 }
 0x1f5   :  { %v256_v44 = vmul.f32 0.03125, %v238_v43 }
 0x1f6   :  { %v6012_v45 = vsub.f32 %v5986_v23, %v257_v42 }
 0x1f7   :  { %v6015_v46 = vsub.f32 %v5988_v25, %v256_v44 }
 0x1f8   :  { %v269_v47 = vmul.f32 %v6012_v45, %v6012_v45 }
 0x1f9   :  { %v268_v48 = vmul.f32 %v6015_v46, %v6015_v46 }
 0x1fa   :  { %v277_v49 = vsel %vm235_vm5, %v269_v47, 0.0 }
 0x1fb   :  { %v247_v50 = vpop.xlane.xlu1 %246  ;;  %278 = vadd.xlane.f32.xlu1 %v277_v49  ;;  %v244_v51 = vpop.xlane.xlu0 %243  ;;  %v274_v52 = vsel %vm235_vm5, %v268_v48, 0.0 }
 0x1fc   :  { %v259_v53 = vmul.f32 0.03125, %v247_v50  ;;  %v258_v54 = vmul.f32 0.03125, %v244_v51  ;;  %275 = vadd.xlane.f32.xlu0 %v274_v52 }
 0x1fe   :  { %v6024_v56 = vsub.f32 %v6002_v37, %v259_v53  ;;  %v6027_v57 = vsub.f32 %v6005_v38, %v258_v54 }
 0x200   :  { %v271_v58 = vmul.f32 %v6024_v56, %v6024_v56  ;;  %v270_v59 = vmul.f32 %v6027_v57, %v6027_v57 }
 0x202   :  { %v283_v61 = vsel %vm235_vm5, %v271_v58, 0.0  ;;  %v280_v62 = vsel %vm235_vm5, %v270_v59, 0.0 }
 0x203   :  { %284 = vadd.xlane.f32.xlu1 %v283_v61  ;;  %281 = vadd.xlane.f32.xlu0 %v280_v62 }
 0x207   :  { %253 = vadd.xlane.f32.xlu1 %v252_v0  ;;  %249 = vadd.xlane.f32.xlu0 %v248_v1 }
 0x288   :  { %v279_v4 = vpop.xlane.xlu1 %278 }
 0x289   :  { %v293_v5 = vmul.f32 0.03125, %v279_v4  ;;  %v276_v6 = vpop.xlane.xlu0 %275 }
 0x28a   :  { %v292_v8 = vmul.f32 0.03125, %v276_v6 }
 0x28b   :  { %v299_v9 = vadd.f32 1e-05, %v293_v5 }
 0x28c   :  { %v298_v10 = vadd.f32 1e-05, %v292_v8 }
 0x28d   :  { %5554 = vrsqrt.f32 %v299_v9 }
 0x28e   :  { %5556 = vrsqrt.f32 %v298_v10 }
 0x290   :  { %v285_v11 = vpop.xlane.xlu1 %284  ;;  %v282_v12 = vpop.xlane.xlu0 %281 }
 0x291   :  { %v295_v13 = vmul.f32 0.03125, %v285_v11  ;;  %v294_v14 = vmul.f32 0.03125, %v282_v12 }
 0x293   :  { %v301_v15 = vadd.f32 1e-05, %v295_v13  ;;  %v300_v16 = vadd.f32 1e-05, %v294_v14 }
 0x294   :  { %v254_v17 = vpop.xlane.xlu1 %253  ;;  %v250_v18 = vpop.xlane.xlu0 %249 }
 0x295   :  { %5558 = vrsqrt.f32 %v301_v15  ;;  %v261_v19 = vmul.f32 0.03125, %v254_v17  ;;  %v260_v20 = vmul.f32 0.03125, %v250_v18 }
 0x296   :  { %5560 = vrsqrt.f32 %v300_v16 }
 0x297   :  { %v5555_v21 = vpop.eup %5554  ;;  %v267_v24 = vsub.f32 %v5997_v31, %v261_v19  ;;  %v266_v26 = vsub.f32 %v6037_v63, %v260_v20 }
 0x298   :  { %v5557_v27 = vpop.eup %5556  ;;  %v311_v28 = vmul.f32 %v5555_v21, %v6012_v45 }
 0x299   :  { %v310_v30 = vmul.f32 %v5557_v27, %v6015_v46  ;;  %v273_v32 = vmul.f32 %v267_v24, %v267_v24  ;;  %v272_v33 = vmul.f32 %v266_v26, %v266_v26 }
 0x29a   :  { %v323_v34 = vmul.f32 %v4621_v22, %v311_v28 }
 0x29b   :  { %v322_v35 = vmul.f32 %v4621_v22, %v310_v30  ;;  %v289_v36 = vsel %vm251_vm9, %v273_v32, 0.0  ;;  %v286_v39 = vsel %vm235_vm5, %v272_v33, 0.0 }
 0x29c   :  { %v335_v31 = vadd.f32 %v4622_v29, %v323_v34  ;;  %290 = vadd.xlane.f32.xlu1 %v289_v36  ;;  %287 = vadd.xlane.f32.xlu0 %v286_v39 }
 0x29d   :  { %v334_v40 = vadd.f32 %v4622_v29, %v322_v35 }
 0x29f   :  { %v5559_v41 = vpop.eup %5558  ;;  %v340_v42 = vpack.c.bf16 %v335_v31, %v334_v40 }
 0x2a0   :  { %v5561_v43 = vpop.eup %5560  ;;  %v313_v44 = vmul.f32 %v5559_v41, %v6024_v56 }
 0x2a1   :  { %4993 = vmatmul.mubr.msk.bf16.vlgmr.msra.gmra.mrb[4].mxu0 %vm235_vm5, %v340_v42  ;;  %v312_v45 = vmul.f32 %v5561_v43, %v6027_v57 }
 0x2a2   :  { %v325_v46 = vmul.f32 %v4621_v22, %v313_v44 }
 0x2a3   :  { %v324_v47 = vmul.f32 %v4621_v22, %v312_v45 }
 0x2a4   :  { %v337_v48 = vadd.f32 %v4622_v29, %v325_v46 }
 0x2a5   :  { %v336_v49 = vadd.f32 %v4622_v29, %v324_v47 }
 0x2a7   :  { %v341_v50 = vpack.c.bf16 %v337_v48, %v336_v49 }
 0x2a9   :  { %4997 = vmatmul.mubr.msk.bf16.vlgmr.msra.gmra.mrb[0].mxu1 %vm235_vm5, %v341_v50 }
 0x2aa   :  { %5000 = vmatprep.mubr.msk.bf16.mxu1 %vm5823_vm10, %v5822_v7 }
 0x329   :  { %v291_v51 = vpop.xlane.xlu1 %290  ;;  %v288_v52 = vpop.xlane.xlu0 %287 }
 0x32a   :  { %v297_v53 = vmul.f32 0.03125, %v291_v51  ;;  %v296_v54 = vmul.f32 0.03125, %v288_v52 }
 0x32c   :  { %v303_v55 = vadd.f32 1e-05, %v297_v53  ;;  %v302_v56 = vadd.f32 1e-05, %v296_v54 }
 0x32e   :  { %5562 = vrsqrt.f32 %v303_v55 }
 0x32f   :  { %5564 = vrsqrt.f32 %v302_v56 }
 0x338   :  { %v5563_v58 = vpop.eup %5562 }
 0x339   :  { %v5565_v57 = vpop.eup %5564  ;;  %v315_v59 = vmul.f32 %v5563_v58, %v267_v24 }
 0x33a   :  { %v314_v60 = vmul.f32 %v5565_v57, %v266_v26 }
 0x33b   :  { %v327_v61 = vmul.f32 %v4621_v22, %v315_v59 }
 0x33c   :  { %v326_v62 = vmul.f32 %v4621_v22, %v314_v60 }
 0x33d   :  { %v339_v0 = vadd.f32 %v4622_v29, %v327_v61 }
 0x33e   :  { %v338_v1 = vadd.f32 %v4622_v29, %v326_v62 }
 0x340   :  { %v342_v2 = vpack.c.bf16 %v339_v0, %v338_v1 }
 0x342   :  { %5001 = vmatmul.mubr.msk.bf16.gmra.mrb[4].mxu1 %vm235_vm5, %v342_v2 }
 0x374   :  { %v409_v4 = vpop.f32.mrb[4].mxu0 }
 0x375   :  { %v4994_v5 = vpop.f32.mrb[5].mxu0  ;;  %v410_v8 = vadd.f32 %v6077_v3, %v409_v4 }
 0x376   :  { %v412_v6 = vpop.f32.mrb[6].mxu0 }
 0x377   :  { %v413_v9 = vadd.f32 %v6077_v3, %v412_v6  ;;  %v4995_v10 = vpop.f32.mrb[7].mxu0 }
 0x379   :  { %v6081_v11 = vpack.c.bf16 %v413_v9, %v410_v8 }
 0x37b   :  { %607 = vrot.lane.b32.xlu1 %v6081_v11, %s5824_s29  ;;  %5008 = vmatprep.mubr.msk.bf16.mxu0 %vm440_vm11, %v6081_v11 }
 0x37c   :  { %v417_v12 = vpop.f32.mrb[0].mxu1  ;;  %436 = vrot.lane.b32.xlu0 %v6081_v11, %s5825_s0 }
 0x37d   :  { %v418_v13 = vadd.f32 %v6077_v3, %v417_v12  ;;  %v4998_v14 = vpop.f32.mrb[1].mxu1 }
 0x37e   :  { %v420_v15 = vpop.f32.mrb[2].mxu1 }
 0x37f   :  { %v6090_v16 = vpack.c.bf16 %v418_v13, %v418_v13  ;;  %v421_v17 = vadd.f32 %v6077_v3, %v420_v15  ;;  %v4999_v18 = vpop.f32.mrb[3].mxu1 }
 0x381   :  { %v6093_v19 = vpack.c.bf16 %v421_v17, %v418_v13  ;;  %438 = vrot.lane.b32.xlu1 %v6090_v16, %s5825_s0  ;;  %609 = vrot.lane.b32.xlu0 %v6090_v16, %s5824_s29 }
 0x385   :  { %603 = vrot.lane.b32.xlu1 %v6081_v11, %s5826_s4  ;;  %772 = vrot.lane.b32.xlu0 %v6081_v11, %s5827_s7 }
 0x389   :  { %605 = vrot.lane.b32.xlu1 %v6090_v16, %s5826_s4  ;;  %774 = vrot.lane.b32.xlu0 %v6090_v16, %s5827_s7 }
 0x38d   :  { %768 = vrot.lane.b32.xlu1 %v6081_v11, %s7287_s22  ;;  %770 = vrot.lane.b32.xlu0 %v6090_v16, %s7287_s22 }
 0x3ed   :  { %v608_v20 = vpop.permute.xlu1 %607 }
 0x3ee   :  { %v437_v21 = vpop.permute.xlu0 %436  ;;  %5414 = vmatprep.subr.msk.bf16.mxu1 %vm440_vm11, %v608_v20  ;;  %v618_v22 = vsel %vm440_vm11, %v608_v20, 0 }
 0x3ef   :  { %5412 = vmatprep.subr.msk.bf16.mxu0 %vm440_vm11, %v437_v21  ;;  %v448_v24 = vsel %vm440_vm11, %v437_v21, 0  ;;  %5021 = vmatpush3.bf16.xpose.msra.mxu1 %v618_v22 }
 0x3f0   :  { %5005 = vmatpush3.bf16.xpose.msra.mxu0 %v448_v24 }
 0x3f3   :  { %v439_v26 = vpop.permute.xlu1 %438  ;;  %v610_v27 = vpop.permute.xlu0 %609 }
 0x3f4   :  { %5413 = vmatprep.subr.msk.bf16.mxu0 %vm440_vm11, %v439_v26  ;;  %5415 = vmatprep.subr.msk.bf16.mxu1 %vm440_vm11, %v610_v27  ;;  %v621_v28 = vsel %vm440_vm11, %v610_v27, 0  ;;  %v451_v32 = vsel %vm440_vm11, %v439_v26, 0 }
 0x3f7   :  { %v604_v29 = vpop.permute.xlu1 %603  ;;  %v773_v30 = vpop.permute.xlu0 %772  ;;  %5023 = vmatpush3.bf16.xpose.msra.mxu1 %v621_v28 }
 0x3f8   :  { %5007 = vmatpush3.bf16.xpose.msra.mxu0 %v451_v32  ;;  %5024 = vmatprep.mubr.msk.bf16.mxu1 %vm440_vm11, %v604_v29  ;;  %v783_v34 = vsel %vm440_vm11, %v773_v30, 0 }
 0x3f9   :  { %5416 = vmatprep.subr.msk.bf16.mxu1 %vm440_vm11, %v773_v30 }
 0x3fb   :  { %v606_v33 = vpop.permute.xlu1 %605  ;;  %v775_v35 = vpop.permute.xlu0 %774 }
 0x3fc   :  { %v786_v39 = vsel %vm440_vm11, %v775_v35, 0 }
 0x3fe   :  { %5025 = vmatmul.mubr.msk.bf16.vlgmr.msra.gmra.mrb[8].mxu1 %vm440_vm11, %v606_v33 }
 0x3ff   :  { %v769_v36 = vpop.permute.xlu1 %768  ;;  %5009 = vmatmul.mubr.msk.bf16.vlgmr.msra.gmra.mrb[8].mxu0 %vm440_vm11, %v6090_v16  ;;  %5037 = vmatpush3.bf16.xpose.msra.mxu1 %v783_v34  ;;  %v771_v31 = vpop.permute.xlu0 %770 }
 0x400   :  { %5040 = vmatprep.mubr.msk.bf16.mxu1 %vm440_vm11, %v769_v36  ;;  %5417 = vmatprep.subr.msk.bf16.mxu1 %vm440_vm11, %v775_v35 }
 0x407   :  { %5039 = vmatpush3.bf16.xpose.msra.mxu1 %v786_v39 }
 0x40e   :  { %5041 = vmatmul.mubr.msk.bf16.vlgmr.msra.gmra.mrb[12].mxu1 %vm440_vm11, %v771_v31 }
 0x415   :  { %v425_v40 = vpop.f32.mrb[4].mxu1 }
 0x416   :  { %v5002_v41 = vpop.f32.mrb[5].mxu1  ;;  %v426_v43 = vadd.f32 %v6077_v3, %v425_v40 }
 0x417   :  { %v428_v42 = vpop.f32.mrb[6].mxu1 }
 0x418   :  { %v429_v44 = vadd.f32 %v6077_v3, %v428_v42  ;;  %v5003_v45 = vpop.f32.mrb[7].mxu1 }
 0x41a   :  { %v6131_v46 = vpack.c.bf16 %v429_v44, %v426_v43 }
 0x4d1   :  { %v5026_v47 = vpop.f32.mrb[8].mxu1 }
 0x4d2   :  { %v5010_v48 = vpop.f32.mrb[8].mxu0  ;;  %v657_v49 = vpop.f32.mrb[9].mxu1  ;;  %v677_v59 = vsel %vm508_vm13, %v5026_v47, -inf }
 0x4d3   :  { %v487_v50 = vpop.f32.mrb[9].mxu0  ;;  %v5027_v51 = vpop.f32.mrb[10].mxu1  ;;  %v671_v58 = vsel %vm501_vm12, %v657_v49, -inf  ;;  %v509_v57 = vsel %vm508_vm13, %v5010_v48, -inf }
 0x4d4   :  { %v5011_v52 = vpop.f32.mrb[10].mxu0  ;;  %v502_v53 = vsel %vm501_vm12, %v487_v50, -inf  ;;  %v660_v54 = vpop.f32.mrb[11].mxu1 }
 0x4d5   :  { %503 = vmax.xlane.f32.xlu1 %v502_v53  ;;  %v490_v55 = vpop.f32.mrb[11].mxu0  ;;  %v674_v60 = vsel %vm501_vm12, %v660_v54, -inf }
 0x4d6   :  { %v505_v56 = vsel %vm501_vm12, %v490_v55, -inf }
 0x4d7   :  { %506 = vmax.xlane.f32.xlu0 %v505_v56 }
 0x4d9   :  { %672 = vmax.xlane.f32.xlu1 %v671_v58 }
 0x4db   :  { %510 = vmax.xlane.f32.xlu0 %v509_v57 }
 0x4dd   :  { %678 = vmax.xlane.f32.xlu1 %v677_v59 }
 0x4df   :  { %675 = vmax.xlane.f32.xlu0 %v674_v60 }
 0x4e1   :  { %v5042_v61 = vpop.f32.mrb[12].mxu1 }
 0x4e2   :  { %v822_v62 = vpop.f32.mrb[13].mxu1  ;;  %v842_v4 = vsel %vm508_vm13, %v5042_v61, -inf }
 0x4e3   :  { %v5043_v0 = vpop.f32.mrb[14].mxu1  ;;  %v836_v1 = vsel %vm501_vm12, %v822_v62, -inf }
 0x4e4   :  { %837 = vmax.xlane.f32.xlu0 %v836_v1  ;;  %v825_v2 = vpop.f32.mrb[15].mxu1 }
 0x4e5   :  { %v839_v3 = vsel %vm501_vm12, %v825_v2, -inf }
 0x4e6   :  { %840 = vmax.xlane.f32.xlu1 %v839_v3 }
 0x4e8   :  { %843 = vmax.xlane.f32.xlu0 %v842_v4 }
 0x4f7   :  { %538 = vrot.lane.b32.xlu1 %v6081_v11, %s5829_s2 }
 0x562   :  { %v504_v5 = vpop.xlane.xlu1 %503 }
 0x563   :  { %v512_v8 = vsub.f32 %v487_v50, %v504_v5 }
 0x564   :  { %v507_v6 = vpop.xlane.xlu0 %506 }
 0x565   :  { %v515_v14 = vmul.f32 1.442695, %v512_v8  ;;  %v513_v20 = vsub.f32 %v490_v55, %v507_v6 }
 0x566   :  { %v673_v9 = vpop.xlane.xlu1 %672 }
 0x567   :  { %v680_v12 = vsub.f32 %v657_v49, %v673_v9  ;;  %v517_v28 = vmul.f32 1.442695, %v513_v20 }
 0x568   :  { %v511_v10 = vpop.xlane.xlu0 %510 }
 0x569   :  { %v514_v13 = vsub.f32 %v5010_v48, %v511_v10  ;;  %v683_v22 = vmul.f32 1.442695, %v680_v12 }
 0x56a   :  { %v679_v15 = vpop.xlane.xlu1 %678 }
 0x56b   :  { %v519_v17 = vmul.f32 1.442695, %v514_v13  ;;  %v682_v18 = vsub.f32 %v5026_v47, %v679_v15  ;;  %v5834_v13 = vmov 65535  }
 0x56c   :  { %v676_v21 = vpop.xlane.xlu0 %675 }
 0x56d   :  { %5566 = vpow2.f32 %v519_v17  ;;  %v687_v24 = vmul.f32 1.442695, %v682_v18  ;;  %v681_v26 = vsub.f32 %v660_v54, %v676_v21 }
 0x56e   :  { %5568 = vpow2.f32 %v515_v14  ;;  %v550_v14 = vsel %vm227_vm6, 4294967295, %v5834_v13 }
 0x56f   :  { %5570 = vpow2.f32 %v687_v24  ;;  %v685_v27 = vmul.f32 1.442695, %v681_v26  ;;  %v6197_v21 = vsel %vm549_vm14, %v550_v14, 0 }
 0x570   :  { %5572 = vpow2.f32 %v683_v22 }
 0x571   :  { %v838_v29 = vpop.xlane.xlu0 %837  ;;  %5574 = vpow2.f32 %v685_v27 }
 0x572   :  { %5576 = vpow2.f32 %v517_v28  ;;  %v845_v32 = vsub.f32 %v822_v62, %v838_v29 }
 0x573   :  { %v841_v30 = vpop.xlane.xlu1 %840 }
 0x574   :  { %v848_v42 = vmul.f32 1.442695, %v845_v32  ;;  %v846_v43 = vsub.f32 %v825_v2, %v841_v30 }
 0x575   :  { %v844_v33 = vpop.xlane.xlu0 %843 }
 0x576   :  { %v847_v34 = vsub.f32 %v5042_v61, %v844_v33  ;;  %v850_v49 = vmul.f32 1.442695, %v846_v43 }
 0x577   :  { %v6144_v35 = vpop.eup %5566  ;;  %v539_v36 = vpop.permute.xlu1 %538 }
 0x578   :  { %v6146_v39 = vpop.eup %5568  ;;  %v852_v31 = vmul.f32 1.442695, %v847_v34  ;;  %5012 = vmatprep.subr.bf16.mxu0 %v539_v36  ;;  %v527_v40 = vsel %vm508_vm13, %v6144_v35, 0.0 }
 0x579   :  { %v6150_v41 = vpop.eup %5570  ;;  %528 = vadd.xlane.f32.xlu1 %v527_v40  ;;  %5013 = vmatpush3.bf16.msra.mxu0 %v539_v36  ;;  %v521_v47 = vsel %vm501_vm12, %v6146_v39, 0.0 }
 0x57a   :  { %5578 = vpow2.f32 %v852_v31  ;;  %v695_v44 = vsel %vm508_vm13, %v6150_v41, 0.0  ;;  %v6154_v45 = vpop.eup %5572 }
 0x57b   :  { %696 = vadd.xlane.f32.xlu0 %v695_v44  ;;  %v6158_v48 = vpop.eup %5574  ;;  %5580 = vpow2.f32 %v848_v42  ;;  %v689_v50 = vsel %vm501_vm12, %v6154_v45, 0.0 }
 0x57c   :  { %v5577_v51 = vpop.eup %5576  ;;  %v692_v52 = vsel %vm501_vm12, %v6158_v48, 0.0  ;;  %5582 = vpow2.f32 %v850_v49 }
 0x57d   :  { %522 = vadd.xlane.f32.xlu1 %v521_v47  ;;  %v524_v53 = vsel %vm501_vm12, %v5577_v51, 0.0 }
 0x57f   :  { %690 = vadd.xlane.f32.xlu0 %v689_v50 }
 0x581   :  { %693 = vadd.xlane.f32.xlu1 %v692_v52 }
 0x583   :  { %525 = vadd.xlane.f32.xlu0 %v524_v53 }
 0x584   :  { %v6165_v54 = vpop.eup %5578 }
 0x585   :  { %v860_v55 = vsel %vm508_vm13, %v6165_v54, 0.0  ;;  %v6169_v56 = vpop.eup %5580 }
 0x586   :  { %v854_v58 = vsel %vm501_vm12, %v6169_v56, 0.0  ;;  %v6173_v57 = vpop.eup %5582 }
 0x587   :  { %861 = vadd.xlane.f32.xlu0 %v860_v55  ;;  %v857_v59 = vsel %vm501_vm12, %v6173_v57, 0.0 }
 0x58b   :  { %855 = vadd.xlane.f32.xlu0 %v854_v58 }
 0x58f   :  { %858 = vadd.xlane.f32.xlu0 %v857_v59 }
 0x592   :  { %706 = vrot.lane.b32.xlu1 %v6081_v11, %s5830_s24 }
 0x596   :  { %708 = vrot.lane.b32.xlu1 %v6090_v16, %s5830_s24 }
 0x59a   :  { %871 = vrot.lane.b32.xlu1 %v6081_v11, %s7281_s1 }
 0x59e   :  { %873 = vrot.lane.b32.xlu1 %v6090_v16, %s7281_s1 }
 0x5a2   :  { %937 = vrot.lane.b32.xlu1 %v6081_v11, %s7279_s25 }
 0x5a5   :  { %540 = vrot.lane.b32.xlu0 %v6090_v16, %s5829_s2 }
 0x5a6   :  { %933 = vrot.lane.b32.xlu1 %v6081_v11, %s7273_s26 }
 0x5a9   :  { %939 = vrot.lane.b32.xlu0 %v6090_v16, %s7279_s25 }
 0x5ad   :  { %935 = vrot.lane.b32.xlu0 %v6090_v16, %s7273_s26 }
 0x606   :  { %v529_v60 = vpop.xlane.xlu1 %528 }
 0x608   :  { %v697_v61 = vpop.xlane.xlu0 %696 }
 0x60a   :  { %v523_v62 = vpop.xlane.xlu1 %522 }
 0x60b   :  { %5584 = vrcp.f32 %v523_v62 }
 0x60c   :  { %v691_v0 = vpop.xlane.xlu0 %690 }
 0x60e   :  { %v694_v2 = vpop.xlane.xlu1 %693 }
 0x610   :  { %v526_v1 = vpop.xlane.xlu0 %525 }
 0x611   :  { %5586 = vrcp.f32 %v526_v1 }
 0x612   :  { %5588 = vrcp.f32 %v529_v60  ;;  %v707_v6 = vpop.permute.xlu1 %706 }
 0x613   :  { %5590 = vrcp.f32 %v694_v2 }
 0x614   :  { %v862_v3 = vpop.xlane.xlu0 %861  ;;  %5592 = vrcp.f32 %v691_v0 }
 0x615   :  { %v5585_v5 = vpop.eup %5584  ;;  %5594 = vrcp.f32 %v697_v61 }
 0x616   :  { %v533_v10 = vmul.f32 %v5585_v5, %v6146_v39  ;;  %v709_v20 = vpop.permute.xlu1 %708 }
 0x617   :  { %v718_v39 = vand.u32 %v709_v20, %v6197_v21 }
 0x618   :  { %v856_v4 = vpop.xlane.xlu0 %855 }
 0x61a   :  { %v872_v30 = vpop.permute.xlu1 %871 }
 0x61b   :  { %v5587_v8 = vpop.eup %5586 }
 0x61c   :  { %v859_v9 = vpop.xlane.xlu0 %858  ;;  %v534_v12 = vmul.f32 %v5587_v8, %v5577_v51  ;;  %v5589_v15 = vpop.eup %5588 }
 0x61d   :  { %5596 = vrcp.f32 %v859_v9  ;;  %v5591_v18 = vpop.eup %5590  ;;  %v535_v27 = vmul.f32 %v5589_v15, %v6144_v35 }
 0x61e   :  { %v536_v17 = vpack.c.bf16 %v534_v12, %v533_v10  ;;  %5598 = vrcp.f32 %v856_v4  ;;  %v5593_v24 = vpop.eup %5592  ;;  %v702_v28 = vmul.f32 %v5591_v18, %v6158_v48  ;;  %v874_v42 = vpop.permute.xlu1 %873 }
 0x61f   :  { %5600 = vrcp.f32 %v862_v3  ;;  %v701_v29 = vmul.f32 %v5593_v24, %v6154_v45  ;;  %v537_v32 = vpack.c.bf16 %v535_v27, %v535_v27  ;;  %v5595_v33 = vpop.eup %5594  ;;  %v883_v48 = vand.u32 %v874_v42, %v6197_v21 }
 0x620   :  { %5016 = vmatprep.mubr.msk.bf16.mxu0 %vm501_vm12, %v536_v17  ;;  %v541_v22 = vpop.permute.xlu0 %540  ;;  %v703_v31 = vmul.f32 %v5595_v33, %v6150_v41  ;;  %v1151_v42 = vshll.u32 %v6093_v19, 16 }
 0x621   :  { %v553_v26 = vand.u32 %v6197_v21, %v541_v22  ;;  %v704_v34 = vpack.c.bf16 %v702_v28, %v701_v29 }
 0x622   :  { %v705_v44 = vpack.c.bf16 %v703_v31, %v703_v31  ;;  %v938_v49 = vpop.permute.xlu1 %937  ;;  %v1159_v31 = vshll.u32 %v6131_v46, 16 }
 0x623   :  { %5014 = vmatprep.subr.bf16.mxu0 %v553_v26  ;;  %v948_v52 = vsel %vm440_vm11, %v938_v49, 0 }
 0x624   :  { %5015 = vmatpush3.bf16.msra.mxu0 %v553_v26  ;;  %v940_v53 = vpop.permute.xlu0 %939 }
 0x625   :  { %5028 = vmatprep.subr.bf16.mxu0 %v707_v6  ;;  %v951_v55 = vsel %vm440_vm11, %v940_v53, 0 }
 0x626   :  { %v934_v51 = vpop.permute.xlu1 %933 }
 0x627   :  { %v5597_v36 = vpop.eup %5596  ;;  %5017 = vmatmul.mubr.msk.bf16.vlgmr.msra.gmra.mrb[12].mxu0 %vm501_vm12, %v537_v32 }
 0x628   :  { %5029 = vmatpush3.bf16.msra.mxu0 %v707_v6  ;;  %5032 = vmatprep.mubr.msk.bf16.mxu0 %vm501_vm12, %v704_v34  ;;  %v5599_v35 = vpop.eup %5598  ;;  %v867_v40 = vmul.f32 %v5597_v36, %v6173_v57 }
 0x629   :  { %5030 = vmatprep.subr.bf16.mxu0 %v718_v39  ;;  %v866_v43 = vmul.f32 %v5599_v35, %v6169_v56  ;;  %v5601_v45 = vpop.eup %5600  ;;  %v936_v56 = vpop.permute.xlu0 %935  ;;  %v1156_v35 = vshrl.u32 %v6131_v46, 16 }
 0x62a   :  { %v868_v41 = vmul.f32 %v5601_v45, %v6165_v54 }
 0x62b   :  { %v869_v47 = vpack.c.bf16 %v867_v40, %v866_v43  ;;  %v1148_v40 = vshrl.u32 %v6093_v19, 16  ;;  %v1158_v43 = vrot.slane %v1156_v35, 2 }
 0x62c   :  { %5031 = vmatpush3.bf16.msra.mxu0 %v718_v39  ;;  %v870_v50 = vpack.c.bf16 %v868_v41, %v868_v41 }
 0x62d   :  { %5044 = vmatprep.subr.bf16.mxu0 %v872_v30  ;;  %v1150_v45 = vrot.slane %v1148_v40, 2 }
 0x62f   :  { %5033 = vmatmul.mubr.msk.bf16.vlgmr.msra.gmra.mrb[16].mxu0 %vm501_vm12, %v705_v44  ;;  %v1161_v44 = vrot.slane %v1159_v31, 3 }
 0x630   :  { %5045 = vmatpush3.bf16.msra.mxu0 %v872_v30  ;;  %5048 = vmatprep.mubr.msk.bf16.mxu0 %vm501_vm12, %v869_v47  ;;  %v1153_v47 = vrot.slane %v1151_v42, 3 }
 0x631   :  { %5046 = vmatprep.subr.bf16.mxu0 %v883_v48 }
 0x634   :  { %5047 = vmatpush3.bf16.msra.mxu0 %v883_v48  ;;  %v6255_v48 = vor.u32 %v1161_v44, %v1158_v43 }
 0x635   :  { %5418 = vmatprep.subr.msk.bf16.mxu0 %vm440_vm11, %v938_v49  ;;  %v1154_v49 = vor.u32 %v1153_v47, %v1150_v45 }
 0x637   :  { %5049 = vmatmul.mubr.msk.bf16.vlgmr.msra.gmra.mrb[20].mxu0 %vm501_vm12, %v870_v50  ;;  %v6263_v19 = vsel %vm1146_vm15, %v1154_v49, %v6255_v48 }
 0x638   :  { %5056 = vmatprep.mubr.msk.bf16.mxu0 %vm440_vm11, %v934_v51 }
 0x63d   :  { %5053 = vmatpush3.bf16.xpose.msra.mxu0 %v948_v52 }
 0x63e   :  { %5419 = vmatprep.subr.msk.bf16.mxu0 %vm440_vm11, %v940_v53 }
 0x645   :  { %5055 = vmatpush3.bf16.xpose.msra.mxu0 %v951_v55 }
 0x64c   :  { %5057 = vmatmul.mubr.msk.bf16.vlgmr.msra.gmra.mrb[24].mxu0 %vm440_vm11, %v936_v56 }
 0x6fa   :  { %v6221_v54 = vpop.f32.mrb[12].mxu0 }
 0x6fb   :  { %v6223_v58 = vpop.f32.mrb[13].mxu0 }
 0x6fc   :  { %v5019_v57 = vpop.f32.mrb[14].mxu0 }
 0x6fd   :  { %v6225_v59 = vpop.f32.mrb[15].mxu0 }
 0x702   :  { %v6227_v60 = vpop.f32.mrb[16].mxu0 }
 0x703   :  { %v6229_v61 = vpop.f32.mrb[17].mxu0 }
 0x704   :  { %v5035_v62 = vpop.f32.mrb[18].mxu0 }
 0x705   :  { %v6231_v0 = vpop.f32.mrb[19].mxu0 }
 0x706   :  { %v5464_v1 = vpack.i.bf16 %v6231_v0, %v6229_v61 }
 0x70a   :  { %v6235_v2 = vpop.f32.mrb[20].mxu0 }
 0x70b   :  { %v6237_v3 = vpop.f32.mrb[21].mxu0 }
 0x70c   :  { %v5051_v4 = vpop.f32.mrb[22].mxu0 }
 0x70d   :  { %v6239_v5 = vpop.f32.mrb[23].mxu0 }
 0x70e   :  { %v5469_v6 = vpack.i.bf16 %v6239_v5, %v6237_v3 }
 0x71f   :  { %v5058_v8 = vpop.f32.mrb[24].mxu0 }
 0x720   :  { %v987_v9 = vpop.f32.mrb[25].mxu0  ;;  %v1007_v15 = vsel %vm508_vm13, %v5058_v8, -inf }
 0x721   :  { %v5059_v10 = vpop.f32.mrb[26].mxu0  ;;  %v1001_v12 = vsel %vm501_vm12, %v987_v9, -inf }
 0x722   :  { %1002 = vmax.xlane.f32.xlu1 %v1001_v12  ;;  %v990_v13 = vpop.f32.mrb[27].mxu0 }
 0x723   :  { %v1004_v14 = vsel %vm501_vm12, %v990_v13, -inf }
 0x724   :  { %1005 = vmax.xlane.f32.xlu0 %v1004_v14 }
 0x728   :  { %1008 = vmax.xlane.f32.xlu0 %v1007_v15 }
 0x7af   :  { %v1003_v17 = vpop.xlane.xlu1 %1002 }
 0x7b0   :  { %v1010_v22 = vsub.f32 %v987_v9, %v1003_v17 }
 0x7b1   :  { %v1006_v18 = vpop.xlane.xlu0 %1005 }
 0x7b2   :  { %v1011_v20 = vsub.f32 %v990_v13, %v1006_v18  ;;  %v1013_v28 = vmul.f32 1.442695, %v1010_v22 }
 0x7b4   :  { %v1015_v24 = vmul.f32 1.442695, %v1011_v20 }
 0x7b5   :  { %v1009_v26 = vpop.xlane.xlu0 %1008 }
 0x7b6   :  { %5602 = vpow2.f32 %v1015_v24  ;;  %v1012_v27 = vsub.f32 %v5058_v8, %v1009_v26 }
 0x7b8   :  { %v1017_v29 = vmul.f32 1.442695, %v1012_v27 }
 0x7ba   :  { %5604 = vpow2.f32 %v1017_v29 }
 0x7bb   :  { %5606 = vpow2.f32 %v1013_v28 }
 0x7c0   :  { %v5603_v30 = vpop.eup %5602 }
 0x7c1   :  { %v1022_v32 = vsel %vm501_vm12, %v5603_v30, 0.0 }
 0x7c2   :  { %1023 = vadd.xlane.f32.xlu0 %v1022_v32 }
 0x7c4   :  { %v5605_v33 = vpop.eup %5604 }
 0x7c5   :  { %v1025_v34 = vsel %vm508_vm13, %v5605_v33, 0.0  ;;  %v5607_v36 = vpop.eup %5606 }
 0x7c6   :  { %1026 = vadd.xlane.f32.xlu1 %v1025_v34  ;;  %v1019_v39 = vsel %vm501_vm12, %v5607_v36, 0.0 }
 0x7ca   :  { %1020 = vadd.xlane.f32.xlu1 %v1019_v39 }
 0x7d8   :  { %1036 = vrot.lane.b32.xlu0 %v6081_v11, %s7277_s27 }
 0x7db   :  { %1038 = vrot.lane.b32.xlu1 %v6090_v16, %s7277_s27 }
 0x7dc   :  { %1166 = vrot.lane.b32.xlu0 %v6255_v48, %s5825_s0 }
 0x7df   :  { %1164 = vrot.lane.b32.xlu1 %v6263_v19, %s5825_s0 }
 0x84f   :  { %v1024_v46 = vpop.xlane.xlu0 %1023 }
 0x853   :  { %v1027_v41 = vpop.xlane.xlu1 %1026  ;;  %v1037_v11 = vpop.permute.xlu0 %1036 }
 0x854   :  { %5060 = vmatprep.subr.bf16.mxu1 %v1037_v11  ;;  %5608 = vrcp.f32 %v1027_v41 }
 0x855   :  { %5061 = vmatpush3.bf16.msra.mxu1 %v1037_v11  ;;  %5610 = vrcp.f32 %v1024_v46 }
 0x857   :  { %v1021_v16 = vpop.xlane.xlu1 %1020  ;;  %v1167_v12 = vpop.permute.xlu0 %1166 }
 0x858   :  { %5612 = vrcp.f32 %v1021_v16  ;;  %v1178_v13 = vsel %vm440_vm11, %v1167_v12, 0 }
 0x85b   :  { %v1039_v50 = vpop.permute.xlu1 %1038 }
 0x85c   :  { %v1048_v51 = vand.u32 %v1039_v50, %v6197_v21 }
 0x85e   :  { %5062 = vmatprep.subr.bf16.mxu1 %v1048_v51  ;;  %v5609_v52 = vpop.eup %5608 }
 0x85f   :  { %v1165_v53 = vpop.permute.xlu1 %1164  ;;  %5063 = vmatpush3.bf16.msra.mxu1 %v1048_v51  ;;  %v5611_v55 = vpop.eup %5610  ;;  %v1033_v57 = vmul.f32 %v5609_v52, %v5605_v33 }
 0x860   :  { %5420 = vmatprep.subr.msk.bf16.mxu1 %vm440_vm11, %v1165_v53  ;;  %v1032_v4 = vmul.f32 %v5611_v55, %v5603_v30  ;;  %v1175_v10 = vsel %vm440_vm11, %v1165_v53, 0 }
 0x861   :  { %v1035_v9 = vpack.c.bf16 %v1033_v57, %v1033_v57 }
 0x862   :  { %v5613_v56 = vpop.eup %5612 }
 0x863   :  { %v1031_v62 = vmul.f32 %v5613_v56, %v5607_v36 }
 0x865   :  { %v1034_v8 = vpack.c.bf16 %v1032_v4, %v1031_v62 }
 0x867   :  { %5064 = vmatprep.mubr.msk.bf16.mxu1 %vm501_vm12, %v1034_v8 }
 0x868   :  { %5065 = vmatmul.mubr.msk.bf16.vlgmr.msra.gmra.mrb[16].mxu1 %vm501_vm12, %v1035_v9 }
 0x869   :  { %5069 = vmatpush3.bf16.xpose.msra.mxu1 %v1175_v10  ;;  %5072 = vmatprep.mubr.msk.bf16.mxu1 %vm440_vm11, %v6263_v19 }
 0x86a   :  { %5421 = vmatprep.subr.msk.bf16.mxu1 %vm440_vm11, %v1167_v12 }
 0x871   :  { %5071 = vmatpush3.bf16.xpose.msra.mxu1 %v1178_v13 }
 0x878   :  { %5073 = vmatmul.mubr.msk.bf16.vlgmr.msra.gmra.mrb[20].mxu1 %vm440_vm11, %v6255_v48 }
 0x93b   :  { %v6278_v14 = vpop.f32.mrb[16].mxu1 }
 0x93c   :  { %v6280_v15 = vpop.f32.mrb[17].mxu1 }
 0x93d   :  { %v5067_v17 = vpop.f32.mrb[18].mxu1 }
 0x93e   :  { %v6282_v18 = vpop.f32.mrb[19].mxu1 }
 0x93f   :  { %v5474_v20 = vpack.i.bf16 %v6282_v18, %v6280_v15 }
 0x94b   :  { %v5074_v22 = vpop.f32.mrb[20].mxu1 }
 0x94c   :  { %v1214_v24 = vpop.f32.mrb[21].mxu1  ;;  %v1234_v30 = vsel %vm508_vm13, %v5074_v22, -inf }
 0x94d   :  { %v5075_v26 = vpop.f32.mrb[22].mxu1  ;;  %v1228_v27 = vsel %vm501_vm12, %v1214_v24, -inf }
 0x94e   :  { %1229 = vmax.xlane.f32.xlu1 %v1228_v27  ;;  %v1217_v28 = vpop.f32.mrb[23].mxu1 }
 0x94f   :  { %v1231_v29 = vsel %vm501_vm12, %v1217_v28, -inf }
 0x950   :  { %1232 = vmax.xlane.f32.xlu0 %v1231_v29 }
 0x954   :  { %1235 = vmax.xlane.f32.xlu0 %v1234_v30 }
 0x9db   :  { %v1230_v32 = vpop.xlane.xlu1 %1229 }
 0x9dc   :  { %v1237_v36 = vsub.f32 %v1214_v24, %v1230_v32 }
 0x9dd   :  { %v1233_v33 = vpop.xlane.xlu0 %1232 }
 0x9de   :  { %v1238_v34 = vsub.f32 %v1217_v28, %v1233_v33  ;;  %v1240_v40 = vmul.f32 1.442695, %v1237_v36 }
 0x9e0   :  { %v1242_v39 = vmul.f32 1.442695, %v1238_v34 }
 0x9e1   :  { %v1236_v35 = vpop.xlane.xlu0 %1235 }
 0x9e2   :  { %5614 = vpow2.f32 %v1242_v39  ;;  %v1239_v31 = vsub.f32 %v5074_v22, %v1236_v35 }
 0x9e4   :  { %v1244_v42 = vmul.f32 1.442695, %v1239_v31 }
 0x9e6   :  { %5616 = vpow2.f32 %v1244_v42 }
 0x9e7   :  { %5618 = vpow2.f32 %v1240_v40 }
 0x9ec   :  { %v5615_v43 = vpop.eup %5614 }
 0x9ed   :  { %v1249_v44 = vsel %vm501_vm12, %v5615_v43, 0.0 }
 0x9ee   :  { %1250 = vadd.xlane.f32.xlu0 %v1249_v44 }
 0x9f0   :  { %v5617_v45 = vpop.eup %5616 }
 0x9f1   :  { %v1252_v47 = vsel %vm508_vm13, %v5617_v45, 0.0  ;;  %v5619_v49 = vpop.eup %5618 }
 0x9f2   :  { %1253 = vadd.xlane.f32.xlu1 %v1252_v47  ;;  %v1246_v46 = vsel %vm501_vm12, %v5619_v49, 0.0 }
 0x9f6   :  { %1247 = vadd.xlane.f32.xlu1 %v1246_v46 }
 0xa04   :  { %1263 = vrot.lane.b32.xlu0 %v6263_v19, %s5829_s2 }
 0xa07   :  { %1265 = vrot.lane.b32.xlu1 %v6255_v48, %s5829_s2 }
 0xa08   :  { %1331 = vrot.lane.b32.xlu0 %v6255_v48, %s5824_s29 }
 0xa0b   :  { %1329 = vrot.lane.b32.xlu1 %v6263_v19, %s5824_s29 }
 0xa0c   :  { %1327 = vrot.lane.b32.xlu0 %v6255_v48, %s5826_s4 }
 0xa0f   :  { %1325 = vrot.lane.b32.xlu1 %v6263_v19, %s5826_s4 }
 0xa7b   :  { %v1251_v41 = vpop.xlane.xlu0 %1250 }
 0xa7f   :  { %v1254_v11 = vpop.xlane.xlu1 %1253  ;;  %v1264_v16 = vpop.permute.xlu0 %1263 }
 0xa80   :  { %5076 = vmatprep.subr.bf16.mxu0 %v1264_v16  ;;  %5620 = vrcp.f32 %v1254_v11 }
 0xa81   :  { %5077 = vmatpush3.bf16.msra.mxu0 %v1264_v16  ;;  %5622 = vrcp.f32 %v1251_v41 }
 0xa83   :  { %v1248_v50 = vpop.xlane.xlu1 %1247  ;;  %v1332_v17 = vpop.permute.xlu0 %1331 }
 0xa84   :  { %5624 = vrcp.f32 %v1248_v50  ;;  %v1343_v22 = vsel %vm440_vm11, %v1332_v17, 0 }
 0xa87   :  { %v1266_v51 = vpop.permute.xlu1 %1265  ;;  %v1328_v24 = vpop.permute.xlu0 %1327 }
 0xa88   :  { %v1275_v52 = vand.u32 %v1266_v51, %v6197_v21 }
 0xa8a   :  { %5078 = vmatprep.subr.bf16.mxu0 %v1275_v52  ;;  %v5621_v53 = vpop.eup %5620 }
 0xa8b   :  { %v1330_v55 = vpop.permute.xlu1 %1329  ;;  %5079 = vmatpush3.bf16.msra.mxu0 %v1275_v52  ;;  %v5623_v56 = vpop.eup %5622  ;;  %v1260_v62 = vmul.f32 %v5621_v53, %v5617_v45 }
 0xa8c   :  { %5422 = vmatprep.subr.msk.bf16.mxu0 %vm440_vm11, %v1330_v55  ;;  %v1259_v8 = vmul.f32 %v5623_v56, %v5615_v43  ;;  %v1340_v13 = vsel %vm440_vm11, %v1330_v55, 0 }
 0xa8d   :  { %v1262_v10 = vpack.c.bf16 %v1260_v62, %v1260_v62 }
 0xa8e   :  { %v5625_v57 = vpop.eup %5624 }
 0xa8f   :  { %v1258_v4 = vmul.f32 %v5625_v57, %v5619_v49  ;;  %v1326_v12 = vpop.permute.xlu1 %1325 }
 0xa91   :  { %v1261_v9 = vpack.c.bf16 %v1259_v8, %v1258_v4 }
 0xa93   :  { %5080 = vmatprep.mubr.msk.bf16.mxu0 %vm501_vm12, %v1261_v9 }
 0xa94   :  { %5081 = vmatmul.mubr.msk.bf16.vlgmr.msra.gmra.mrb[28].mxu0 %vm501_vm12, %v1262_v10 }
 0xa95   :  { %5085 = vmatpush3.bf16.xpose.msra.mxu0 %v1340_v13  ;;  %5088 = vmatprep.mubr.msk.bf16.mxu0 %vm440_vm11, %v1326_v12 }
 0xa96   :  { %5423 = vmatprep.subr.msk.bf16.mxu0 %vm440_vm11, %v1332_v17 }
 0xa9d   :  { %5087 = vmatpush3.bf16.xpose.msra.mxu0 %v1343_v22 }
 0xaa4   :  { %5089 = vmatmul.mubr.msk.bf16.vlgmr.msra.gmra.mrb[32].mxu0 %vm440_vm11, %v1328_v24 }
 0xb67   :  { %v6313_v26 = vpop.f32.mrb[28].mxu0 }
 0xb68   :  { %v6315_v27 = vpop.f32.mrb[29].mxu0 }
 0xb69   :  { %v5083_v28 = vpop.f32.mrb[30].mxu0 }
 0xb6a   :  { %v6317_v29 = vpop.f32.mrb[31].mxu0 }
 0xb77   :  { %v5090_v30 = vpop.f32.mrb[32].mxu0 }
 0xb78   :  { %v1379_v32 = vpop.f32.mrb[33].mxu0  ;;  %v1399_v35 = vsel %vm508_vm13, %v5090_v30, -inf }
 0xb79   :  { %v5091_v33 = vpop.f32.mrb[34].mxu0  ;;  %v1393_v34 = vsel %vm501_vm12, %v1379_v32, -inf }
 0xb7a   :  { %1394 = vmax.xlane.f32.xlu1 %v1393_v34  ;;  %v1382_v36 = vpop.f32.mrb[35].mxu0 }
 0xb7b   :  { %v1396_v39 = vsel %vm501_vm12, %v1382_v36, -inf }
 0xb7c   :  { %1397 = vmax.xlane.f32.xlu0 %v1396_v39 }
 0xb80   :  { %1400 = vmax.xlane.f32.xlu0 %v1399_v35 }
 0xc07   :  { %v1395_v31 = vpop.xlane.xlu1 %1394 }
 0xc08   :  { %v1402_v43 = vsub.f32 %v1379_v32, %v1395_v31 }
 0xc09   :  { %v1398_v40 = vpop.xlane.xlu0 %1397 }
 0xc0a   :  { %v1403_v42 = vsub.f32 %v1382_v36, %v1398_v40  ;;  %v1405_v49 = vmul.f32 1.442695, %v1402_v43 }
 0xc0c   :  { %v1407_v44 = vmul.f32 1.442695, %v1403_v42 }
 0xc0d   :  { %v1401_v45 = vpop.xlane.xlu0 %1400 }
 0xc0e   :  { %5626 = vpow2.f32 %v1407_v44  ;;  %v1404_v47 = vsub.f32 %v5090_v30, %v1401_v45 }
 0xc10   :  { %v1409_v46 = vmul.f32 1.442695, %v1404_v47 }
 0xc12   :  { %5628 = vpow2.f32 %v1409_v46 }
 0xc13   :  { %5630 = vpow2.f32 %v1405_v49 }
 0xc18   :  { %v5627_v41 = vpop.eup %5626 }
 0xc19   :  { %v1414_v11 = vsel %vm501_vm12, %v5627_v41, 0.0 }
 0xc1a   :  { %1415 = vadd.xlane.f32.xlu0 %v1414_v11 }
 0xc1c   :  { %v5629_v16 = vpop.eup %5628 }
 0xc1d   :  { %v1417_v50 = vsel %vm508_vm13, %v5629_v16, 0.0  ;;  %v5631_v51 = vpop.eup %5630 }
 0xc1e   :  { %1418 = vadd.xlane.f32.xlu1 %v1417_v50  ;;  %v1411_v52 = vsel %vm501_vm12, %v5631_v51, 0.0 }
 0xc22   :  { %1412 = vadd.xlane.f32.xlu1 %v1411_v52 }
 0xc30   :  { %1428 = vrot.lane.b32.xlu0 %v6263_v19, %s5830_s24 }
 0xc33   :  { %1430 = vrot.lane.b32.xlu1 %v6255_v48, %s5830_s24 }
 0xc34   :  { %1496 = vrot.lane.b32.xlu0 %v6255_v48, %s5827_s7 }
 0xc37   :  { %1494 = vrot.lane.b32.xlu1 %v6263_v19, %s5827_s7 }
 0xc38   :  { %1492 = vrot.lane.b32.xlu0 %v6255_v48, %s7287_s22 }
 0xc3b   :  { %1490 = vrot.lane.b32.xlu1 %v6263_v19, %s7287_s22 }
 0xca7   :  { %v1416_v53 = vpop.xlane.xlu0 %1415 }
 0xcab   :  { %v1419_v55 = vpop.xlane.xlu1 %1418  ;;  %v1429_v56 = vpop.permute.xlu0 %1428 }
 0xcac   :  { %5092 = vmatprep.subr.bf16.mxu1 %v1429_v56  ;;  %5632 = vrcp.f32 %v1419_v55 }
 0xcad   :  { %5093 = vmatpush3.bf16.msra.mxu1 %v1429_v56  ;;  %5634 = vrcp.f32 %v1416_v53 }
 0xcaf   :  { %v1413_v57 = vpop.xlane.xlu1 %1412  ;;  %v1497_v33 = vpop.permute.xlu0 %1496 }
 0xcb0   :  { %5636 = vrcp.f32 %v1413_v57  ;;  %v1508_v34 = vsel %vm440_vm11, %v1497_v33, 0 }
 0xcb3   :  { %v1431_v62 = vpop.permute.xlu1 %1430  ;;  %v1493_v36 = vpop.permute.xlu0 %1492 }
 0xcb4   :  { %v1440_v4 = vand.u32 %v1431_v62, %v6197_v21 }
 0xcb6   :  { %5094 = vmatprep.subr.bf16.mxu1 %v1440_v4  ;;  %v5633_v8 = vpop.eup %5632 }
 0xcb7   :  { %v1495_v9 = vpop.permute.xlu1 %1494  ;;  %5095 = vmatpush3.bf16.msra.mxu1 %v1440_v4  ;;  %v5635_v10 = vpop.eup %5634  ;;  %v1425_v13 = vmul.f32 %v5633_v8, %v5629_v16 }
 0xcb8   :  { %5424 = vmatprep.subr.msk.bf16.mxu1 %vm440_vm11, %v1495_v9  ;;  %v1424_v22 = vmul.f32 %v5635_v10, %v5627_v41  ;;  %v1505_v32 = vsel %vm440_vm11, %v1495_v9, 0 }
 0xcb9   :  { %v1427_v28 = vpack.c.bf16 %v1425_v13, %v1425_v13 }
 0xcba   :  { %v5637_v12 = vpop.eup %5636 }
 0xcbb   :  { %v1423_v17 = vmul.f32 %v5637_v12, %v5631_v51  ;;  %v1491_v30 = vpop.permute.xlu1 %1490 }
 0xcbd   :  { %v1426_v24 = vpack.c.bf16 %v1424_v22, %v1423_v17 }
 0xcbf   :  { %5096 = vmatprep.mubr.msk.bf16.mxu1 %vm501_vm12, %v1426_v24 }
 0xcc0   :  { %5097 = vmatmul.mubr.msk.bf16.vlgmr.msra.gmra.mrb[24].mxu1 %vm501_vm12, %v1427_v28 }
 0xcc1   :  { %5101 = vmatpush3.bf16.xpose.msra.mxu1 %v1505_v32  ;;  %5104 = vmatprep.mubr.msk.bf16.mxu1 %vm440_vm11, %v1491_v30 }
 0xcc2   :  { %5425 = vmatprep.subr.msk.bf16.mxu1 %vm440_vm11, %v1497_v33 }
 0xcc9   :  { %5103 = vmatpush3.bf16.xpose.msra.mxu1 %v1508_v34 }
 0xcd0   :  { %5105 = vmatmul.mubr.msk.bf16.vlgmr.msra.gmra.mrb[28].mxu1 %vm440_vm11, %v1493_v36 }
 0xd93   :  { %v6346_v39 = vpop.f32.mrb[24].mxu1 }
 0xd94   :  { %v6348_v35 = vpop.f32.mrb[25].mxu1 }
 0xd95   :  { %v5099_v31 = vpop.f32.mrb[26].mxu1 }
 0xd96   :  { %v6350_v40 = vpop.f32.mrb[27].mxu1 }
 0xd97   :  { %v5479_v42 = vpack.i.bf16 %v6350_v40, %v6348_v35 }
 0xda3   :  { %v5106_v43 = vpop.f32.mrb[28].mxu1 }
 0xda4   :  { %v1544_v44 = vpop.f32.mrb[29].mxu1  ;;  %v1564_v41 = vsel %vm508_vm13, %v5106_v43, -inf }
 0xda5   :  { %v5107_v45 = vpop.f32.mrb[30].mxu1  ;;  %v1558_v47 = vsel %vm501_vm12, %v1544_v44, -inf }
 0xda6   :  { %1559 = vmax.xlane.f32.xlu1 %v1558_v47  ;;  %v1547_v49 = vpop.f32.mrb[31].mxu1 }
 0xda7   :  { %v1561_v46 = vsel %vm501_vm12, %v1547_v49, -inf }
 0xda8   :  { %1562 = vmax.xlane.f32.xlu0 %v1561_v46 }
 0xdac   :  { %1565 = vmax.xlane.f32.xlu0 %v1564_v41 }
 0xe33   :  { %v1560_v11 = vpop.xlane.xlu1 %1559 }
 0xe34   :  { %v1567_v51 = vsub.f32 %v1544_v44, %v1560_v11 }
 0xe35   :  { %v1563_v16 = vpop.xlane.xlu0 %1562 }
 0xe36   :  { %v1568_v50 = vsub.f32 %v1547_v49, %v1563_v16  ;;  %v1570_v56 = vmul.f32 1.442695, %v1567_v51 }
 0xe38   :  { %v1572_v52 = vmul.f32 1.442695, %v1568_v50 }
 0xe39   :  { %v1566_v53 = vpop.xlane.xlu0 %1565 }
 0xe3a   :  { %5638 = vpow2.f32 %v1572_v52  ;;  %v1569_v55 = vsub.f32 %v5106_v43, %v1566_v53 }
 0xe3c   :  { %v1574_v57 = vmul.f32 1.442695, %v1569_v55 }
 0xe3e   :  { %5640 = vpow2.f32 %v1574_v57 }
 0xe3f   :  { %5642 = vpow2.f32 %v1570_v56 }
 0xe44   :  { %v5639_v62 = vpop.eup %5638 }
 0xe45   :  { %v1579_v4 = vsel %vm501_vm12, %v5639_v62, 0.0 }
 0xe46   :  { %1580 = vadd.xlane.f32.xlu0 %v1579_v4 }
 0xe48   :  { %v5641_v8 = vpop.eup %5640 }
 0xe49   :  { %v1582_v9 = vsel %vm508_vm13, %v5641_v8, 0.0  ;;  %v5643_v10 = vpop.eup %5642 }
 0xe4a   :  { %1583 = vadd.xlane.f32.xlu1 %v1582_v9  ;;  %v1576_v12 = vsel %vm501_vm12, %v5643_v10, 0.0 }
 0xe4e   :  { %1577 = vadd.xlane.f32.xlu1 %v1576_v12 }
 0xe5c   :  { %1593 = vrot.lane.b32.xlu0 %v6263_v19, %s7281_s1 }
 0xe5f   :  { %1595 = vrot.lane.b32.xlu1 %v6255_v48, %s7281_s1 }
 0xe60   :  { %1661 = vrot.lane.b32.xlu0 %v6255_v48, %s7279_s25 }
 0xe63   :  { %1659 = vrot.lane.b32.xlu1 %v6263_v19, %s7279_s25  ;;  %s7302_s25 = smov 48  }
 0xe64   :  { %1657 = vrot.lane.b32.xlu0 %v6255_v48, %s7273_s26 }
 0xe67   :  { %1655 = vrot.lane.b32.xlu1 %v6263_v19, %s7273_s26  ;;  %s7283_s26 = smov 24  }
 0xed3   :  { %v1581_v13 = vpop.xlane.xlu0 %1580 }
 0xed7   :  { %v1584_v17 = vpop.xlane.xlu1 %1583  ;;  %v1594_v22 = vpop.permute.xlu0 %1593 }
 0xed8   :  { %5108 = vmatprep.subr.bf16.mxu0 %v1594_v22  ;;  %5644 = vrcp.f32 %v1584_v17 }
 0xed9   :  { %5109 = vmatpush3.bf16.msra.mxu0 %v1594_v22  ;;  %5646 = vrcp.f32 %v1581_v13 }
 0xedb   :  { %v1578_v24 = vpop.xlane.xlu1 %1577  ;;  %v1662_v41 = vpop.permute.xlu0 %1661 }
 0xedc   :  { %5648 = vrcp.f32 %v1578_v24  ;;  %v1673_v11 = vsel %vm440_vm11, %v1662_v41, 0 }
 0xedf   :  { %v1596_v28 = vpop.permute.xlu1 %1595  ;;  %v1658_v16 = vpop.permute.xlu0 %1657 }
 0xee0   :  { %v1605_v30 = vand.u32 %v1596_v28, %v6197_v21 }
 0xee2   :  { %5110 = vmatprep.subr.bf16.mxu0 %v1605_v30  ;;  %v5645_v32 = vpop.eup %5644 }
 0xee3   :  { %v1660_v33 = vpop.permute.xlu1 %1659  ;;  %5111 = vmatpush3.bf16.msra.mxu0 %v1605_v30  ;;  %v5647_v34 = vpop.eup %5646  ;;  %v1590_v31 = vmul.f32 %v5645_v32, %v5641_v8 }
 0xee4   :  { %5426 = vmatprep.subr.msk.bf16.mxu0 %vm440_vm11, %v1660_v33  ;;  %v1589_v44 = vmul.f32 %v5647_v34, %v5639_v62  ;;  %v1670_v46 = vsel %vm440_vm11, %v1660_v33, 0 }
 0xee5   :  { %v1592_v47 = vpack.c.bf16 %v1590_v31, %v1590_v31 }
 0xee6   :  { %v5649_v36 = vpop.eup %5648 }
 0xee7   :  { %v1588_v43 = vmul.f32 %v5649_v36, %v5643_v10  ;;  %v1656_v49 = vpop.permute.xlu1 %1655 }
 0xee9   :  { %v1591_v45 = vpack.c.bf16 %v1589_v44, %v1588_v43 }
 0xeeb   :  { %5112 = vmatprep.mubr.msk.bf16.mxu0 %vm501_vm12, %v1591_v45 }
 0xeec   :  { %5113 = vmatmul.mubr.msk.bf16.vlgmr.msra.gmra.mrb[36].mxu0 %vm501_vm12, %v1592_v47 }
 0xeed   :  { %5117 = vmatpush3.bf16.xpose.msra.mxu0 %v1670_v46  ;;  %5120 = vmatprep.mubr.msk.bf16.mxu0 %vm440_vm11, %v1656_v49 }
 0xeee   :  { %5427 = vmatprep.subr.msk.bf16.mxu0 %vm440_vm11, %v1662_v41 }
 0xef5   :  { %5119 = vmatpush3.bf16.xpose.msra.mxu0 %v1673_v11 }
 0xef6   :  { %5148 = vmatprep.subr.bf16.mxu0 %v5822_v7 }
 0xefc   :  { %5121 = vmatmul.mubr.msk.bf16.vlgmr.msra.gmra.mrb[40].mxu0 %vm440_vm11, %v1658_v16 }
 0xefd   :  { %5152 = vmatprep.mubr.msk.bf16.mxu0 %vm5823_vm10, %v5822_v7 }
 0xfbf   :  { %v6384_v50 = vpop.f32.mrb[36].mxu0 }
 0xfc0   :  { %v1641_v51 = vpop.f32.mrb[37].mxu0 }
 0xfc1   :  { %v5115_v52 = vpop.f32.mrb[38].mxu0 }
 0xfc2   :  { %v1644_v53 = vpop.f32.mrb[39].mxu0 }
 0xfc3   :  { %v5484_v55 = vpack.i.bf16 %v1644_v53, %v1641_v51 }
 0xfcf   :  { %v5122_v56 = vpop.f32.mrb[40].mxu0 }
 0xfd0   :  { %v1709_v57 = vpop.f32.mrb[41].mxu0  ;;  %v1729_v10 = vsel %vm508_vm13, %v5122_v56, -inf }
 0xfd1   :  { %v5123_v62 = vpop.f32.mrb[42].mxu0  ;;  %v1723_v4 = vsel %vm501_vm12, %v1709_v57, -inf }
 0xfd2   :  { %1724 = vmax.xlane.f32.xlu1 %v1723_v4  ;;  %v1712_v8 = vpop.f32.mrb[43].mxu0  ;;  %v5527_v62 = vld [vmem:[%s7255_s9 + $0x8] sm:$0xff]  }
 0xfd3   :  { %v1726_v9 = vsel %vm501_vm12, %v1712_v8, -inf }
 0xfd4   :  { %1727 = vmax.xlane.f32.xlu0 %v1726_v9 }
 0xfd8   :  { %1730 = vmax.xlane.f32.xlu0 %v1729_v10 }
0x105f   :  { %v1725_v12 = vpop.xlane.xlu1 %1724 }
0x1060   :  { %v1732_v22 = vsub.f32 %v1709_v57, %v1725_v12 }
0x1061   :  { %v1728_v13 = vpop.xlane.xlu0 %1727 }
0x1062   :  { %v1733_v17 = vsub.f32 %v1712_v8, %v1728_v13  ;;  %v1735_v32 = vmul.f32 1.442695, %v1732_v22 }
0x1064   :  { %v1737_v24 = vmul.f32 1.442695, %v1733_v17 }
0x1065   :  { %v1731_v28 = vpop.xlane.xlu0 %1730 }
0x1066   :  { %5650 = vpow2.f32 %v1737_v24  ;;  %v1734_v30 = vsub.f32 %v5122_v56, %v1731_v28 }
0x1068   :  { %v1739_v33 = vmul.f32 1.442695, %v1734_v30  ;;  %v6451_v30 = vld [vmem:[%s7256_s10] ss:$0 sm:$0xff] }
0x106a   :  { %5652 = vpow2.f32 %v1739_v33 }
0x106b   :  { %5654 = vpow2.f32 %v1735_v32 }
0x1070   :  { %v5651_v34 = vpop.eup %5650 }
0x1071   :  { %v1744_v36 = vsel %vm501_vm12, %v5651_v34, 0.0 }
0x1072   :  { %1745 = vadd.xlane.f32.xlu0 %v1744_v36 }
0x1074   :  { %v5653_v31 = vpop.eup %5652 }
0x1075   :  { %v1747_v43 = vsel %vm508_vm13, %v5653_v31, 0.0  ;;  %v5655_v44 = vpop.eup %5654 }
0x1076   :  { %1748 = vadd.xlane.f32.xlu1 %v1747_v43  ;;  %v1741_v45 = vsel %vm501_vm12, %v5655_v44, 0.0 }
0x107a   :  { %1742 = vadd.xlane.f32.xlu1 %v1741_v45 }
0x1088   :  { %1758 = vrot.lane.b32.xlu0 %v6263_v19, %s7277_s27 }
0x108b   :  { %1760 = vrot.lane.b32.xlu1 %v6255_v48, %s7277_s27  ;;  %s7304_s27 = smov 104  }
0x108c   :  { %5470 = vrot.lane.b32.xlu0 %v5469_v6, %s7285_s3 }
0x108f   :  { %5465 = vrot.lane.b32.xlu1 %v5464_v1, %s7275_s28 }
0x1090   :  { %5480 = vrot.lane.b32.xlu0 %v5479_v42, %s7275_s28 }
0x1093   :  { %5475 = vrot.lane.b32.xlu1 %v5474_v20, %s7283_s26 }
0x1094   :  { %1105 = vrot.lane.b32.xlu0 %v6227_v60, %s7275_s28 }
0x1097   :  { %5485 = vrot.lane.b32.xlu1 %v5484_v55, %s7285_s3 }
0x1098   :  { %1117 = vrot.lane.b32.xlu0 %v6235_v2, %s7285_s3 }
0x109c   :  { %1827 = vrot.lane.b32.xlu0 %v6346_v39, %s7275_s28 }
0x10ff   :  { %v1746_v61 = vpop.xlane.xlu0 %1745 }
0x1103   :  { %v1749_v0 = vpop.xlane.xlu1 %1748  ;;  %v1759_v1 = vpop.permute.xlu0 %1758 }
0x1104   :  { %5124 = vmatprep.subr.bf16.mxu1 %v1759_v1  ;;  %5656 = vrcp.f32 %v1749_v0 }
0x1105   :  { %5125 = vmatpush3.bf16.msra.mxu1 %v1759_v1  ;;  %5658 = vrcp.f32 %v1746_v61 }
0x1107   :  { %v1743_v3 = vpop.xlane.xlu1 %1742  ;;  %v5471_v19 = vpop.permute.xlu0 %5470 }
0x1108   :  { %5660 = vrcp.f32 %v1743_v3  ;;  %v5473_v42 = vunpack.i.h.bf16 %v5471_v19  ;;  %v5472_v47 = vunpack.i.l.bf16 %v5471_v19 }
0x110b   :  { %v1761_v5 = vpop.permute.xlu1 %1760  ;;  %v5481_v36 = vpop.permute.xlu0 %5480 }
0x110c   :  { %v1770_v60 = vand.u32 %v1761_v5, %v6197_v21  ;;  %v5482_v45 = vunpack.i.l.bf16 %v5481_v36 }
0x110e   :  { %5126 = vmatprep.subr.bf16.mxu1 %v1770_v60  ;;  %v5657_v6 = vpop.eup %5656  ;;  %v1856_v1 = vsel %vm440_vm11, %v6315_v27, %v5482_v45 }
0x110f   :  { %v5466_v48 = vpop.permute.xlu1 %5465  ;;  %5127 = vmatpush3.bf16.msra.mxu1 %v1770_v60  ;;  %v5659_v2 = vpop.eup %5658  ;;  %v1755_v40 = vmul.f32 %v5657_v6, %v5653_v31 }
0x1110   :  { %v5468_v15 = vunpack.i.h.bf16 %v5466_v48  ;;  %v5467_v18 = vunpack.i.l.bf16 %v5466_v48  ;;  %5132 = vmatprep.subr.bf16.mxu1 %v5822_v7  ;;  %v1754_v41 = vmul.f32 %v5659_v2, %v5651_v34  ;;  %v1106_v31 = vpop.permute.xlu0 %1105 }
0x1111   :  { %v1757_v56 = vpack.c.bf16 %v1755_v40, %v1755_v40  ;;  %v1136_v2 = vsel %vm440_vm11, %v6221_v54, %v1106_v31 }
0x1112   :  { %v5661_v20 = vpop.eup %5660  ;;  %v1135_v39 = vsel %vm440_vm11, %v6225_v59, %v5468_v15  ;;  %v1134_v35 = vsel %vm440_vm11, %v6223_v58, %v5467_v18  ;;  %v5526_v59 = vld [vmem:[%s7255_s9] sm:$0xff]  }
0x1113   :  { %v5476_v49 = vpop.permute.xlu1 %5475  ;;  %v1753_v46 = vmul.f32 %v5661_v20, %v5655_v44  ;;  %v1137_v51 = vsel %vm101_vm0, %v1134_v35, %v5472_v47  ;;  %v1138_v52 = vsel %vm101_vm0, %v1135_v39, %v5473_v42  ;;  %v5483_v44 = vunpack.i.h.bf16 %v5481_v36 }
0x1114   :  { %v5478_v11 = vunpack.i.h.bf16 %v5476_v49  ;;  %v5477_v16 = vunpack.i.l.bf16 %v5476_v49  ;;  %v1118_v3 = vpop.permute.xlu0 %1117 }
0x1115   :  { %v1756_v53 = vpack.c.bf16 %v1754_v41, %v1753_v46  ;;  %v1139_v18 = vsel %vm101_vm0, %v1136_v2, %v1118_v3  ;;  %v5820_v3 = vld [vmem:[%s7299_s30 + $0x80] ss:$0 sm:$0xff] }
0x1116   :  { %v1141_v58 = vsel %vm1140_vm1, %v1137_v51, %v5477_v16  ;;  %v1142_v55 = vsel %vm1140_vm1, %v1138_v52, %v5478_v11 }
0x1117   :  { %v1878_v57 = vpack.c.bf16 %v1142_v55, %v1141_v58  ;;  %5128 = vmatprep.mubr.msk.bf16.mxu1 %vm501_vm12, %v1756_v53  ;;  %v5486_v43 = vpop.permute.xlu1 %5485 }
0x1118   :  { %5129 = vmatmul.mubr.msk.bf16.vlgmr.msra.gmra.mrb[32].mxu1 %vm501_vm12, %v1757_v56  ;;  %v5488_v61 = vunpack.i.h.bf16 %v5486_v43  ;;  %v5487_v0 = vunpack.i.l.bf16 %v5486_v43  ;;  %v1828_v54 = vpop.permute.xlu0 %1827 }
0x1119   :  { %5133 = vmatpush3.bf16.msra.mxu1 %v5526_v59  ;;  %5136 = vmatprep.mubr.msk.bf16.mxu1 %vm5823_vm10, %v5822_v7  ;;  %v1858_v41 = vsel %vm440_vm11, %v6313_v26, %v1828_v54 }
0x111a   :  { %5134 = vmatprep.subr.bf16.mxu1 %v5822_v7  ;;  %v1859_v6 = vsel %vm101_vm0, %v1856_v1, %v5487_v0 }
0x111d   :  { %5135 = vmatpush3.bf16.msra.mxu1 %v5527_v62 }
0x111e   :  { %5164 = vmatprep.subr.bf16.mxu1 %v5822_v7 }
0x1120   :  { %5137 = vmatmul.mubr.msk.bf16.vlgmr.msra.gmra.mrb[36].mxu1 %vm235_vm5, %v1878_v57 }
0x1121   :  { %5140 = vmatprep.mubr.msk.bf16.mxu1 %vm5823_vm10, %v5822_v7 }
0x11eb   :  { %v5130_v4 = vpop.f32.mrb[32].mxu1 }
0x11ec   :  { %v1806_v8 = vpop.f32.mrb[33].mxu1 }
0x11ed   :  { %v5131_v9 = vpop.f32.mrb[34].mxu1 }
0x11ee   :  { %v1809_v10 = vpop.f32.mrb[35].mxu1 }
0x11ef   :  { %v5489_v12 = vpack.i.bf16 %v1809_v10, %v1806_v8 }
0x11f1   :  { %5490 = vrot.lane.b32.xlu1 %v5489_v12, %s7283_s26 }
0x11f3   :  { %v1940_v13 = vpop.f32.mrb[36].mxu1 }
0x11f4   :  { %v5138_v17 = vpop.f32.mrb[37].mxu1  ;;  %v1963_v34 = vadd.f32 %v1940_v13, %v5988_v25 }
0x11f5   :  { %1129 = vrot.lane.b32.xlu1 %v6278_v14, %s7283_s26  ;;  %v1943_v22 = vpop.f32.mrb[38].mxu1 }
0x11f6   :  { %v1964_v24 = vadd.f32 %v1943_v22, %v5986_v23  ;;  %v5139_v28 = vpop.f32.mrb[39].mxu1  ;;  %v6462_v23 = vadd.f32 %v6451_v30, %v1963_v34  ;;  %v5529_v34 = vld [vmem:[%s7257_s13 + $0x8] sm:$0xff]  }
0x11f8   :  { %v6454_v32 = vadd.f32 %v6451_v30, %v1964_v24  ;;  %v1984_v14 = vsel %vm235_vm5, %v6462_v23, 0.0 }
0x11fa   :  { %v1987_v33 = vsel %vm235_vm5, %v6454_v32, 0.0 }
0x11fb   :  { %1988 = vadd.xlane.f32.xlu0 %v1987_v33 }
0x1211   :  { %1839 = vrot.lane.b32.xlu0 %v6384_v50, %s7285_s3  ;;  %v1857_v50 = vsel %vm440_vm11, %v6317_v29, %v5483_v44  ;;  %s7305_s3 = smov 40  }
0x1212   :  { %v1860_v48 = vsel %vm101_vm0, %v1857_v50, %v5488_v61 }
0x1219   :  { %1985 = vadd.xlane.f32.xlu1 %v1984_v14 }
0x122a   :  { %1851 = vrot.lane.b32.xlu1 %v5130_v4, %s7283_s26  ;;  %s7303_s26 = smov 72  }
0x1263   :  { %v5491_v25 = vpop.permute.xlu1 %5490 }
0x1264   :  { %v5493_v5 = vunpack.i.h.bf16 %v5491_v25  ;;  %v5492_v60 = vunpack.i.l.bf16 %v5491_v25 }
0x1266   :  { %v1862_v19 = vsel %vm1140_vm1, %v1859_v6, %v5492_v60  ;;  %v1863_v15 = vsel %vm1140_vm1, %v1860_v48, %v5493_v5 }
0x1267   :  { %v1868_v29 = vrot.slane %v1862_v19, 3  ;;  %v1869_v20 = vrot.slane %v1863_v15, 3  ;;  %v1130_v39 = vpop.permute.xlu1 %1129 }
0x1268   :  { %v1143_v27 = vsel %vm1140_vm1, %v1139_v18, %v1130_v39 }
0x1269   :  { %v1870_v35 = vsel %vm218_vm7, %v1868_v29, %v1869_v20  ;;  %v1877_v40 = vsel %vm218_vm7, %v1143_v27, %v1868_v29 }
0x126a   :  { %v1879_v42 = vpack.c.bf16 %v1870_v35, %v1877_v40 }
0x126c   :  { %5141 = vmatmul.mubr.msk.bf16.gmra.mrb[40].mxu1 %vm235_vm5, %v1879_v42 }
0x126d   :  { %5144 = vmatprep.mubr.msk.bf16.mxu1 %vm5823_vm10, %v5822_v7 }
0x1288   :  { %v1989_v47 = vpop.xlane.xlu0 %1988 }
0x1289   :  { %v2003_v58 = vmul.f32 0.03125, %v1989_v47 }
0x128b   :  { %v2009_v57 = vsub.f32 %v6454_v32, %v2003_v58  ;;  %v5532_v58 = vld [vmem:[%s7260_s15 + $0x10] sm:$0xff]  }
0x128c   :  { %v1840_v46 = vpop.permute.xlu0 %1839 }
0x128d   :  { %v1861_v11 = vsel %vm101_vm0, %v1858_v41, %v1840_v46  ;;  %v2015_v22 = vmul.f32 %v2009_v57, %v2009_v57  ;;  %v6551_v41 = vld [vmem:[%s7259_s12] ss:$0 sm:$0xff] }
0x128f   :  { %v2023_v28 = vsel %vm235_vm5, %v2015_v22, 0.0 }
0x12a6   :  { %v1986_v49 = vpop.xlane.xlu1 %1985 }
0x12a7   :  { %v2002_v55 = vmul.f32 0.03125, %v1986_v49 }
0x12a9   :  { %v2008_v8 = vsub.f32 %v6462_v23, %v2002_v55  ;;  %v5533_v55 = vld [vmem:[%s7260_s15 + $0x18] sm:$0xff]  }
0x12aa   :  { %v1852_v16 = vpop.permute.xlu1 %1851 }
0x12ab   :  { %v1864_v51 = vsel %vm1140_vm1, %v1861_v11, %v1852_v16  ;;  %v2014_v24 = vmul.f32 %v2008_v8, %v2008_v8 }
0x12ac   :  { %v1871_v52 = vrot.slane %v1864_v51, 3 }
0x12ad   :  { %v2020_v33 = vsel %vm235_vm5, %v2014_v24, 0.0 }
0x12ae   :  { %v1872_v53 = vsel %vm218_vm7, %v1869_v20, %v1871_v52 }
0x12af   :  { %v1880_v59 = vpack.c.bf16 %v1871_v52, %v1872_v53  ;;  %v5530_v53 = vld [vmem:[%s7260_s15] sm:$0xff]  }
0x12b0   :  { %5165 = vmatpush3.bf16.msra.mxu1 %v5530_v53 }
0x12b1   :  { %5145 = vmatmul.mubr.msk.bf16.gmra.mrb[44].mxu1 %vm235_vm5, %v1880_v59  ;;  %5166 = vmatprep.subr.bf16.mxu1 %v5822_v7  ;;  %v5531_v59 = vld [vmem:[%s7260_s15 + $0x8] sm:$0xff]  }
0x12b2   :  { %5180 = vmatprep.mubr.msk.bf16.mxu1 %vm5823_vm10, %v5822_v7 }
0x12b4   :  { %5167 = vmatpush3.bf16.msra.mxu1 %v5531_v59 }
0x12b5   :  { %5168 = vmatprep.subr.bf16.mxu1 %v5822_v7 }
0x12b8   :  { %5169 = vmatpush3.bf16.msra.mxu1 %v5532_v58 }
0x12b9   :  { %5170 = vmatprep.subr.bf16.mxu1 %v5822_v7 }
0x12bc   :  { %5171 = vmatpush3.bf16.msra.mxu1 %v5533_v55 }
0x12bd   :  { %5172 = vmatprep.subr.bf16.mxu1 %v5822_v7 }
0x133f   :  { %v1948_v56 = vpop.f32.mrb[40].mxu1 }
0x1340   :  { %v1965_v26 = vadd.f32 %v1948_v56, %v6005_v38  ;;  %v5142_v62 = vpop.f32.mrb[41].mxu1  ;;  %v5534_v56 = vld [vmem:[%s7260_s15 + $0x20] sm:$0xff]  }
0x1341   :  { %v1951_v4 = vpop.f32.mrb[42].mxu1  ;;  %5173 = vmatpush3.bf16.msra.mxu1 %v5534_v56  ;;  %v5537_v62 = vld [vmem:[%s7260_s15 + $0x38] sm:$0xff]  }
0x1342   :  { %v6496_v9 = vadd.f32 %v6451_v30, %v1965_v26  ;;  %v1966_v10 = vadd.f32 %v1951_v4, %v6002_v37  ;;  %v5143_v12 = vpop.f32.mrb[43].mxu1  ;;  %v5528_v37 = vld [vmem:[%s7257_s13] sm:$0xff]   ;;  %5174 = vmatprep.subr.bf16.mxu1 %v5822_v7  ;;  %v5536_v26 = vld [vmem:[%s7260_s15 + $0x30] sm:$0xff]  }
0x1343   :  { %5149 = vmatpush3.bf16.msra.mxu0 %v5528_v37 }
0x1344   :  { %v6500_v13 = vadd.f32 %v6451_v30, %v1966_v10  ;;  %v1990_v17 = vsel %vm235_vm5, %v6496_v9, 0.0  ;;  %5150 = vmatprep.subr.bf16.mxu0 %v5822_v7 }
0x1345   :  { %1991 = vadd.xlane.f32.xlu1 %v1990_v17 }
0x1346   :  { %v1993_v38 = vsel %vm235_vm5, %v6500_v13, 0.0 }
0x1347   :  { %1994 = vadd.xlane.f32.xlu0 %v1993_v38  ;;  %5151 = vmatpush3.bf16.msra.mxu0 %v5529_v34 }
0x1348   :  { %5192 = vmatprep.subr.bf16.mxu0 %v5822_v7 }
0x1349   :  { %2024 = vadd.xlane.f32.xlu1 %v2023_v28 }
0x134b   :  { %2021 = vadd.xlane.f32.xlu0 %v2020_v33 }
0x1384   :  { %v1956_v14 = vpop.f32.mrb[44].mxu1 }
0x1385   :  { %v5146_v36 = vpop.f32.mrb[45].mxu1  ;;  %v1967_v61 = vadd.f32 %v1956_v14, %v6037_v63 }
0x1386   :  { %v1959_v31 = vpop.f32.mrb[46].mxu1 }
0x1387   :  { %v5147_v43 = vpop.f32.mrb[47].mxu1  ;;  %v1968_v5 = vadd.f32 %v5820_v3, %v1959_v31  ;;  %v6529_v63 = vadd.f32 %v6451_v30, %v1967_v61 }
0x1389   :  { %v6535_v20 = vadd.f32 %v6451_v30, %v1968_v5  ;;  %v1996_v35 = vsel %vm235_vm5, %v6529_v63, 0.0  ;;  %v6545_v30 = vld [vmem:[%s7258_s11] ss:$0 sm:$0xff] }
0x138b   :  { %v1999_v40 = vsel %vm251_vm9, %v6535_v20, 0.0 }
0x13d2   :  { %v1992_v44 = vpop.xlane.xlu1 %1991 }
0x13d3   :  { %v2004_v45 = vmul.f32 0.03125, %v1992_v44 }
0x13d4   :  { %v1995_v0 = vpop.xlane.xlu0 %1994 }
0x13d5   :  { %v6518_v25 = vsub.f32 %v6496_v9, %v2004_v45  ;;  %v2005_v50 = vmul.f32 0.03125, %v1995_v0 }
0x13d6   :  { %v2025_v1 = vpop.xlane.xlu1 %2024 }
0x13d7   :  { %v6524_v60 = vsub.f32 %v6500_v13, %v2005_v50  ;;  %v2039_v6 = vmul.f32 0.03125, %v2025_v1  ;;  %v2016_v48 = vmul.f32 %v6518_v25, %v6518_v25 }
0x13d8   :  { %v2022_v2 = vpop.xlane.xlu0 %2021 }
0x13d9   :  { %v2045_v19 = vadd.f32 1e-05, %v2039_v6  ;;  %v2038_v15 = vmul.f32 0.03125, %v2022_v2  ;;  %v2026_v18 = vsel %vm235_vm5, %v2016_v48, 0.0  ;;  %v2017_v29 = vmul.f32 %v6524_v60, %v6524_v60 }
0x13da   :  { %2027 = vadd.xlane.f32.xlu0 %v2026_v18 }
0x13db   :  { %5662 = vrsqrt.f32 %v2045_v19  ;;  %v2044_v39 = vadd.f32 1e-05, %v2038_v15  ;;  %v2029_v27 = vsel %vm235_vm5, %v2017_v29, 0.0 }
0x13dc   :  { %2030 = vadd.xlane.f32.xlu1 %v2029_v27 }
0x13dd   :  { %5664 = vrsqrt.f32 %v2044_v39 }
0x13de   :  { %1997 = vadd.xlane.f32.xlu0 %v1996_v35 }
0x13e0   :  { %2000 = vadd.xlane.f32.xlu1 %v1999_v40 }
0x13e5   :  { %v5663_v42 = vpop.eup %5662 }
0x13e6   :  { %v2057_v54 = vmul.f32 %v5663_v42, %v2009_v57  ;;  %v5535_v57 = vld [vmem:[%s7260_s15 + $0x28] sm:$0xff]  }
0x13e7   :  { %v5665_v47 = vpop.eup %5664  ;;  %5175 = vmatpush3.bf16.msra.mxu1 %v5535_v57 }
0x13e8   :  { %v2069_v49 = vmul.f32 %v6545_v30, %v2057_v54  ;;  %v2056_v46 = vmul.f32 %v5665_v47, %v2008_v8  ;;  %5176 = vmatprep.subr.bf16.mxu1 %v5822_v7 }
0x13ea   :  { %v2068_v11 = vmul.f32 %v6545_v30, %v2056_v46  ;;  %v2081_v51 = vadd.f32 %v6551_v41, %v2069_v49 }
0x13eb   :  { %5177 = vmatpush3.bf16.msra.mxu1 %v5536_v26 }
0x13ec   :  { %v2080_v16 = vadd.f32 %v6551_v41, %v2068_v11  ;;  %5178 = vmatprep.subr.bf16.mxu1 %v5822_v7 }
0x13ee   :  { %v2086_v52 = vpack.c.bf16 %v2081_v51, %v2080_v16 }
0x13ef   :  { %5179 = vmatpush3.bf16.msra.mxu1 %v5537_v62 }
0x13f0   :  { %5153 = vmatmul.mubr.msk.bf16.vlgmr.msra.gmra.mrb[44].mxu0 %vm235_vm5, %v2086_v52 }
0x13f1   :  { %5156 = vmatprep.mubr.msk.bf16.mxu0 %vm5823_vm10, %v5822_v7 }
0x1467   :  { %v2028_v4 = vpop.xlane.xlu0 %2027 }
0x1468   :  { %v2040_v8 = vmul.f32 0.03125, %v2028_v4 }
0x1469   :  { %v2031_v10 = vpop.xlane.xlu1 %2030 }
0x146a   :  { %v2046_v12 = vadd.f32 1e-05, %v2040_v8  ;;  %v2041_v17 = vmul.f32 0.03125, %v2031_v10 }
0x146b   :  { %v1998_v22 = vpop.xlane.xlu0 %1997 }
0x146c   :  { %5666 = vrsqrt.f32 %v2046_v12  ;;  %v2047_v38 = vadd.f32 1e-05, %v2041_v17  ;;  %v2006_v24 = vmul.f32 0.03125, %v1998_v22 }
0x146d   :  { %v2001_v28 = vpop.xlane.xlu1 %2000 }
0x146e   :  { %5668 = vrsqrt.f32 %v2047_v38  ;;  %v2012_v33 = vsub.f32 %v6529_v63, %v2006_v24  ;;  %v2007_v37 = vmul.f32 0.03125, %v2001_v28 }
0x1470   :  { %v2013_v34 = vsub.f32 %v6535_v20, %v2007_v37  ;;  %v2018_v14 = vmul.f32 %v2012_v33, %v2012_v33 }
0x1472   :  { %v2032_v36 = vsel %vm235_vm5, %v2018_v14, 0.0  ;;  %v2019_v31 = vmul.f32 %v2013_v34, %v2013_v34 }
0x1473   :  { %2033 = vadd.xlane.f32.xlu0 %v2032_v36 }
0x1474   :  { %v2035_v43 = vsel %vm251_vm9, %v2019_v31, 0.0 }
0x1475   :  { %2036 = vadd.xlane.f32.xlu1 %v2035_v43 }
0x1476   :  { %v5667_v44 = vpop.eup %5666 }
0x1477   :  { %v2058_v45 = vmul.f32 %v5667_v44, %v6518_v25  ;;  %v6606_v25 = vld [vmem:[%s7261_s14] ss:$0 sm:$0xff] }
0x1478   :  { %v5669_v61 = vpop.eup %5668 }
0x1479   :  { %v2059_v0 = vmul.f32 %v5669_v61, %v6524_v60  ;;  %v2070_v50 = vmul.f32 %v6545_v30, %v2058_v45 }
0x147b   :  { %v2071_v1 = vmul.f32 %v6545_v30, %v2059_v0  ;;  %v2082_v3 = vadd.f32 %v6551_v41, %v2070_v50 }
0x147d   :  { %v2083_v5 = vadd.f32 %v6551_v41, %v2071_v1 }
0x147f   :  { %v2087_v6 = vpack.c.bf16 %v2083_v5, %v2082_v3 }
0x1481   :  { %5157 = vmatmul.mubr.msk.bf16.gmra.mrb[48].mxu0 %vm235_vm5, %v2087_v6 }
0x1482   :  { %5160 = vmatprep.mubr.msk.bf16.mxu0 %vm5823_vm10, %v5822_v7 }
0x14c3   :  { %v2155_v60 = vpop.f32.mrb[44].mxu0 }
0x14c4   :  { %v2156_v48 = vadd.f32 %v6606_v25, %v2155_v60  ;;  %v5154_v2 = vpop.f32.mrb[45].mxu0 }
0x14c5   :  { %v2158_v19 = vpop.f32.mrb[46].mxu0 }
0x14c6   :  { %v2184_v15 = vmul.f32 0.044715, %v2156_v48  ;;  %v2159_v18 = vadd.f32 %v6606_v25, %v2158_v19  ;;  %v5155_v29 = vpop.f32.mrb[47].mxu0  ;;  %v2178_v52 = vmul.f32 0.5, %v2156_v48 }
0x14c8   :  { %v2190_v39 = vmul.f32 %v2184_v15, %v2156_v48  ;;  %v2185_v27 = vmul.f32 0.044715, %v2159_v18  ;;  %v2179_v53 = vmul.f32 0.5, %v2159_v18 }
0x14ca   :  { %v2196_v35 = vmul.f32 %v2190_v39, %v2156_v48  ;;  %v2191_v40 = vmul.f32 %v2185_v27, %v2159_v18 }
0x14cc   :  { %v2202_v42 = vadd.f32 %v2196_v35, %v2156_v48  ;;  %v2197_v54 = vmul.f32 %v2191_v40, %v2159_v18 }
0x14ce   :  { %v2208_v47 = vmul.f32 0.7978846, %v2202_v42  ;;  %v2203_v49 = vadd.f32 %v2197_v54, %v2159_v18  ;;  %v6626_v42 = vld [vmem:[%s7262_s16] ss:$0 sm:$0xff] }
0x14d0   :  { %5670 = vtanh.f32 %v2208_v47  ;;  %v2209_v46 = vmul.f32 0.7978846, %v2203_v49 }
0x14d2   :  { %5672 = vtanh.f32 %v2209_v46 }
0x14da   :  { %v5671_v11 = vpop.eup %5670 }
0x14db   :  { %v2220_v16 = vadd.f32 1.0, %v5671_v11 }
0x14dc   :  { %v5673_v51 = vpop.eup %5672 }
0x14dd   :  { %v2221_v59 = vadd.f32 1.0, %v5673_v51  ;;  %v2226_v58 = vmul.f32 %v2220_v16, %v2178_v52 }
0x14df   :  { %v2227_v55 = vmul.f32 %v2221_v59, %v2179_v53 }
0x14e1   :  { %v2232_v56 = vpack.c.bf16 %v2227_v55, %v2226_v58 }
0x14e3   :  { %5181 = vmatmul.mubr.bf16.vlgmr.msra.gmra.mrb[48].mxu1 %v2232_v56 }
0x14e4   :  { %5184 = vmatprep.mubr.msk.bf16.mxu1 %vm5823_vm10, %v5822_v7 }
0x1500   :  { %v2034_v57 = vpop.xlane.xlu0 %2033 }
0x1501   :  { %v2042_v26 = vmul.f32 0.03125, %v2034_v57 }
0x1502   :  { %v2037_v62 = vpop.xlane.xlu1 %2036 }
0x1503   :  { %v2048_v4 = vadd.f32 1e-05, %v2042_v26  ;;  %v2043_v8 = vmul.f32 0.03125, %v2037_v62 }
0x1505   :  { %5674 = vrsqrt.f32 %v2048_v4  ;;  %v2049_v10 = vadd.f32 1e-05, %v2043_v8 }
0x1507   :  { %5676 = vrsqrt.f32 %v2049_v10 }
0x150f   :  { %v5675_v12 = vpop.eup %5674 }
0x1510   :  { %v2060_v17 = vmul.f32 %v5675_v12, %v2012_v33 }
0x1511   :  { %v5677_v22 = vpop.eup %5676 }
0x1512   :  { %v2061_v38 = vmul.f32 %v5677_v22, %v2013_v34  ;;  %v2072_v24 = vmul.f32 %v6545_v30, %v2060_v17 }
0x1514   :  { %v2073_v28 = vmul.f32 %v6545_v30, %v2061_v38  ;;  %v2084_v37 = vadd.f32 %v6551_v41, %v2072_v24 }
0x1516   :  { %v2085_v14 = vadd.f32 %v6551_v41, %v2073_v28 }
0x1518   :  { %v2088_v36 = vpack.c.bf16 %v2085_v14, %v2084_v37 }
0x151a   :  { %5161 = vmatmul.mubr.msk.bf16.gmra.mrb[52].mxu0 %vm235_vm5, %v2088_v36 }
0x151b   :  { %5196 = vmatprep.mubr.msk.bf16.mxu0 %vm5823_vm10, %v5822_v7 }
0x1554   :  { %v2163_v31 = vpop.f32.mrb[48].mxu0 }
0x1555   :  { %v2164_v43 = vadd.f32 %v6606_v25, %v2163_v31  ;;  %v5158_v33 = vpop.f32.mrb[49].mxu0 }
0x1556   :  { %v2166_v44 = vpop.f32.mrb[50].mxu0 }
0x1557   :  { %v2186_v34 = vmul.f32 0.044715, %v2164_v43  ;;  %v2167_v45 = vadd.f32 %v6606_v25, %v2166_v44  ;;  %v5159_v61 = vpop.f32.mrb[51].mxu0  ;;  %v2180_v15 = vmul.f32 0.5, %v2164_v43 }
0x1559   :  { %v2192_v30 = vmul.f32 %v2186_v34, %v2164_v43  ;;  %v2187_v0 = vmul.f32 0.044715, %v2167_v45  ;;  %v2181_v18 = vmul.f32 0.5, %v2167_v45 }
0x155b   :  { %v2198_v50 = vmul.f32 %v2192_v30, %v2164_v43  ;;  %v2193_v1 = vmul.f32 %v2187_v0, %v2167_v45 }
0x155d   :  { %v2199_v41 = vmul.f32 %v2193_v1, %v2167_v45  ;;  %v2204_v3 = vadd.f32 %v2198_v50, %v2164_v43 }
0x155f   :  { %v2205_v5 = vadd.f32 %v2199_v41, %v2167_v45  ;;  %v2210_v6 = vmul.f32 0.7978846, %v2204_v3 }
0x1561   :  { %v2211_v60 = vmul.f32 0.7978846, %v2205_v5  ;;  %5678 = vtanh.f32 %v2210_v6 }
0x1563   :  { %5680 = vtanh.f32 %v2211_v60 }
0x156b   :  { %v5679_v48 = vpop.eup %5678 }
0x156c   :  { %v2222_v2 = vadd.f32 1.0, %v5679_v48 }
0x156d   :  { %v5681_v19 = vpop.eup %5680 }
0x156e   :  { %v2223_v29 = vadd.f32 1.0, %v5681_v19  ;;  %v2228_v39 = vmul.f32 %v2222_v2, %v2180_v15 }
0x1570   :  { %v2229_v27 = vmul.f32 %v2223_v29, %v2181_v18  ;;  %v5538_v29 = vld [vmem:[%s7300_s23 + $0x10] sm:$0xff]  }
0x1571   :  { %5193 = vmatpush3.bf16.msra.mxu0 %v5538_v29 }
0x1572   :  { %v2233_v35 = vpack.c.bf16 %v2229_v27, %v2228_v39  ;;  %5194 = vmatprep.subr.bf16.mxu0 %v5822_v7  ;;  %v5539_v39 = vld [vmem:[%s7300_s23 + $0x18] sm:$0xff]  }
0x1574   :  { %5185 = vmatmul.mubr.bf16.gmra.mrb[52].mxu1 %v2233_v35 }
0x1575   :  { %5188 = vmatprep.mubr.msk.bf16.mxu1 %vm5823_vm10, %v5822_v7  ;;  %5195 = vmatpush3.bf16.msra.mxu0 %v5539_v39 }
0x15b6   :  { %v2333_v40 = vpop.f32.mrb[48].mxu1 }
0x15b7   :  { %v2356_v54 = vadd.f32 %v2333_v40, %v6462_v23  ;;  %v5182_v47 = vpop.f32.mrb[49].mxu1 }
0x15b8   :  { %v2336_v49 = vpop.f32.mrb[50].mxu1 }
0x15b9   :  { %v6630_v46 = vadd.f32 %v6626_v42, %v2356_v54  ;;  %v2357_v11 = vadd.f32 %v2336_v49, %v6454_v32  ;;  %v5183_v16 = vpop.f32.mrb[51].mxu1 }
0x15bb   :  { %v6634_v51 = vadd.f32 %v6626_v42, %v2357_v11  ;;  %v2379_v52 = vsel %vm235_vm5, %v6630_v46, 0.0 }
0x15bc   :  { %2380 = vadd.xlane.f32.xlu0 %v2379_v52 }
0x15bd   :  { %v2382_v53 = vsel %vm235_vm5, %v6634_v51, 0.0 }
0x15be   :  { %2383 = vadd.xlane.f32.xlu1 %v2382_v53 }
0x15ed   :  { %v2171_v23 = vpop.f32.mrb[52].mxu0 }
0x15ee   :  { %v2172_v59 = vadd.f32 %v6606_v25, %v2171_v23  ;;  %v5162_v58 = vpop.f32.mrb[53].mxu0 }
0x15ef   :  { %v2174_v55 = vpop.f32.mrb[54].mxu0 }
0x15f0   :  { %v2188_v56 = vmul.f32 0.044715, %v2172_v59  ;;  %v2175_v32 = vadd.f32 %v6606_v25, %v2174_v55  ;;  %v5163_v57 = vpop.f32.mrb[55].mxu0  ;;  %v2182_v14 = vmul.f32 0.5, %v2172_v59 }
0x15f2   :  { %v2194_v26 = vmul.f32 %v2188_v56, %v2172_v59  ;;  %v2189_v62 = vmul.f32 0.044715, %v2175_v32  ;;  %v2183_v36 = vmul.f32 0.5, %v2175_v32 }
0x15f4   :  { %v2200_v4 = vmul.f32 %v2194_v26, %v2172_v59  ;;  %v2195_v8 = vmul.f32 %v2189_v62, %v2175_v32 }
0x15f6   :  { %v2201_v10 = vmul.f32 %v2195_v8, %v2175_v32  ;;  %v2206_v12 = vadd.f32 %v2200_v4, %v2172_v59 }
0x15f8   :  { %v2207_v17 = vadd.f32 %v2201_v10, %v2175_v32  ;;  %v2212_v22 = vmul.f32 0.7978846, %v2206_v12 }
0x15fa   :  { %v2213_v38 = vmul.f32 0.7978846, %v2207_v17  ;;  %5682 = vtanh.f32 %v2212_v22 }
0x15fc   :  { %5684 = vtanh.f32 %v2213_v38 }
0x1604   :  { %v5683_v24 = vpop.eup %5682 }
0x1605   :  { %v2224_v28 = vadd.f32 1.0, %v5683_v24 }
0x1606   :  { %v5685_v37 = vpop.eup %5684 }
0x1607   :  { %v2225_v31 = vadd.f32 1.0, %v5685_v37  ;;  %v2230_v43 = vmul.f32 %v2224_v28, %v2182_v14  ;;  %v4687_v14 = vld [vmem:[%s7253_s6 + $0x1] ss:$0 sm:$0xff] }
0x1609   :  { %v2231_v25 = vmul.f32 %v2225_v31, %v2183_v36 }
0x160b   :  { %v2234_v33 = vpack.c.bf16 %v2231_v25, %v2230_v43 }
0x160d   :  { %5189 = vmatmul.mubr.bf16.gmra.mrb[56].mxu1 %v2234_v33 }
0x1647   :  { %v2341_v44 = vpop.f32.mrb[52].mxu1 }
0x1648   :  { %v2358_v34 = vadd.f32 %v2341_v44, %v6496_v9  ;;  %v5186_v45 = vpop.f32.mrb[53].mxu1 }
0x1649   :  { %v2381_v61 = vpop.xlane.xlu0 %2380  ;;  %v2344_v30 = vpop.f32.mrb[54].mxu1 }
0x164a   :  { %v6644_v0 = vadd.f32 %v6626_v42, %v2358_v34  ;;  %v2397_v50 = vmul.f32 0.03125, %v2381_v61  ;;  %v2359_v1 = vadd.f32 %v2344_v30, %v6500_v13  ;;  %v5187_v41 = vpop.f32.mrb[55].mxu1 }
0x164b   :  { %v2384_v3 = vpop.xlane.xlu1 %2383 }
0x164c   :  { %v2403_v5 = vsub.f32 %v6630_v46, %v2397_v50  ;;  %v6649_v6 = vadd.f32 %v6626_v42, %v2359_v1  ;;  %v2398_v60 = vmul.f32 0.03125, %v2384_v3  ;;  %v2385_v9 = vsel %vm235_vm5, %v6644_v0, 0.0 }
0x164d   :  { %2386 = vadd.xlane.f32.xlu0 %v2385_v9 }
0x164e   :  { %v2404_v48 = vsub.f32 %v6634_v51, %v2398_v60  ;;  %v2388_v2 = vsel %vm235_vm5, %v6649_v6, 0.0  ;;  %v2409_v19 = vmul.f32 %v2403_v5, %v2403_v5 }
0x164f   :  { %2389 = vadd.xlane.f32.xlu1 %v2388_v2 }
0x1650   :  { %v2415_v13 = vsel %vm235_vm5, %v2409_v19, 0.0  ;;  %v2410_v15 = vmul.f32 %v2404_v48, %v2404_v48 }
0x1651   :  { %2416 = vadd.xlane.f32.xlu0 %v2415_v13 }
0x1652   :  { %v2418_v18 = vsel %vm235_vm5, %v2410_v15, 0.0 }
0x1653   :  { %2419 = vadd.xlane.f32.xlu1 %v2418_v18 }
0x16da   :  { %v2387_v27 = vpop.xlane.xlu0 %2386 }
0x16db   :  { %v2399_v35 = vmul.f32 0.03125, %v2387_v27 }
0x16dc   :  { %v2390_v40 = vpop.xlane.xlu1 %2389 }
0x16dd   :  { %v6666_v54 = vsub.f32 %v6644_v0, %v2399_v35  ;;  %v2400_v47 = vmul.f32 0.03125, %v2390_v40 }
0x16de   :  { %v2417_v49 = vpop.xlane.xlu0 %2416 }
0x16df   :  { %v2406_v11 = vsub.f32 %v6649_v6, %v2400_v47  ;;  %v2433_v16 = vmul.f32 0.03125, %v2417_v49  ;;  %v2411_v52 = vmul.f32 %v6666_v54, %v6666_v54  ;;  %v6711_v49 = vld [vmem:[%s7254_s8 + $0x1] ss:$0 sm:$0xff]  ;;  %s7301_s8 = smov 112  }
0x16e0   :  { %v2420_v53 = vpop.xlane.xlu1 %2419  ;;  %v2349_v23 = vpop.f32.mrb[56].mxu1 }
0x16e1   :  { %v2439_v59 = vadd.f32 1e-05, %v2433_v16  ;;  %v2434_v58 = vmul.f32 0.03125, %v2420_v53  ;;  %v2360_v55 = vadd.f32 %v2349_v23, %v6529_v63  ;;  %v5190_v56 = vpop.f32.mrb[57].mxu1  ;;  %v2421_v32 = vsel %vm235_vm5, %v2411_v52, 0.0 }
0x16e2   :  { %2422 = vadd.xlane.f32.xlu0 %v2421_v32  ;;  %v2352_v57 = vpop.f32.mrb[58].mxu1  ;;  %v2412_v26 = vmul.f32 %v2406_v11, %v2406_v11 }
0x16e3   :  { %5686 = vrsqrt.f32 %v2439_v59  ;;  %v2440_v62 = vadd.f32 1e-05, %v2434_v58  ;;  %v6674_v4 = vadd.f32 %v6626_v42, %v2360_v55  ;;  %v2361_v8 = vadd.f32 %v2352_v57, %v6535_v20  ;;  %v5191_v10 = vpop.f32.mrb[59].mxu1  ;;  %v6688_v20 = vld [vmem:[%s7252_s5 + $0x1] ss:$0 sm:$0xff] }
0x16e4   :  { %v2424_v12 = vsel %vm235_vm5, %v2412_v26, 0.0 }
0x16e5   :  { %5688 = vrsqrt.f32 %v2440_v62  ;;  %v6679_v17 = vadd.f32 %v6626_v42, %v2361_v8  ;;  %2425 = vadd.xlane.f32.xlu1 %v2424_v12  ;;  %v2391_v63 = vsel %vm235_vm5, %v6674_v4, 0.0 }
0x16e6   :  { %2392 = vadd.xlane.f32.xlu0 %v2391_v63 }
0x16e7   :  { %v2394_v22 = vsel %vm251_vm9, %v6679_v17, 0.0 }
0x16e9   :  { %2395 = vadd.xlane.f32.xlu1 %v2394_v22 }
0x16ed   :  { %v5687_v38 = vpop.eup %5686 }
0x16ee   :  { %v2451_v24 = vmul.f32 %v5687_v38, %v2403_v5 }
0x16ef   :  { %v5689_v28 = vpop.eup %5688 }
0x16f0   :  { %v2463_v42 = vmul.f32 %v6688_v20, %v2451_v24  ;;  %v2452_v37 = vmul.f32 %v5689_v28, %v2404_v48 }
0x16f2   :  { %v2464_v36 = vmul.f32 %v6688_v20, %v2452_v37  ;;  %v2475_v31 = vadd.f32 %v4687_v14, %v2463_v42 }
0x16f4   :  { %v2476_v43 = vadd.f32 %v4687_v14, %v2464_v36 }
0x16f6   :  { %v2481_v25 = vpack.c.bf16 %v2476_v43, %v2475_v31 }
0x16f8   :  { %5197 = vmatmul.mubr.msk.bf16.vlgmr.msra.gmra.mrb[56].mxu0 %vm235_vm5, %v2481_v25 }
0x16f9   :  { %5200 = vmatprep.mubr.msk.bf16.mxu0 %vm5823_vm10, %v5822_v7 }
0x176f   :  { %v2423_v33 = vpop.xlane.xlu0 %2422 }
0x1770   :  { %v2435_v44 = vmul.f32 0.03125, %v2423_v33 }
0x1772   :  { %v2441_v34 = vadd.f32 1e-05, %v2435_v44  ;;  %v2426_v45 = vpop.xlane.xlu1 %2425 }
0x1773   :  { %v2436_v61 = vmul.f32 0.03125, %v2426_v45  ;;  %v2393_v30 = vpop.xlane.xlu0 %2392 }
0x1774   :  { %5690 = vrsqrt.f32 %v2441_v34  ;;  %v2401_v50 = vmul.f32 0.03125, %v2393_v30 }
0x1775   :  { %v2442_v1 = vadd.f32 1e-05, %v2436_v61 }
0x1776   :  { %v2407_v41 = vsub.f32 %v6674_v4, %v2401_v50  ;;  %v2396_v3 = vpop.xlane.xlu1 %2395 }
0x1777   :  { %5692 = vrsqrt.f32 %v2442_v1  ;;  %v2402_v5 = vmul.f32 0.03125, %v2396_v3 }
0x1778   :  { %v2413_v60 = vmul.f32 %v2407_v41, %v2407_v41 }
0x1779   :  { %v2408_v9 = vsub.f32 %v6679_v17, %v2402_v5 }
0x177a   :  { %v2427_v48 = vsel %vm235_vm5, %v2413_v60, 0.0 }
0x177b   :  { %2428 = vadd.xlane.f32.xlu0 %v2427_v48  ;;  %v2414_v2 = vmul.f32 %v2408_v9, %v2408_v9 }
0x177d   :  { %v2430_v19 = vsel %vm251_vm9, %v2414_v2, 0.0 }
0x177e   :  { %v5691_v13 = vpop.eup %5690  ;;  %2431 = vadd.xlane.f32.xlu1 %v2430_v19 }
0x177f   :  { %v2453_v15 = vmul.f32 %v5691_v13, %v6666_v54 }
0x1781   :  { %v5693_v18 = vpop.eup %5692  ;;  %v2465_v39 = vmul.f32 %v6688_v20, %v2453_v15 }
0x1782   :  { %v2454_v29 = vmul.f32 %v5693_v18, %v2406_v11 }
0x1783   :  { %v2477_v35 = vadd.f32 %v4687_v14, %v2465_v39 }
0x1784   :  { %v2466_v27 = vmul.f32 %v6688_v20, %v2454_v29 }
0x1786   :  { %v2478_v40 = vadd.f32 %v4687_v14, %v2466_v27 }
0x1788   :  { %v2482_v47 = vpack.c.bf16 %v2478_v40, %v2477_v35 }
0x178a   :  { %5201 = vmatmul.mubr.msk.bf16.gmra.mrb[60].mxu0 %vm235_vm5, %v2482_v47 }
0x178b   :  { %5204 = vmatprep.mubr.msk.bf16.mxu0 %vm5823_vm10, %v5822_v7 }
0x17cb   :  { %v2552_v54 = vpop.f32.mrb[56].mxu0 }
0x17cc   :  { %v5198_v16 = vpop.f32.mrb[57].mxu0  ;;  %v2553_v52 = vadd.f32 %v6711_v49, %v2552_v54 }
0x17cd   :  { %v2555_v11 = vpop.f32.mrb[58].mxu0 }
0x17ce   :  { %v2556_v53 = vadd.f32 %v6711_v49, %v2555_v11  ;;  %v5199_v23 = vpop.f32.mrb[59].mxu0 }
0x17d0   :  { %v6715_v59 = vpack.c.bf16 %v2556_v53, %v2553_v52 }
0x17d2   :  { %2579 = vrot.lane.b32.xlu0 %v6715_v59, %s5825_s0 }
0x1808   :  { %v2429_v58 = vpop.xlane.xlu0 %2428 }
0x1809   :  { %v2437_v55 = vmul.f32 0.03125, %v2429_v58 }
0x180b   :  { %v2443_v56 = vadd.f32 1e-05, %v2437_v55  ;;  %v2432_v32 = vpop.xlane.xlu1 %2431 }
0x180c   :  { %v2438_v57 = vmul.f32 0.03125, %v2432_v32 }
0x180d   :  { %5694 = vrsqrt.f32 %v2443_v56 }
0x180e   :  { %v2444_v26 = vadd.f32 1e-05, %v2438_v57 }
0x1810   :  { %5696 = vrsqrt.f32 %v2444_v26 }
0x1817   :  { %v5695_v62 = vpop.eup %5694 }
0x1818   :  { %v2455_v8 = vmul.f32 %v5695_v62, %v2407_v41 }
0x181a   :  { %v5697_v10 = vpop.eup %5696  ;;  %v2467_v63 = vmul.f32 %v6688_v20, %v2455_v8 }
0x181b   :  { %v2456_v12 = vmul.f32 %v5697_v10, %v2408_v9 }
0x181c   :  { %v2479_v38 = vadd.f32 %v4687_v14, %v2467_v63 }
0x181d   :  { %v2468_v22 = vmul.f32 %v6688_v20, %v2456_v12 }
0x181f   :  { %v2480_v24 = vadd.f32 %v4687_v14, %v2468_v22 }
0x1821   :  { %v2483_v28 = vpack.c.bf16 %v2480_v24, %v2479_v38 }
0x1823   :  { %5205 = vmatmul.mubr.msk.bf16.gmra.mrb[64].mxu0 %vm235_vm5, %v2483_v28 }
0x1824   :  { %5212 = vmatprep.mubr.msk.bf16.mxu0 %vm440_vm11, %v6715_v59 }
0x1844   :  { %v2580_v42 = vpop.permute.xlu0 %2579 }
0x1845   :  { %5428 = vmatprep.subr.msk.bf16.mxu0 %vm440_vm11, %v2580_v42  ;;  %v2590_v37 = vsel %vm440_vm11, %v2580_v42, 0 }
0x1846   :  { %5209 = vmatpush3.bf16.xpose.msra.mxu0 %v2590_v37 }
0x185d   :  { %v2560_v36 = vpop.f32.mrb[60].mxu0 }
0x185e   :  { %v2561_v31 = vadd.f32 %v6711_v49, %v2560_v36  ;;  %v5202_v43 = vpop.f32.mrb[61].mxu0 }
0x185f   :  { %v2563_v25 = vpop.f32.mrb[62].mxu0 }
0x1860   :  { %v6727_v20 = vpack.c.bf16 %v2561_v31, %v2561_v31  ;;  %v2564_v14 = vadd.f32 %v6711_v49, %v2563_v25  ;;  %v5203_v33 = vpop.f32.mrb[63].mxu0 }
0x1862   :  { %v6730_v44 = vpack.c.bf16 %v2564_v14, %v2561_v31  ;;  %2746 = vrot.lane.b32.xlu0 %v6727_v20, %s5824_s29  ;;  %2581 = vrot.lane.b32.xlu1 %v6727_v20, %s5825_s0 }
0x1866   :  { %2742 = vrot.lane.b32.xlu0 %v6727_v20, %s5826_s4  ;;  %2744 = vrot.lane.b32.xlu1 %v6715_v59, %s5824_s29 }
0x186a   :  { %2740 = vrot.lane.b32.xlu1 %v6715_v59, %s5826_s4 }
0x18d4   :  { %v2582_v34 = vpop.permute.xlu1 %2581  ;;  %v2747_v1 = vpop.permute.xlu0 %2746 }
0x18d5   :  { %5429 = vmatprep.subr.msk.bf16.mxu0 %vm440_vm11, %v2582_v34  ;;  %v2593_v45 = vsel %vm440_vm11, %v2582_v34, 0  ;;  %v2758_v41 = vsel %vm440_vm11, %v2747_v1, 0 }
0x18d6   :  { %5211 = vmatpush3.bf16.xpose.msra.mxu0 %v2593_v45 }
0x18d8   :  { %v2745_v61 = vpop.permute.xlu1 %2744  ;;  %v2743_v3 = vpop.permute.xlu0 %2742 }
0x18d9   :  { %5430 = vmatprep.subr.msk.bf16.mxu0 %vm440_vm11, %v2745_v61  ;;  %v2755_v50 = vsel %vm440_vm11, %v2745_v61, 0 }
0x18dc   :  { %v2741_v30 = vpop.permute.xlu1 %2740 }
0x18dd   :  { %5213 = vmatmul.mubr.msk.bf16.vlgmr.msra.gmra.mrb[68].mxu0 %vm440_vm11, %v6727_v20 }
0x18de   :  { %5225 = vmatpush3.bf16.xpose.msra.mxu0 %v2755_v50  ;;  %5228 = vmatprep.mubr.msk.bf16.mxu0 %vm440_vm11, %v2741_v30 }
0x18df   :  { %5431 = vmatprep.subr.msk.bf16.mxu0 %vm440_vm11, %v2747_v1 }
0x18e6   :  { %5227 = vmatpush3.bf16.xpose.msra.mxu0 %v2758_v41 }
0x18ed   :  { %5229 = vmatmul.mubr.msk.bf16.vlgmr.msra.gmra.mrb[72].mxu0 %vm440_vm11, %v2743_v3 }
0x18f6   :  { %v2568_v5 = vpop.f32.mrb[64].mxu0 }
0x18f7   :  { %v5206_v60 = vpop.f32.mrb[65].mxu0  ;;  %v2569_v48 = vadd.f32 %v6711_v49, %v2568_v5 }
0x18f8   :  { %v2571_v9 = vpop.f32.mrb[66].mxu0 }
0x18f9   :  { %v2572_v2 = vadd.f32 %v6711_v49, %v2571_v9  ;;  %v5207_v19 = vpop.f32.mrb[67].mxu0 }
0x18fb   :  { %v6754_v13 = vpack.c.bf16 %v2572_v2, %v2569_v48 }
0x19b0   :  { %v5214_v15 = vpop.f32.mrb[68].mxu0 }
0x19b1   :  { %v2629_v18 = vpop.f32.mrb[69].mxu0  ;;  %v2649_v40 = vsel %vm508_vm13, %v5214_v15, -inf }
0x19b2   :  { %v5215_v29 = vpop.f32.mrb[70].mxu0  ;;  %v2643_v39 = vsel %vm501_vm12, %v2629_v18, -inf }
0x19b3   :  { %2644 = vmax.xlane.f32.xlu1 %v2643_v39  ;;  %v2632_v27 = vpop.f32.mrb[71].mxu0 }
0x19b4   :  { %v2646_v35 = vsel %vm501_vm12, %v2632_v27, -inf }
0x19b5   :  { %2647 = vmax.xlane.f32.xlu0 %v2646_v35 }
0x19b9   :  { %2650 = vmax.xlane.f32.xlu0 %v2649_v40 }
0x19c0   :  { %v5230_v47 = vpop.f32.mrb[72].mxu0 }
0x19c1   :  { %v2794_v54 = vpop.f32.mrb[73].mxu0  ;;  %v2814_v53 = vsel %vm508_vm13, %v5230_v47, -inf }
0x19c2   :  { %v5231_v16 = vpop.f32.mrb[74].mxu0  ;;  %v2808_v49 = vsel %vm501_vm12, %v2794_v54, -inf }
0x19c3   :  { %2809 = vmax.xlane.f32.xlu1 %v2808_v49  ;;  %v2797_v11 = vpop.f32.mrb[75].mxu0 }
0x19c4   :  { %v2811_v52 = vsel %vm501_vm12, %v2797_v11, -inf }
0x19c5   :  { %2812 = vmax.xlane.f32.xlu0 %v2811_v52 }
0x19c7   :  { %2815 = vmax.xlane.f32.xlu1 %v2814_v53 }
0x19d8   :  { %2680 = vrot.lane.b32.xlu1 %v6727_v20, %s5829_s2 }
0x19db   :  { %2678 = vrot.lane.b32.xlu0 %v6715_v59, %s5829_s2 }
0x19dc   :  { %2843 = vrot.lane.b32.xlu1 %v6715_v59, %s5830_s24 }
0x1a40   :  { %v2645_v23 = vpop.xlane.xlu1 %2644 }
0x1a41   :  { %v2652_v56 = vsub.f32 %v2629_v18, %v2645_v23 }
0x1a42   :  { %v2648_v58 = vpop.xlane.xlu0 %2647 }
0x1a43   :  { %v2653_v55 = vsub.f32 %v2632_v27, %v2648_v58  ;;  %v2655_v62 = vmul.f32 1.442695, %v2652_v56 }
0x1a45   :  { %v2657_v32 = vmul.f32 1.442695, %v2653_v55 }
0x1a46   :  { %v2651_v57 = vpop.xlane.xlu0 %2650 }
0x1a47   :  { %5698 = vpow2.f32 %v2657_v32  ;;  %v2654_v26 = vsub.f32 %v5214_v15, %v2651_v57 }
0x1a49   :  { %v2659_v8 = vmul.f32 1.442695, %v2654_v26 }
0x1a4b   :  { %5700 = vpow2.f32 %v2659_v8 }
0x1a4c   :  { %5702 = vpow2.f32 %v2655_v62 }
0x1a50   :  { %v2810_v10 = vpop.xlane.xlu1 %2809 }
0x1a51   :  { %v5699_v12 = vpop.eup %5698  ;;  %v2817_v38 = vsub.f32 %v2794_v54, %v2810_v10 }
0x1a52   :  { %v2813_v63 = vpop.xlane.xlu0 %2812  ;;  %v2664_v22 = vsel %vm501_vm12, %v5699_v12, 0.0 }
0x1a53   :  { %v2818_v24 = vsub.f32 %v2797_v11, %v2813_v63  ;;  %2665 = vadd.xlane.f32.xlu1 %v2664_v22  ;;  %v2820_v14 = vmul.f32 1.442695, %v2817_v38 }
0x1a54   :  { %v2816_v28 = vpop.xlane.xlu1 %2815 }
0x1a55   :  { %v5701_v42 = vpop.eup %5700  ;;  %v2822_v37 = vmul.f32 1.442695, %v2818_v24  ;;  %v2819_v36 = vsub.f32 %v5230_v47, %v2816_v28 }
0x1a56   :  { %v2679_v31 = vpop.permute.xlu0 %2678  ;;  %v2667_v43 = vsel %vm508_vm13, %v5701_v42, 0.0  ;;  %v5703_v25 = vpop.eup %5702 }
0x1a57   :  { %5704 = vpow2.f32 %v2822_v37  ;;  %v2824_v33 = vmul.f32 1.442695, %v2819_v36  ;;  %2668 = vadd.xlane.f32.xlu0 %v2667_v43  ;;  %5216 = vmatprep.subr.bf16.mxu1 %v2679_v31  ;;  %v2661_v61 = vsel %vm501_vm12, %v5703_v25, 0.0 }
0x1a58   :  { %5217 = vmatpush3.bf16.msra.mxu1 %v2679_v31  ;;  %v2681_v34 = vpop.permute.xlu1 %2680 }
0x1a59   :  { %5706 = vpow2.f32 %v2824_v33  ;;  %v2690_v45 = vand.u32 %v2681_v34, %v6197_v21 }
0x1a5a   :  { %5708 = vpow2.f32 %v2820_v14 }
0x1a5b   :  { %2662 = vadd.xlane.f32.xlu0 %v2661_v61  ;;  %5218 = vmatprep.subr.bf16.mxu1 %v2690_v45 }
0x1a5c   :  { %5219 = vmatpush3.bf16.msra.mxu1 %v2690_v45  ;;  %v2844_v30 = vpop.permute.xlu1 %2843 }
0x1a5d   :  { %5232 = vmatprep.subr.bf16.mxu1 %v2844_v30 }
0x1a61   :  { %v5705_v50 = vpop.eup %5704 }
0x1a62   :  { %v2829_v1 = vsel %vm501_vm12, %v5705_v50, 0.0 }
0x1a63   :  { %v5707_v41 = vpop.eup %5706  ;;  %2830 = vadd.xlane.f32.xlu0 %v2829_v1 }
0x1a64   :  { %v2832_v3 = vsel %vm508_vm13, %v5707_v41, 0.0  ;;  %v5709_v5 = vpop.eup %5708 }
0x1a65   :  { %2833 = vadd.xlane.f32.xlu1 %v2832_v3  ;;  %v2826_v60 = vsel %vm501_vm12, %v5709_v5, 0.0 }
0x1a69   :  { %2827 = vadd.xlane.f32.xlu1 %v2826_v60 }
0x1a79   :  { %2845 = vrot.lane.b32.xlu0 %v6727_v20, %s5830_s24 }
0x1a7a   :  { %2909 = vrot.lane.b32.xlu1 %v6715_v59, %s5827_s7 }
0x1a7d   :  { %2911 = vrot.lane.b32.xlu0 %v6727_v20, %s5827_s7 }
0x1a7e   :  { %2905 = vrot.lane.b32.xlu1 %v6715_v59, %s7301_s8 }
0x1a81   :  { %2907 = vrot.lane.b32.xlu0 %v6727_v20, %s7301_s8 }
0x1ae0   :  { %v2666_v9 = vpop.xlane.xlu1 %2665 }
0x1ae4   :  { %v2669_v48 = vpop.xlane.xlu0 %2668 }
0x1ae5   :  { %5710 = vrcp.f32 %v2669_v48 }
0x1ae6   :  { %5712 = vrcp.f32 %v2666_v9 }
0x1ae8   :  { %v2663_v2 = vpop.xlane.xlu0 %2662 }
0x1ae9   :  { %5714 = vrcp.f32 %v2663_v2 }
0x1aef   :  { %v5711_v19 = vpop.eup %5710 }
0x1af0   :  { %v2831_v15 = vpop.xlane.xlu0 %2830  ;;  %v5713_v18 = vpop.eup %5712  ;;  %v2675_v27 = vmul.f32 %v5711_v19, %v5701_v42 }
0x1af1   :  { %v2674_v40 = vmul.f32 %v5713_v18, %v5699_v12 }
0x1af2   :  { %v2834_v29 = vpop.xlane.xlu1 %2833  ;;  %v2677_v49 = vpack.c.bf16 %v2675_v27, %v2675_v27 }
0x1af3   :  { %v5715_v39 = vpop.eup %5714  ;;  %5716 = vrcp.f32 %v2834_v29 }
0x1af4   :  { %v2673_v35 = vmul.f32 %v5715_v39, %v5703_v25  ;;  %5718 = vrcp.f32 %v2831_v15  ;;  %v2846_v47 = vpop.permute.xlu0 %2845 }
0x1af5   :  { %v2855_v11 = vand.u32 %v2846_v47, %v6197_v21 }
0x1af6   :  { %v2828_v54 = vpop.xlane.xlu1 %2827  ;;  %v2676_v16 = vpack.c.bf16 %v2674_v40, %v2673_v35 }
0x1af7   :  { %5720 = vrcp.f32 %v2828_v54 }
0x1af8   :  { %5220 = vmatprep.mubr.msk.bf16.mxu1 %vm501_vm12, %v2676_v16  ;;  %v2912_v10 = vpop.permute.xlu0 %2911 }
0x1af9   :  { %5221 = vmatmul.mubr.msk.bf16.vlgmr.msra.gmra.mrb[60].mxu1 %vm501_vm12, %v2677_v49  ;;  %v2923_v12 = vsel %vm440_vm11, %v2912_v10, 0 }
0x1afa   :  { %5233 = vmatpush3.bf16.msra.mxu1 %v2844_v30  ;;  %v2910_v53 = vpop.permute.xlu1 %2909 }
0x1afb   :  { %5234 = vmatprep.subr.bf16.mxu1 %v2855_v11  ;;  %v2920_v62 = vsel %vm440_vm11, %v2910_v53, 0 }
0x1afc   :  { %v2908_v63 = vpop.permute.xlu0 %2907 }
0x1afd   :  { %v5717_v52 = vpop.eup %5716 }
0x1afe   :  { %5235 = vmatpush3.bf16.msra.mxu1 %v2855_v11  ;;  %v5719_v23 = vpop.eup %5718  ;;  %v2840_v55 = vmul.f32 %v5717_v52, %v5707_v41  ;;  %v2906_v8 = vpop.permute.xlu1 %2905 }
0x1aff   :  { %5432 = vmatprep.subr.msk.bf16.mxu1 %vm440_vm11, %v2910_v53  ;;  %v2839_v32 = vmul.f32 %v5719_v23, %v5705_v50 }
0x1b00   :  { %v2842_v26 = vpack.c.bf16 %v2840_v55, %v2840_v55 }
0x1b01   :  { %v5721_v58 = vpop.eup %5720 }
0x1b02   :  { %v2838_v56 = vmul.f32 %v5721_v58, %v5709_v5 }
0x1b04   :  { %v2841_v57 = vpack.c.bf16 %v2839_v32, %v2838_v56 }
0x1b06   :  { %5236 = vmatprep.mubr.msk.bf16.mxu1 %vm501_vm12, %v2841_v57 }
0x1b07   :  { %5237 = vmatmul.mubr.msk.bf16.vlgmr.msra.gmra.mrb[64].mxu1 %vm501_vm12, %v2842_v26 }
0x1b08   :  { %5241 = vmatpush3.bf16.xpose.msra.mxu1 %v2920_v62  ;;  %5244 = vmatprep.mubr.msk.bf16.mxu1 %vm440_vm11, %v2906_v8 }
0x1b09   :  { %5433 = vmatprep.subr.msk.bf16.mxu1 %vm440_vm11, %v2912_v10 }
0x1b10   :  { %5243 = vmatpush3.bf16.xpose.msra.mxu1 %v2923_v12 }
0x1b17   :  { %5245 = vmatmul.mubr.msk.bf16.vlgmr.msra.gmra.mrb[68].mxu1 %vm440_vm11, %v2908_v63 }
0x1bcc   :  { %v6796_v22 = vpop.f32.mrb[60].mxu1 }
0x1bcd   :  { %v6798_v38 = vpop.f32.mrb[61].mxu1 }
0x1bce   :  { %v5223_v24 = vpop.f32.mrb[62].mxu1 }
0x1bcf   :  { %v6800_v28 = vpop.f32.mrb[63].mxu1 }
0x1bda   :  { %v6802_v42 = vpop.f32.mrb[64].mxu1 }
0x1bdb   :  { %v6804_v37 = vpop.f32.mrb[65].mxu1 }
0x1bdc   :  { %v5239_v36 = vpop.f32.mrb[66].mxu1 }
0x1bdd   :  { %v6806_v31 = vpop.f32.mrb[67].mxu1 }
0x1bde   :  { %v5494_v43 = vpack.i.bf16 %v6806_v31, %v6804_v37 }
0x1bea   :  { %v5246_v25 = vpop.f32.mrb[68].mxu1 }
0x1beb   :  { %v2959_v14 = vpop.f32.mrb[69].mxu1  ;;  %v2979_v30 = vsel %vm508_vm13, %v5246_v25, -inf }
0x1bec   :  { %v5247_v33 = vpop.f32.mrb[70].mxu1  ;;  %v2973_v34 = vsel %vm501_vm12, %v2959_v14, -inf }
0x1bed   :  { %2974 = vmax.xlane.f32.xlu1 %v2973_v34  ;;  %v2962_v45 = vpop.f32.mrb[71].mxu1 }
0x1bee   :  { %v2976_v61 = vsel %vm501_vm12, %v2962_v45, -inf }
0x1bef   :  { %2977 = vmax.xlane.f32.xlu0 %v2976_v61 }
0x1bf3   :  { %2980 = vmax.xlane.f32.xlu0 %v2979_v30 }
0x1c7a   :  { %v2975_v50 = vpop.xlane.xlu1 %2974 }
0x1c7b   :  { %v2982_v3 = vsub.f32 %v2959_v14, %v2975_v50 }
0x1c7c   :  { %v2978_v1 = vpop.xlane.xlu0 %2977 }
0x1c7d   :  { %v2983_v41 = vsub.f32 %v2962_v45, %v2978_v1  ;;  %v2985_v48 = vmul.f32 1.442695, %v2982_v3 }
0x1c7f   :  { %v2987_v5 = vmul.f32 1.442695, %v2983_v41 }
0x1c80   :  { %v2981_v60 = vpop.xlane.xlu0 %2980 }
0x1c81   :  { %5722 = vpow2.f32 %v2987_v5  ;;  %v2984_v9 = vsub.f32 %v5246_v25, %v2981_v60 }
0x1c83   :  { %v2989_v2 = vmul.f32 1.442695, %v2984_v9 }
0x1c85   :  { %5724 = vpow2.f32 %v2989_v2 }
0x1c86   :  { %5726 = vpow2.f32 %v2985_v48 }
0x1c8b   :  { %v5723_v19 = vpop.eup %5722 }
0x1c8c   :  { %v2994_v15 = vsel %vm501_vm12, %v5723_v19, 0.0 }
0x1c8d   :  { %2995 = vadd.xlane.f32.xlu0 %v2994_v15 }
0x1c8f   :  { %v5725_v18 = vpop.eup %5724 }
0x1c90   :  { %v2997_v29 = vsel %vm508_vm13, %v5725_v18, 0.0  ;;  %v5727_v39 = vpop.eup %5726 }
0x1c91   :  { %2998 = vadd.xlane.f32.xlu1 %v2997_v29  ;;  %v2991_v27 = vsel %vm501_vm12, %v5727_v39, 0.0 }
0x1c95   :  { %2992 = vadd.xlane.f32.xlu1 %v2991_v27 }
0x1ca3   :  { %3008 = vrot.lane.b32.xlu0 %v6715_v59, %s7302_s25 }
0x1ca6   :  { %3010 = vrot.lane.b32.xlu1 %v6727_v20, %s7302_s25 }
0x1ca7   :  { %3076 = vrot.lane.b32.xlu0 %v6727_v20, %s7303_s26 }
0x1caa   :  { %3074 = vrot.lane.b32.xlu1 %v6715_v59, %s7303_s26 }
0x1cab   :  { %3072 = vrot.lane.b32.xlu0 %v6727_v20, %s7304_s27 }
0x1cae   :  { %3070 = vrot.lane.b32.xlu1 %v6715_v59, %s7304_s27 }
0x1d1a   :  { %v2996_v35 = vpop.xlane.xlu0 %2995 }
0x1d1e   :  { %v2999_v40 = vpop.xlane.xlu1 %2998  ;;  %v3009_v47 = vpop.permute.xlu0 %3008 }
0x1d1f   :  { %5248 = vmatprep.subr.bf16.mxu0 %v3009_v47  ;;  %5728 = vrcp.f32 %v2999_v40 }
0x1d20   :  { %5249 = vmatpush3.bf16.msra.mxu0 %v3009_v47  ;;  %5730 = vrcp.f32 %v2996_v35  ;;  %v3291_v47 = vshrl.u32 %v6754_v13, 16 }
0x1d22   :  { %v2993_v54 = vpop.xlane.xlu1 %2992  ;;  %v3077_v8 = vpop.permute.xlu0 %3076 }
0x1d23   :  { %5732 = vrcp.f32 %v2993_v54  ;;  %v3088_v10 = vsel %vm440_vm11, %v3077_v8, 0  ;;  %v3294_v54 = vshll.u32 %v6754_v13, 16 }
0x1d26   :  { %v3011_v16 = vpop.permute.xlu1 %3010  ;;  %v3073_v12 = vpop.permute.xlu0 %3072 }
0x1d27   :  { %v3020_v49 = vand.u32 %v3011_v16, %v6197_v21  ;;  %v3283_v16 = vshrl.u32 %v6730_v44, 16 }
0x1d29   :  { %5250 = vmatprep.subr.bf16.mxu0 %v3020_v49  ;;  %v5729_v11 = vpop.eup %5728 }
0x1d2a   :  { %v3075_v52 = vpop.permute.xlu1 %3074  ;;  %5251 = vmatpush3.bf16.msra.mxu0 %v3020_v49  ;;  %v5731_v53 = vpop.eup %5730  ;;  %v3005_v58 = vmul.f32 %v5729_v11, %v5725_v18  ;;  %v3286_v49 = vshll.u32 %v6730_v44, 16  ;;  %v3293_v11 = vrot.slane %v3291_v47, 2 }
0x1d2b   :  { %5434 = vmatprep.subr.msk.bf16.mxu0 %vm440_vm11, %v3075_v52  ;;  %v3004_v56 = vmul.f32 %v5731_v53, %v5723_v19  ;;  %v3085_v26 = vsel %vm440_vm11, %v3075_v52, 0  ;;  %v3296_v52 = vrot.slane %v3294_v54, 3  ;;  %v3285_v53 = vrot.slane %v3283_v16, 2 }
0x1d2c   :  { %v3007_v57 = vpack.c.bf16 %v3005_v58, %v3005_v58 }
0x1d2d   :  { %v5733_v23 = vpop.eup %5732  ;;  %v6857_v58 = vor.u32 %v3296_v52, %v3293_v11 }
0x1d2e   :  { %v3003_v55 = vmul.f32 %v5733_v23, %v5727_v39  ;;  %v3071_v62 = vpop.permute.xlu1 %3070  ;;  %v3288_v23 = vrot.slane %v3286_v49, 3 }
0x1d30   :  { %v3006_v32 = vpack.c.bf16 %v3004_v56, %v3003_v55  ;;  %v3289_v55 = vor.u32 %v3288_v23, %v3285_v53 }
0x1d32   :  { %5252 = vmatprep.mubr.msk.bf16.mxu0 %vm501_vm12, %v3006_v32  ;;  %v6865_v13 = vsel %vm1146_vm15, %v3289_v55, %v6857_v58 }
0x1d33   :  { %5253 = vmatmul.mubr.msk.bf16.vlgmr.msra.gmra.mrb[76].mxu0 %vm501_vm12, %v3007_v57 }
0x1d34   :  { %5257 = vmatpush3.bf16.xpose.msra.mxu0 %v3085_v26  ;;  %5260 = vmatprep.mubr.msk.bf16.mxu0 %vm440_vm11, %v3071_v62 }
0x1d35   :  { %5435 = vmatprep.subr.msk.bf16.mxu0 %vm440_vm11, %v3077_v8 }
0x1d3c   :  { %5259 = vmatpush3.bf16.xpose.msra.mxu0 %v3088_v10 }
0x1d43   :  { %5261 = vmatmul.mubr.msk.bf16.vlgmr.msra.gmra.mrb[80].mxu0 %vm440_vm11, %v3073_v12 }
0x1e06   :  { %v6837_v63 = vpop.f32.mrb[76].mxu0 }
0x1e07   :  { %v6839_v24 = vpop.f32.mrb[77].mxu0 }
0x1e08   :  { %v5255_v36 = vpop.f32.mrb[78].mxu0 }
0x1e09   :  { %v6841_v25 = vpop.f32.mrb[79].mxu0 }
0x1e0a   :  { %v5499_v14 = vpack.i.bf16 %v6841_v25, %v6839_v24 }
0x1e16   :  { %v5262_v33 = vpop.f32.mrb[80].mxu0 }
0x1e17   :  { %v3124_v34 = vpop.f32.mrb[81].mxu0  ;;  %v3144_v1 = vsel %vm508_vm13, %v5262_v33, -inf }
0x1e18   :  { %v5263_v45 = vpop.f32.mrb[82].mxu0  ;;  %v3138_v61 = vsel %vm501_vm12, %v3124_v34, -inf }
0x1e19   :  { %3139 = vmax.xlane.f32.xlu1 %v3138_v61  ;;  %v3127_v30 = vpop.f32.mrb[83].mxu0 }
0x1e1a   :  { %v3141_v50 = vsel %vm501_vm12, %v3127_v30, -inf }
0x1e1b   :  { %3142 = vmax.xlane.f32.xlu0 %v3141_v50 }
0x1e1f   :  { %3145 = vmax.xlane.f32.xlu0 %v3144_v1 }
0x1ea6   :  { %v3140_v41 = vpop.xlane.xlu1 %3139 }
0x1ea7   :  { %v3147_v60 = vsub.f32 %v3124_v34, %v3140_v41 }
0x1ea8   :  { %v3143_v3 = vpop.xlane.xlu0 %3142 }
0x1ea9   :  { %v3148_v5 = vsub.f32 %v3127_v30, %v3143_v3  ;;  %v3150_v19 = vmul.f32 1.442695, %v3147_v60 }
0x1eab   :  { %v3152_v9 = vmul.f32 1.442695, %v3148_v5 }
0x1eac   :  { %v3146_v48 = vpop.xlane.xlu0 %3145 }
0x1ead   :  { %5734 = vpow2.f32 %v3152_v9  ;;  %v3149_v2 = vsub.f32 %v5262_v33, %v3146_v48 }
0x1eaf   :  { %v3154_v15 = vmul.f32 1.442695, %v3149_v2 }
0x1eb1   :  { %5736 = vpow2.f32 %v3154_v15 }
0x1eb2   :  { %5738 = vpow2.f32 %v3150_v19 }
0x1eb7   :  { %v5735_v18 = vpop.eup %5734 }
0x1eb8   :  { %v3159_v29 = vsel %vm501_vm12, %v5735_v18, 0.0 }
0x1eb9   :  { %3160 = vadd.xlane.f32.xlu0 %v3159_v29 }
0x1ebb   :  { %v5737_v39 = vpop.eup %5736 }
0x1ebc   :  { %v3162_v27 = vsel %vm508_vm13, %v5737_v39, 0.0  ;;  %v5739_v35 = vpop.eup %5738 }
0x1ebd   :  { %3163 = vadd.xlane.f32.xlu1 %v3162_v27  ;;  %v3156_v40 = vsel %vm501_vm12, %v5739_v35, 0.0 }
0x1ec1   :  { %3157 = vadd.xlane.f32.xlu1 %v3156_v40 }
0x1ecf   :  { %3173 = vrot.lane.b32.xlu0 %v6715_v59, %s7305_s3 }
0x1ed2   :  { %3175 = vrot.lane.b32.xlu1 %v6727_v20, %s7305_s3 }
0x1ed3   :  { %3301 = vrot.lane.b32.xlu0 %v6857_v58, %s5825_s0 }
0x1ed6   :  { %3299 = vrot.lane.b32.xlu1 %v6865_v13, %s5825_s0  ;;  %s7307_s0 = smov 8  }
0x1f46   :  { %v3161_v44 = vpop.xlane.xlu0 %3160 }
0x1f4a   :  { %v3164_v56 = vpop.xlane.xlu1 %3163  ;;  %v3174_v32 = vpop.permute.xlu0 %3173 }
0x1f4b   :  { %5264 = vmatprep.subr.bf16.mxu1 %v3174_v32  ;;  %5740 = vrcp.f32 %v3164_v56 }
0x1f4c   :  { %5265 = vmatpush3.bf16.msra.mxu1 %v3174_v32  ;;  %5742 = vrcp.f32 %v3161_v44 }
0x1f4e   :  { %v3158_v59 = vpop.xlane.xlu1 %3157  ;;  %v3302_v30 = vpop.permute.xlu0 %3301 }
0x1f4f   :  { %5744 = vrcp.f32 %v3158_v59  ;;  %v3313_v50 = vsel %vm440_vm11, %v3302_v30, 0 }
0x1f52   :  { %v3176_v20 = vpop.permute.xlu1 %3175 }
0x1f53   :  { %v3185_v57 = vand.u32 %v3176_v20, %v6197_v21 }
0x1f55   :  { %5266 = vmatprep.subr.bf16.mxu1 %v3185_v57  ;;  %v5741_v26 = vpop.eup %5740 }
0x1f56   :  { %v3300_v62 = vpop.permute.xlu1 %3299  ;;  %5267 = vmatpush3.bf16.msra.mxu1 %v3185_v57  ;;  %v5743_v8 = vpop.eup %5742  ;;  %v3170_v12 = vmul.f32 %v5741_v26, %v5737_v39 }
0x1f57   :  { %5436 = vmatprep.subr.msk.bf16.mxu1 %vm440_vm11, %v3300_v62  ;;  %v3169_v33 = vmul.f32 %v5743_v8, %v5735_v18  ;;  %v3310_v61 = vsel %vm440_vm11, %v3300_v62, 0 }
0x1f58   :  { %v3172_v45 = vpack.c.bf16 %v3170_v12, %v3170_v12 }
0x1f59   :  { %v5745_v10 = vpop.eup %5744 }
0x1f5a   :  { %v3168_v36 = vmul.f32 %v5745_v10, %v5739_v35 }
0x1f5c   :  { %v3171_v34 = vpack.c.bf16 %v3169_v33, %v3168_v36 }
0x1f5e   :  { %5268 = vmatprep.mubr.msk.bf16.mxu1 %vm501_vm12, %v3171_v34 }
0x1f5f   :  { %5269 = vmatmul.mubr.msk.bf16.vlgmr.msra.gmra.mrb[72].mxu1 %vm501_vm12, %v3172_v45 }
0x1f60   :  { %5273 = vmatpush3.bf16.xpose.msra.mxu1 %v3310_v61  ;;  %5276 = vmatprep.mubr.msk.bf16.mxu1 %vm440_vm11, %v6865_v13 }
0x1f61   :  { %5437 = vmatprep.subr.msk.bf16.mxu1 %vm440_vm11, %v3302_v30 }
0x1f68   :  { %5275 = vmatpush3.bf16.xpose.msra.mxu1 %v3313_v50 }
0x1f6f   :  { %5277 = vmatmul.mubr.msk.bf16.vlgmr.msra.gmra.mrb[76].mxu1 %vm440_vm11, %v6857_v58 }
0x2032   :  { %v6880_v1 = vpop.f32.mrb[72].mxu1 }
0x2033   :  { %v6882_v41 = vpop.f32.mrb[73].mxu1 }
0x2034   :  { %v5271_v3 = vpop.f32.mrb[74].mxu1 }
0x2035   :  { %v6884_v5 = vpop.f32.mrb[75].mxu1 }
0x2036   :  { %v5504_v60 = vpack.i.bf16 %v6884_v5, %v6882_v41 }
0x2042   :  { %v5278_v9 = vpop.f32.mrb[76].mxu1 }
0x2043   :  { %v3349_v48 = vpop.f32.mrb[77].mxu1  ;;  %v3369_v29 = vsel %vm508_vm13, %v5278_v9, -inf }
0x2044   :  { %v5279_v2 = vpop.f32.mrb[78].mxu1  ;;  %v3363_v19 = vsel %vm501_vm12, %v3349_v48, -inf }
0x2045   :  { %3364 = vmax.xlane.f32.xlu1 %v3363_v19  ;;  %v3352_v15 = vpop.f32.mrb[79].mxu1 }
0x2046   :  { %v3366_v18 = vsel %vm501_vm12, %v3352_v15, -inf }
0x2047   :  { %3367 = vmax.xlane.f32.xlu0 %v3366_v18 }
0x204b   :  { %3370 = vmax.xlane.f32.xlu0 %v3369_v29 }
0x20d2   :  { %v3365_v39 = vpop.xlane.xlu1 %3364 }
0x20d3   :  { %v3372_v40 = vsub.f32 %v3349_v48, %v3365_v39 }
0x20d4   :  { %v3368_v27 = vpop.xlane.xlu0 %3367 }
0x20d5   :  { %v3373_v35 = vsub.f32 %v3352_v15, %v3368_v27  ;;  %v3375_v49 = vmul.f32 1.442695, %v3372_v40 }
0x20d7   :  { %v3377_v47 = vmul.f32 1.442695, %v3373_v35 }
0x20d8   :  { %v3371_v54 = vpop.xlane.xlu0 %3370 }
0x20d9   :  { %5746 = vpow2.f32 %v3377_v47  ;;  %v3374_v16 = vsub.f32 %v5278_v9, %v3371_v54 }
0x20db   :  { %v3379_v11 = vmul.f32 1.442695, %v3374_v16 }
0x20dd   :  { %5748 = vpow2.f32 %v3379_v11 }
0x20de   :  { %5750 = vpow2.f32 %v3375_v49 }
0x20e3   :  { %v5747_v52 = vpop.eup %5746 }
0x20e4   :  { %v3384_v53 = vsel %vm501_vm12, %v5747_v52, 0.0 }
0x20e5   :  { %3385 = vadd.xlane.f32.xlu0 %v3384_v53 }
0x20e7   :  { %v5749_v23 = vpop.eup %5748 }
0x20e8   :  { %v3387_v55 = vsel %vm508_vm13, %v5749_v23, 0.0  ;;  %v5751_v44 = vpop.eup %5750 }
0x20e9   :  { %3388 = vadd.xlane.f32.xlu1 %v3387_v55  ;;  %v3381_v56 = vsel %vm501_vm12, %v5751_v44, 0.0 }
0x20ed   :  { %3382 = vadd.xlane.f32.xlu1 %v3381_v56 }
0x20fb   :  { %3398 = vrot.lane.b32.xlu0 %v6865_v13, %s5829_s2 }
0x20fe   :  { %3400 = vrot.lane.b32.xlu1 %v6857_v58, %s5829_s2 }
0x20ff   :  { %3466 = vrot.lane.b32.xlu0 %v6857_v58, %s5824_s29 }
0x2102   :  { %3464 = vrot.lane.b32.xlu1 %v6865_v13, %s5824_s29  ;;  %s7306_s29 = smov 16  }
0x2103   :  { %3462 = vrot.lane.b32.xlu0 %v6857_v58, %s5826_s4 }
0x2106   :  { %3460 = vrot.lane.b32.xlu1 %v6865_v13, %s5826_s4  ;;  %s7308_s4 = smov 24  }
0x2172   :  { %v3386_v32 = vpop.xlane.xlu0 %3385 }
0x2176   :  { %v3389_v59 = vpop.xlane.xlu1 %3388  ;;  %v3399_v20 = vpop.permute.xlu0 %3398 }
0x2177   :  { %5280 = vmatprep.subr.bf16.mxu0 %v3399_v20  ;;  %5752 = vrcp.f32 %v3389_v59 }
0x2178   :  { %5281 = vmatpush3.bf16.msra.mxu0 %v3399_v20  ;;  %5754 = vrcp.f32 %v3386_v32 }
0x217a   :  { %v3383_v57 = vpop.xlane.xlu1 %3382  ;;  %v3467_v9 = vpop.permute.xlu0 %3466 }
0x217b   :  { %5756 = vrcp.f32 %v3383_v57  ;;  %v3478_v48 = vsel %vm440_vm11, %v3467_v9, 0 }
0x217e   :  { %v3401_v26 = vpop.permute.xlu1 %3400  ;;  %v3463_v2 = vpop.permute.xlu0 %3462 }
0x217f   :  { %v3410_v62 = vand.u32 %v3401_v26, %v6197_v21 }
0x2181   :  { %5282 = vmatprep.subr.bf16.mxu0 %v3410_v62  ;;  %v5753_v8 = vpop.eup %5752 }
0x2182   :  { %v3465_v10 = vpop.permute.xlu1 %3464  ;;  %5283 = vmatpush3.bf16.msra.mxu0 %v3410_v62  ;;  %v5755_v12 = vpop.eup %5754  ;;  %v3395_v33 = vmul.f32 %v5753_v8, %v5749_v23 }
0x2183   :  { %5438 = vmatprep.subr.msk.bf16.mxu0 %vm440_vm11, %v3465_v10  ;;  %v3394_v45 = vmul.f32 %v5755_v12, %v5747_v52  ;;  %v3475_v50 = vsel %vm440_vm11, %v3465_v10, 0 }
0x2184   :  { %v3397_v30 = vpack.c.bf16 %v3395_v33, %v3395_v33 }
0x2185   :  { %v5757_v36 = vpop.eup %5756 }
0x2186   :  { %v3393_v34 = vmul.f32 %v5757_v36, %v5751_v44  ;;  %v3461_v3 = vpop.permute.xlu1 %3460 }
0x2188   :  { %v3396_v61 = vpack.c.bf16 %v3394_v45, %v3393_v34 }
0x218a   :  { %5284 = vmatprep.mubr.msk.bf16.mxu0 %vm501_vm12, %v3396_v61 }
0x218b   :  { %5285 = vmatmul.mubr.msk.bf16.vlgmr.msra.gmra.mrb[84].mxu0 %vm501_vm12, %v3397_v30 }
0x218c   :  { %5289 = vmatpush3.bf16.xpose.msra.mxu0 %v3475_v50  ;;  %5292 = vmatprep.mubr.msk.bf16.mxu0 %vm440_vm11, %v3461_v3 }
0x218d   :  { %5439 = vmatprep.subr.msk.bf16.mxu0 %vm440_vm11, %v3467_v9 }
0x2194   :  { %5291 = vmatpush3.bf16.xpose.msra.mxu0 %v3478_v48 }
0x219b   :  { %5293 = vmatmul.mubr.msk.bf16.vlgmr.msra.gmra.mrb[88].mxu0 %vm440_vm11, %v3463_v2 }
0x225e   :  { %v6915_v19 = vpop.f32.mrb[84].mxu0 }
0x225f   :  { %v6917_v15 = vpop.f32.mrb[85].mxu0 }
0x2260   :  { %v5287_v18 = vpop.f32.mrb[86].mxu0 }
0x2261   :  { %v6919_v29 = vpop.f32.mrb[87].mxu0 }
0x226e   :  { %v5294_v39 = vpop.f32.mrb[88].mxu0 }
0x226f   :  { %v3514_v27 = vpop.f32.mrb[89].mxu0  ;;  %v3534_v16 = vsel %vm508_vm13, %v5294_v39, -inf }
0x2270   :  { %v5295_v35 = vpop.f32.mrb[90].mxu0  ;;  %v3528_v40 = vsel %vm501_vm12, %v3514_v27, -inf }
0x2271   :  { %3529 = vmax.xlane.f32.xlu1 %v3528_v40  ;;  %v3517_v47 = vpop.f32.mrb[91].mxu0 }
0x2272   :  { %v3531_v54 = vsel %vm501_vm12, %v3517_v47, -inf }
0x2273   :  { %3532 = vmax.xlane.f32.xlu0 %v3531_v54 }
0x2277   :  { %3535 = vmax.xlane.f32.xlu0 %v3534_v16 }
0x22fe   :  { %v3530_v49 = vpop.xlane.xlu1 %3529 }
0x22ff   :  { %v3537_v53 = vsub.f32 %v3514_v27, %v3530_v49 }
0x2300   :  { %v3533_v11 = vpop.xlane.xlu0 %3532 }
0x2301   :  { %v3538_v52 = vsub.f32 %v3517_v47, %v3533_v11  ;;  %v3540_v56 = vmul.f32 1.442695, %v3537_v53 }
0x2303   :  { %v3542_v23 = vmul.f32 1.442695, %v3538_v52 }
0x2304   :  { %v3536_v55 = vpop.xlane.xlu0 %3535 }
0x2305   :  { %5758 = vpow2.f32 %v3542_v23  ;;  %v3539_v44 = vsub.f32 %v5294_v39, %v3536_v55 }
0x2307   :  { %v3544_v32 = vmul.f32 1.442695, %v3539_v44 }
0x2309   :  { %5760 = vpow2.f32 %v3544_v32 }
0x230a   :  { %5762 = vpow2.f32 %v3540_v56 }
0x230f   :  { %v5759_v59 = vpop.eup %5758 }
0x2310   :  { %v3549_v20 = vsel %vm501_vm12, %v5759_v59, 0.0 }
0x2311   :  { %3550 = vadd.xlane.f32.xlu0 %v3549_v20 }
0x2313   :  { %v5761_v57 = vpop.eup %5760 }
0x2314   :  { %v3552_v26 = vsel %vm508_vm13, %v5761_v57, 0.0  ;;  %v5763_v62 = vpop.eup %5762 }
0x2315   :  { %3553 = vadd.xlane.f32.xlu1 %v3552_v26  ;;  %v3546_v8 = vsel %vm501_vm12, %v5763_v62, 0.0 }
0x2319   :  { %3547 = vadd.xlane.f32.xlu1 %v3546_v8 }
0x2327   :  { %3563 = vrot.lane.b32.xlu0 %v6865_v13, %s5830_s24 }
0x232a   :  { %3565 = vrot.lane.b32.xlu1 %v6857_v58, %s5830_s24 }
0x232b   :  { %3631 = vrot.lane.b32.xlu0 %v6857_v58, %s5827_s7 }
0x232e   :  { %3629 = vrot.lane.b32.xlu1 %v6865_v13, %s5827_s7 }
0x232f   :  { %3627 = vrot.lane.b32.xlu0 %v6857_v58, %s7301_s8 }
0x2332   :  { %3625 = vrot.lane.b32.xlu1 %v6865_v13, %s7301_s8 }
0x239e   :  { %v3551_v10 = vpop.xlane.xlu0 %3550 }
0x23a2   :  { %v3554_v12 = vpop.xlane.xlu1 %3553  ;;  %v3564_v36 = vpop.permute.xlu0 %3563 }
0x23a3   :  { %5296 = vmatprep.subr.bf16.mxu1 %v3564_v36  ;;  %5764 = vrcp.f32 %v3554_v12 }
0x23a4   :  { %5297 = vmatpush3.bf16.msra.mxu1 %v3564_v36  ;;  %5766 = vrcp.f32 %v3551_v10 }
0x23a6   :  { %v3548_v33 = vpop.xlane.xlu1 %3547  ;;  %v3632_v40 = vpop.permute.xlu0 %3631 }
0x23a7   :  { %5768 = vrcp.f32 %v3548_v33  ;;  %v3643_v47 = vsel %vm440_vm11, %v3632_v40, 0 }
0x23aa   :  { %v3566_v34 = vpop.permute.xlu1 %3565  ;;  %v3628_v54 = vpop.permute.xlu0 %3627 }
0x23ab   :  { %v3575_v45 = vand.u32 %v3566_v34, %v6197_v21 }
0x23ad   :  { %5298 = vmatprep.subr.bf16.mxu1 %v3575_v45  ;;  %v5765_v61 = vpop.eup %5764 }
0x23ae   :  { %v3630_v30 = vpop.permute.xlu1 %3629  ;;  %5299 = vmatpush3.bf16.msra.mxu1 %v3575_v45  ;;  %v5767_v50 = vpop.eup %5766  ;;  %v3560_v9 = vmul.f32 %v5765_v61, %v5761_v57 }
0x23af   :  { %5440 = vmatprep.subr.msk.bf16.mxu1 %vm440_vm11, %v3630_v30  ;;  %v3559_v2 = vmul.f32 %v5767_v50, %v5759_v59  ;;  %v3640_v27 = vsel %vm440_vm11, %v3630_v30, 0 }
0x23b0   :  { %v3562_v39 = vpack.c.bf16 %v3560_v9, %v3560_v9 }
0x23b1   :  { %v5769_v3 = vpop.eup %5768 }
0x23b2   :  { %v3558_v48 = vmul.f32 %v5769_v3, %v5763_v62  ;;  %v3626_v35 = vpop.permute.xlu1 %3625 }
0x23b4   :  { %v3561_v18 = vpack.c.bf16 %v3559_v2, %v3558_v48 }
0x23b6   :  { %5300 = vmatprep.mubr.msk.bf16.mxu1 %vm501_vm12, %v3561_v18 }
0x23b7   :  { %5301 = vmatmul.mubr.msk.bf16.vlgmr.msra.gmra.mrb[80].mxu1 %vm501_vm12, %v3562_v39 }
0x23b8   :  { %5305 = vmatpush3.bf16.xpose.msra.mxu1 %v3640_v27  ;;  %5308 = vmatprep.mubr.msk.bf16.mxu1 %vm440_vm11, %v3626_v35 }
0x23b9   :  { %5441 = vmatprep.subr.msk.bf16.mxu1 %vm440_vm11, %v3632_v40 }
0x23c0   :  { %5307 = vmatpush3.bf16.xpose.msra.mxu1 %v3643_v47 }
0x23c7   :  { %5309 = vmatmul.mubr.msk.bf16.vlgmr.msra.gmra.mrb[84].mxu1 %vm440_vm11, %v3628_v54 }
0x248a   :  { %v6948_v16 = vpop.f32.mrb[80].mxu1 }
0x248b   :  { %v6950_v49 = vpop.f32.mrb[81].mxu1 }
0x248c   :  { %v5303_v11 = vpop.f32.mrb[82].mxu1 }
0x248d   :  { %v6952_v52 = vpop.f32.mrb[83].mxu1 }
0x248e   :  { %v5509_v53 = vpack.i.bf16 %v6952_v52, %v6950_v49 }
0x249a   :  { %v5310_v23 = vpop.f32.mrb[84].mxu1 }
0x249b   :  { %v3679_v55 = vpop.f32.mrb[85].mxu1  ;;  %v3699_v20 = vsel %vm508_vm13, %v5310_v23, -inf }
0x249c   :  { %v5311_v44 = vpop.f32.mrb[86].mxu1  ;;  %v3693_v56 = vsel %vm501_vm12, %v3679_v55, -inf }
0x249d   :  { %3694 = vmax.xlane.f32.xlu1 %v3693_v56  ;;  %v3682_v32 = vpop.f32.mrb[87].mxu1 }
0x249e   :  { %v3696_v59 = vsel %vm501_vm12, %v3682_v32, -inf }
0x249f   :  { %3697 = vmax.xlane.f32.xlu0 %v3696_v59 }
0x24a3   :  { %3700 = vmax.xlane.f32.xlu0 %v3699_v20 }
0x252a   :  { %v3695_v57 = vpop.xlane.xlu1 %3694 }
0x252b   :  { %v3702_v8 = vsub.f32 %v3679_v55, %v3695_v57 }
0x252c   :  { %v3698_v26 = vpop.xlane.xlu0 %3697 }
0x252d   :  { %v3703_v62 = vsub.f32 %v3682_v32, %v3698_v26  ;;  %v3705_v33 = vmul.f32 1.442695, %v3702_v8 }
0x252f   :  { %v3707_v10 = vmul.f32 1.442695, %v3703_v62 }
0x2530   :  { %v3701_v12 = vpop.xlane.xlu0 %3700 }
0x2531   :  { %5770 = vpow2.f32 %v3707_v10  ;;  %v3704_v36 = vsub.f32 %v5310_v23, %v3701_v12 }
0x2533   :  { %v3709_v34 = vmul.f32 1.442695, %v3704_v36 }
0x2535   :  { %5772 = vpow2.f32 %v3709_v34 }
0x2536   :  { %5774 = vpow2.f32 %v3705_v33 }
0x253b   :  { %v5771_v45 = vpop.eup %5770 }
0x253c   :  { %v3714_v61 = vsel %vm501_vm12, %v5771_v45, 0.0 }
0x253d   :  { %3715 = vadd.xlane.f32.xlu0 %v3714_v61 }
0x253f   :  { %v5773_v30 = vpop.eup %5772 }
0x2540   :  { %v3717_v50 = vsel %vm508_vm13, %v5773_v30, 0.0  ;;  %v5775_v3 = vpop.eup %5774 }
0x2541   :  { %3718 = vadd.xlane.f32.xlu1 %v3717_v50  ;;  %v3711_v9 = vsel %vm501_vm12, %v5775_v3, 0.0 }
0x2545   :  { %3712 = vadd.xlane.f32.xlu1 %v3711_v9 }
0x2553   :  { %3728 = vrot.lane.b32.xlu0 %v6865_v13, %s7302_s25 }
0x2556   :  { %3730 = vrot.lane.b32.xlu1 %v6857_v58, %s7302_s25 }
0x2557   :  { %3796 = vrot.lane.b32.xlu0 %v6857_v58, %s7303_s26 }
0x255a   :  { %3794 = vrot.lane.b32.xlu1 %v6865_v13, %s7303_s26 }
0x255b   :  { %3792 = vrot.lane.b32.xlu0 %v6857_v58, %s7304_s27 }
0x255e   :  { %3790 = vrot.lane.b32.xlu1 %v6865_v13, %s7304_s27 }
0x25ca   :  { %v3716_v48 = vpop.xlane.xlu0 %3715 }
0x25ce   :  { %v3719_v2 = vpop.xlane.xlu1 %3718  ;;  %v3729_v18 = vpop.permute.xlu0 %3728 }
0x25cf   :  { %5312 = vmatprep.subr.bf16.mxu0 %v3729_v18  ;;  %5776 = vrcp.f32 %v3719_v2 }
0x25d0   :  { %5313 = vmatpush3.bf16.msra.mxu0 %v3729_v18  ;;  %5778 = vrcp.f32 %v3716_v48 }
0x25d2   :  { %v3713_v39 = vpop.xlane.xlu1 %3712  ;;  %v3797_v57 = vpop.permute.xlu0 %3796 }
0x25d3   :  { %5780 = vrcp.f32 %v3713_v39  ;;  %v3808_v26 = vsel %vm440_vm11, %v3797_v57, 0 }
0x25d6   :  { %v3731_v27 = vpop.permute.xlu1 %3730  ;;  %v3793_v62 = vpop.permute.xlu0 %3792 }
0x25d7   :  { %v3740_v35 = vand.u32 %v3731_v27, %v6197_v21 }
0x25d9   :  { %5314 = vmatprep.subr.bf16.mxu0 %v3740_v35  ;;  %v5777_v40 = vpop.eup %5776 }
0x25da   :  { %v3795_v47 = vpop.permute.xlu1 %3794  ;;  %5315 = vmatpush3.bf16.msra.mxu0 %v3740_v35  ;;  %v5779_v54 = vpop.eup %5778  ;;  %v3725_v23 = vmul.f32 %v5777_v40, %v5773_v30 }
0x25db   :  { %5442 = vmatprep.subr.msk.bf16.mxu0 %vm440_vm11, %v3795_v47  ;;  %v3724_v44 = vmul.f32 %v5779_v54, %v5771_v45  ;;  %v3805_v59 = vsel %vm440_vm11, %v3795_v47, 0 }
0x25dc   :  { %v3727_v32 = vpack.c.bf16 %v3725_v23, %v3725_v23 }
0x25dd   :  { %v5781_v11 = vpop.eup %5780 }
0x25de   :  { %v3723_v55 = vmul.f32 %v5781_v11, %v5775_v3  ;;  %v3791_v20 = vpop.permute.xlu1 %3790 }
0x25e0   :  { %v3726_v56 = vpack.c.bf16 %v3724_v44, %v3723_v55 }
0x25e2   :  { %5316 = vmatprep.mubr.msk.bf16.mxu0 %vm501_vm12, %v3726_v56 }
0x25e3   :  { %5317 = vmatmul.mubr.msk.bf16.vlgmr.msra.gmra.mrb[92].mxu0 %vm501_vm12, %v3727_v32 }
0x25e4   :  { %5321 = vmatpush3.bf16.xpose.msra.mxu0 %v3805_v59  ;;  %5324 = vmatprep.mubr.msk.bf16.mxu0 %vm440_vm11, %v3791_v20 }
0x25e5   :  { %5443 = vmatprep.subr.msk.bf16.mxu0 %vm440_vm11, %v3797_v57 }
0x25ec   :  { %5323 = vmatpush3.bf16.xpose.msra.mxu0 %v3808_v26 }
0x25ed   :  { %5352 = vmatprep.subr.bf16.mxu0 %v5822_v7 }
0x25f3   :  { %5325 = vmatmul.mubr.msk.bf16.vlgmr.msra.gmra.mrb[96].mxu0 %vm440_vm11, %v3793_v62 }
0x25f4   :  { %5356 = vmatprep.mubr.msk.bf16.mxu0 %vm5823_vm10, %v5822_v7 }
0x26b6   :  { %v6986_v8 = vpop.f32.mrb[92].mxu0 }
0x26b7   :  { %v3776_v10 = vpop.f32.mrb[93].mxu0 }
0x26b8   :  { %v5319_v12 = vpop.f32.mrb[94].mxu0 }
0x26b9   :  { %v3779_v36 = vpop.f32.mrb[95].mxu0 }
0x26ba   :  { %v5514_v33 = vpack.i.bf16 %v3779_v36, %v3776_v10 }
0x26c6   :  { %v5326_v34 = vpop.f32.mrb[96].mxu0 }
0x26c7   :  { %v3844_v45 = vpop.f32.mrb[97].mxu0  ;;  %v3864_v9 = vsel %vm508_vm13, %v5326_v34, -inf }
0x26c8   :  { %v5327_v61 = vpop.f32.mrb[98].mxu0  ;;  %v3858_v30 = vsel %vm501_vm12, %v3844_v45, -inf }
0x26c9   :  { %3859 = vmax.xlane.f32.xlu1 %v3858_v30  ;;  %v3847_v50 = vpop.f32.mrb[99].mxu0  ;;  %v5541_v30 = vld [vmem:[%s7255_s9 + $0x18] sm:$0xff]  }
0x26ca   :  { %v3861_v3 = vsel %vm501_vm12, %v3847_v50, -inf }
0x26cb   :  { %3862 = vmax.xlane.f32.xlu0 %v3861_v3 }
0x26cf   :  { %3865 = vmax.xlane.f32.xlu0 %v3864_v9 }
0x2756   :  { %v3860_v48 = vpop.xlane.xlu1 %3859 }
0x2757   :  { %v3867_v39 = vsub.f32 %v3844_v45, %v3860_v48 }
0x2758   :  { %v3863_v2 = vpop.xlane.xlu0 %3862 }
0x2759   :  { %v3868_v18 = vsub.f32 %v3847_v50, %v3863_v2  ;;  %v3870_v47 = vmul.f32 1.442695, %v3867_v39  ;;  %v7050_v39 = vld [vmem:[%s7256_s10 + $0x1] ss:$0 sm:$0xff] }
0x275b   :  { %v3872_v27 = vmul.f32 1.442695, %v3868_v18 }
0x275c   :  { %v3866_v35 = vpop.xlane.xlu0 %3865 }
0x275d   :  { %5782 = vpow2.f32 %v3872_v27  ;;  %v3869_v40 = vsub.f32 %v5326_v34, %v3866_v35  ;;  %v5540_v34 = vld [vmem:[%s7255_s9 + $0x10] sm:$0xff]  }
0x275f   :  { %v3874_v54 = vmul.f32 1.442695, %v3869_v40 }
0x2761   :  { %5784 = vpow2.f32 %v3874_v54 }
0x2762   :  { %5786 = vpow2.f32 %v3870_v47 }
0x2767   :  { %v5783_v11 = vpop.eup %5782 }
0x2768   :  { %v3879_v23 = vsel %vm501_vm12, %v5783_v11, 0.0 }
0x2769   :  { %3880 = vadd.xlane.f32.xlu0 %v3879_v23 }
0x276b   :  { %v5785_v55 = vpop.eup %5784 }
0x276c   :  { %v3882_v44 = vsel %vm508_vm13, %v5785_v55, 0.0  ;;  %v5787_v56 = vpop.eup %5786 }
0x276d   :  { %3883 = vadd.xlane.f32.xlu1 %v3882_v44  ;;  %v3876_v32 = vsel %vm501_vm12, %v5787_v56, 0.0 }
0x2771   :  { %3877 = vadd.xlane.f32.xlu1 %v3876_v32 }
0x277f   :  { %3893 = vrot.lane.b32.xlu0 %v6865_v13, %s7305_s3 }
0x2782   :  { %3895 = vrot.lane.b32.xlu1 %v6857_v58, %s7305_s3 }
0x2783   :  { %5500 = vrot.lane.b32.xlu0 %v5499_v14, %s7306_s29 }
0x2786   :  { %5495 = vrot.lane.b32.xlu1 %v5494_v43, %s7307_s0 }
0x2787   :  { %5510 = vrot.lane.b32.xlu0 %v5509_v53, %s7307_s0 }
0x278a   :  { %5505 = vrot.lane.b32.xlu1 %v5504_v60, %s7308_s4 }
0x278b   :  { %3242 = vrot.lane.b32.xlu0 %v6802_v42, %s7307_s0 }
0x278e   :  { %5515 = vrot.lane.b32.xlu1 %v5514_v33, %s7306_s29 }
0x278f   :  { %3254 = vrot.lane.b32.xlu0 %v6837_v63, %s7306_s29 }
0x27f6   :  { %v3881_v37 = vpop.xlane.xlu0 %3880 }
0x27fa   :  { %v3884_v31 = vpop.xlane.xlu1 %3883  ;;  %v3894_v43 = vpop.permute.xlu0 %3893 }
0x27fb   :  { %5328 = vmatprep.subr.bf16.mxu1 %v3894_v43  ;;  %5788 = vrcp.f32 %v3884_v31 }
0x27fc   :  { %5329 = vmatpush3.bf16.msra.mxu1 %v3894_v43  ;;  %5790 = vrcp.f32 %v3881_v37 }
0x27fe   :  { %v3878_v24 = vpop.xlane.xlu1 %3877  ;;  %v5501_v41 = vpop.permute.xlu0 %5500 }
0x27ff   :  { %5792 = vrcp.f32 %v3878_v24  ;;  %v5503_v59 = vunpack.i.h.bf16 %v5501_v41 }
0x2802   :  { %v3896_v25 = vpop.permute.xlu1 %3895 }
0x2803   :  { %v3905_v14 = vand.u32 %v3896_v25, %v6197_v21  ;;  %v5502_v21 = vunpack.i.l.bf16 %v5501_v41 }
0x2805   :  { %5330 = vmatprep.subr.bf16.mxu1 %v3905_v14  ;;  %v5789_v58 = vpop.eup %5788 }
0x2806   :  { %v5496_v42 = vpop.permute.xlu1 %5495  ;;  %5331 = vmatpush3.bf16.msra.mxu1 %v3905_v14  ;;  %v5791_v13 = vpop.eup %5790  ;;  %v3890_v49 = vmul.f32 %v5789_v58, %v5785_v55 }
0x2807   :  { %v5498_v5 = vunpack.i.h.bf16 %v5496_v42  ;;  %v5497_v63 = vunpack.i.l.bf16 %v5496_v42  ;;  %5336 = vmatprep.subr.bf16.mxu1 %v5822_v7  ;;  %v3889_v26 = vmul.f32 %v5791_v13, %v5783_v11 }
0x2808   :  { %v3892_v45 = vpack.c.bf16 %v3890_v49, %v3890_v49 }
0x2809   :  { %v5793_v60 = vpop.eup %5792  ;;  %v3272_v52 = vsel %vm440_vm11, %v6800_v28, %v5498_v5  ;;  %v3271_v53 = vsel %vm440_vm11, %v6798_v38, %v5497_v63 }
0x280a   :  { %v5506_v20 = vpop.permute.xlu1 %5505  ;;  %v3888_v57 = vmul.f32 %v5793_v60, %v5787_v56  ;;  %v3274_v12 = vsel %vm101_vm0, %v3271_v53, %v5502_v21  ;;  %v3275_v36 = vsel %vm101_vm0, %v3272_v52, %v5503_v59 }
0x280b   :  { %v5508_v62 = vunpack.i.h.bf16 %v5506_v20  ;;  %v5507_v10 = vunpack.i.l.bf16 %v5506_v20 }
0x280c   :  { %v3891_v33 = vpack.c.bf16 %v3889_v26, %v3888_v57 }
0x280d   :  { %v3277_v28 = vsel %vm1140_vm1, %v3274_v12, %v5507_v10  ;;  %v3278_v38 = vsel %vm1140_vm1, %v3275_v36, %v5508_v62 }
0x280e   :  { %v4013_v61 = vpack.c.bf16 %v3278_v38, %v3277_v28  ;;  %5332 = vmatprep.mubr.msk.bf16.mxu1 %vm501_vm12, %v3891_v33  ;;  %v5516_v32 = vpop.permute.xlu1 %5515 }
0x280f   :  { %5333 = vmatmul.mubr.msk.bf16.vlgmr.msra.gmra.mrb[88].mxu1 %vm501_vm12, %v3892_v45  ;;  %v5518_v31 = vunpack.i.h.bf16 %v5516_v32  ;;  %v5517_v43 = vunpack.i.l.bf16 %v5516_v32 }
0x2810   :  { %5337 = vmatpush3.bf16.msra.mxu1 %v5540_v34  ;;  %5340 = vmatprep.mubr.msk.bf16.mxu1 %vm5823_vm10, %v5822_v7 }
0x2811   :  { %5338 = vmatprep.subr.bf16.mxu1 %v5822_v7 }
0x2814   :  { %5339 = vmatpush3.bf16.msra.mxu1 %v5541_v30 }
0x2815   :  { %5368 = vmatprep.subr.bf16.mxu1 %v5822_v7 }
0x2817   :  { %5341 = vmatmul.mubr.msk.bf16.vlgmr.msra.gmra.mrb[92].mxu1 %vm235_vm5, %v4013_v61 }
0x2818   :  { %5344 = vmatprep.mubr.msk.bf16.mxu1 %vm5823_vm10, %v5822_v7 }
0x28e2   :  { %v7044_v50 = vpop.f32.mrb[88].mxu1 }
0x28e3   :  { %v3941_v3 = vpop.f32.mrb[89].mxu1 }
0x28e4   :  { %v5335_v9 = vpop.f32.mrb[90].mxu1 }
0x28e5   :  { %v3944_v48 = vpop.f32.mrb[91].mxu1 }
0x28e6   :  { %v5519_v2 = vpack.i.bf16 %v3944_v48, %v3941_v3 }
0x28e8   :  { %5520 = vrot.lane.b32.xlu1 %v5519_v2, %s7308_s4 }
0x28ea   :  { %v4076_v18 = vpop.f32.mrb[92].mxu1 }
0x28eb   :  { %v4099_v27 = vadd.f32 %v4076_v18, %v6630_v46  ;;  %v5342_v35 = vpop.f32.mrb[93].mxu1  ;;  %v5511_v46 = vpop.permute.xlu0 %5510  ;;  %v5542_v18 = vld [vmem:[%s7257_s13 + $0x10] sm:$0xff]  }
0x28ec   :  { %3266 = vrot.lane.b32.xlu1 %v6880_v1, %s7308_s4  ;;  %v4079_v40 = vpop.f32.mrb[94].mxu1  ;;  %v5513_v1 = vunpack.i.h.bf16 %v5511_v46  ;;  %v5512_v37 = vunpack.i.l.bf16 %v5511_v46  ;;  %5353 = vmatpush3.bf16.msra.mxu0 %v5542_v18 }
0x28ed   :  { %v7056_v47 = vadd.f32 %v7050_v39, %v4099_v27  ;;  %v5343_v54 = vpop.f32.mrb[95].mxu1  ;;  %v4100_v23 = vadd.f32 %v4079_v40, %v6634_v51  ;;  %5354 = vmatprep.subr.bf16.mxu0 %v5822_v7 }
0x28ee   :  { %v3992_v25 = vsel %vm440_vm11, %v6919_v29, %v5513_v1  ;;  %v3991_v14 = vsel %vm440_vm11, %v6917_v15, %v5512_v37 }
0x28ef   :  { %v4123_v11 = vsel %vm235_vm5, %v7056_v47, 0.0  ;;  %v4114_v55 = vadd.f32 %v7050_v39, %v4100_v23  ;;  %v3243_v56 = vpop.permute.xlu0 %3242  ;;  %v3994_v13 = vsel %vm101_vm0, %v3991_v14, %v5517_v43  ;;  %v3995_v41 = vsel %vm101_vm0, %v3992_v25, %v5518_v31 }
0x28f0   :  { %4124 = vadd.xlane.f32.xlu0 %v4123_v11  ;;  %v3273_v5 = vsel %vm440_vm11, %v6796_v22, %v3243_v56 }
0x28f1   :  { %v4126_v44 = vsel %vm235_vm5, %v4114_v55, 0.0 }
0x28f3   :  { %v3255_v51 = vpop.permute.xlu0 %3254 }
0x28f4   :  { %v3276_v29 = vsel %vm101_vm0, %v3273_v5, %v3255_v51  ;;  %v7121_v51 = vld [vmem:[%s7258_s11 + $0x1] ss:$0 sm:$0xff] }
0x2910   :  { %4127 = vadd.xlane.f32.xlu1 %v4126_v44 }
0x295a   :  { %v5521_v24 = vpop.permute.xlu1 %5520 }
0x295b   :  { %v5523_v58 = vunpack.i.h.bf16 %v5521_v24  ;;  %v5522_v42 = vunpack.i.l.bf16 %v5521_v24 }
0x295d   :  { %v3997_v63 = vsel %vm1140_vm1, %v3994_v13, %v5522_v42  ;;  %v7073_v60 = vsel %vm1140_vm1, %v3995_v41, %v5523_v58  ;;  %v7129_v41 = vld [vmem:[%s7259_s12 + $0x1] ss:$0 sm:$0xff] }
0x295e   :  { %v4003_v49 = vrot.slane %v3997_v63, 3  ;;  %v4004_v15 = vrot.slane %v7073_v60, 3  ;;  %v3267_v52 = vpop.permute.xlu1 %3266 }
0x295f   :  { %v3279_v53 = vsel %vm1140_vm1, %v3276_v29, %v3267_v52  ;;  %v5545_v52 = vld [vmem:[%s7260_s15 + $0x48] sm:$0xff]  }
0x2960   :  { %v4005_v59 = vsel %vm218_vm7, %v4003_v49, %v4004_v15  ;;  %v4012_v21 = vsel %vm218_vm7, %v3279_v53, %v4003_v49  ;;  %v5546_v53 = vld [vmem:[%s7260_s15 + $0x50] sm:$0xff]  }
0x2961   :  { %v4014_v22 = vpack.c.bf16 %v4005_v59, %v4012_v21  ;;  %v5548_v59 = vld [vmem:[%s7260_s15 + $0x60] sm:$0xff]   ;;  %v5549_v21 = vld [vmem:[%s7260_s15 + $0x68] sm:$0xff]  }
0x2963   :  { %5345 = vmatmul.mubr.msk.bf16.gmra.mrb[96].mxu1 %vm235_vm5, %v4014_v22  ;;  %v5550_v22 = vld [vmem:[%s7260_s15 + $0x70] sm:$0xff]  }
0x2964   :  { %5348 = vmatprep.mubr.msk.bf16.mxu1 %vm5823_vm10, %v5822_v7 }
0x297d   :  { %v4125_v20 = vpop.xlane.xlu0 %4124 }
0x297e   :  { %v4141_v57 = vmul.f32 0.03125, %v4125_v20  ;;  %v5551_v20 = vld [vmem:[%s7260_s15 + $0x78] sm:$0xff]  }
0x2980   :  { %v4147_v26 = vsub.f32 %v7056_v47, %v4141_v57 }
0x2982   :  { %v4153_v62 = vmul.f32 %v4147_v26, %v4147_v26 }
0x2984   :  { %v4159_v10 = vsel %vm235_vm5, %v4153_v62, 0.0 }
0x2985   :  { %4160 = vadd.xlane.f32.xlu1 %v4159_v10 }
0x2996   :  { %3962 = vrot.lane.b32.xlu1 %v6948_v16, %s7307_s0 }
0x299d   :  { %v4128_v12 = vpop.xlane.xlu1 %4127 }
0x299e   :  { %v4142_v33 = vmul.f32 0.03125, %v4128_v12 }
0x29a0   :  { %v4148_v3 = vsub.f32 %v4114_v55, %v4142_v33 }
0x29a2   :  { %v4154_v2 = vmul.f32 %v4148_v3, %v4148_v3 }
0x2a12   :  { %v4161_v27 = vpop.xlane.xlu1 %4160 }
0x2a13   :  { %v4177_v35 = vmul.f32 0.03125, %v4161_v27 }
0x2a15   :  { %v4183_v11 = vadd.f32 1e-05, %v4177_v35  ;;  %v7192_v35 = vld [vmem:[%s7261_s14 + $0x1] ss:$0 sm:$0xff] }
0x2a16   :  { %v3963_v57 = vpop.permute.xlu1 %3962 }
0x2a17   :  { %5794 = vrsqrt.f32 %v4183_v11 }
0x2a21   :  { %v5795_v25 = vpop.eup %5794 }
0x2a22   :  { %v4195_v14 = vmul.f32 %v5795_v25, %v4147_v26 }
0x2a24   :  { %v4207_v42 = vmul.f32 %v7121_v51, %v4195_v14 }
0x2a26   :  { %v4219_v63 = vadd.f32 %v7129_v41, %v4207_v42 }
0x2a36   :  { %v4084_v36 = vpop.f32.mrb[96].mxu1 }
0x2a37   :  { %v4101_v34 = vadd.f32 %v4084_v36, %v6644_v0  ;;  %v5346_v28 = vpop.f32.mrb[97].mxu1  ;;  %v4162_v0 = vsel %vm235_vm5, %v4154_v2, 0.0 }
0x2a38   :  { %v4087_v38 = vpop.f32.mrb[98].mxu1 }
0x2a39   :  { %v7091_v45 = vadd.f32 %v7050_v39, %v4101_v34  ;;  %v4102_v61 = vadd.f32 %v4087_v38, %v6649_v6  ;;  %v5347_v30 = vpop.f32.mrb[99].mxu1  ;;  %v5543_v6 = vld [vmem:[%s7257_s13 + $0x18] sm:$0xff]   ;;  %v3993_v34 = vsel %vm440_vm11, %v6915_v19, %v3963_v57 }
0x2a3a   :  { %5355 = vmatpush3.bf16.msra.mxu0 %v5543_v6 }
0x2a3b   :  { %v4116_v9 = vadd.f32 %v7050_v39, %v4102_v61  ;;  %v4129_v48 = vsel %vm235_vm5, %v7091_v45, 0.0  ;;  %5396 = vmatprep.subr.bf16.mxu0 %v5822_v7 }
0x2a3c   :  { %4130 = vadd.xlane.f32.xlu0 %v4129_v48 }
0x2a3d   :  { %v4132_v16 = vsel %vm235_vm5, %v4116_v9, 0.0 }
0x2a40   :  { %4133 = vadd.xlane.f32.xlu0 %v4132_v16 }
0x2a44   :  { %4163 = vadd.xlane.f32.xlu0 %v4162_v0 }
0x2ac9   :  { %v4131_v40 = vpop.xlane.xlu0 %4130 }
0x2aca   :  { %v4143_v54 = vmul.f32 0.03125, %v4131_v40 }
0x2acc   :  { %v7108_v23 = vsub.f32 %v7091_v45, %v4143_v54 }
0x2acd   :  { %v4134_v55 = vpop.xlane.xlu0 %4133 }
0x2ace   :  { %v4144_v44 = vmul.f32 0.03125, %v4134_v55  ;;  %v4155_v46 = vmul.f32 %v7108_v23, %v7108_v23 }
0x2ad0   :  { %v7112_v56 = vsub.f32 %v4116_v9, %v4144_v44  ;;  %v4165_v32 = vsel %vm235_vm5, %v4155_v46, 0.0 }
0x2ad1   :  { %4166 = vadd.xlane.f32.xlu1 %v4165_v32  ;;  %v4164_v1 = vpop.xlane.xlu0 %4163 }
0x2ad2   :  { %v4178_v37 = vmul.f32 0.03125, %v4164_v1  ;;  %v4156_v31 = vmul.f32 %v7112_v56, %v7112_v56 }
0x2ad4   :  { %v4184_v43 = vadd.f32 1e-05, %v4178_v37  ;;  %v4168_v24 = vsel %vm235_vm5, %v4156_v31, 0.0 }
0x2ad5   :  { %4169 = vadd.xlane.f32.xlu0 %v4168_v24 }
0x2ad6   :  { %5796 = vrsqrt.f32 %v4184_v43 }
0x2ae0   :  { %v5797_v58 = vpop.eup %5796 }
0x2ae1   :  { %v4196_v13 = vmul.f32 %v5797_v58, %v4148_v3 }
0x2ae2   :  { %3986 = vrot.lane.b32.xlu1 %v7044_v50, %s7308_s4  ;;  %v5544_v50 = vld [vmem:[%s7260_s15 + $0x40] sm:$0xff]  }
0x2ae3   :  { %v4208_v5 = vmul.f32 %v7121_v51, %v4196_v13  ;;  %5369 = vmatpush3.bf16.msra.mxu1 %v5544_v50 }
0x2ae4   :  { %5370 = vmatprep.subr.bf16.mxu1 %v5822_v7 }
0x2ae5   :  { %v4220_v29 = vadd.f32 %v7129_v41, %v4208_v5 }
0x2ae7   :  { %v4225_v49 = vpack.c.bf16 %v4220_v29, %v4219_v63  ;;  %5371 = vmatpush3.bf16.msra.mxu1 %v5545_v52 }
0x2ae8   :  { %5372 = vmatprep.subr.bf16.mxu1 %v5822_v7 }
0x2ae9   :  { %5357 = vmatmul.mubr.msk.bf16.vlgmr.msra.gmra.mrb[100].mxu0 %vm235_vm5, %v4225_v49 }
0x2aea   :  { %5360 = vmatprep.mubr.msk.bf16.mxu0 %vm5823_vm10, %v5822_v7 }
0x2aeb   :  { %3974 = vrot.lane.b32.xlu0 %v6986_v8, %s7306_s29  ;;  %5373 = vmatpush3.bf16.msra.mxu1 %v5546_v53  ;;  %v5547_v8 = vld [vmem:[%s7260_s15 + $0x58] sm:$0xff]  }
0x2aec   :  { %5374 = vmatprep.subr.bf16.mxu1 %v5822_v7 }
0x2aef   :  { %5375 = vmatpush3.bf16.msra.mxu1 %v5547_v8 }
0x2af0   :  { %5376 = vmatprep.subr.bf16.mxu1 %v5822_v7 }
0x2af3   :  { %5377 = vmatpush3.bf16.msra.mxu1 %v5548_v59 }
0x2af4   :  { %5378 = vmatprep.subr.bf16.mxu1 %v5822_v7 }
0x2af7   :  { %5379 = vmatpush3.bf16.msra.mxu1 %v5549_v21 }
0x2af8   :  { %5380 = vmatprep.subr.bf16.mxu1 %v5822_v7 }
0x2afb   :  { %5381 = vmatpush3.bf16.msra.mxu1 %v5550_v22 }
0x2afc   :  { %5382 = vmatprep.subr.bf16.mxu1 %v5822_v7 }
0x2aff   :  { %5383 = vmatpush3.bf16.msra.mxu1 %v5551_v20 }
0x2b5e   :  { %v4167_v26 = vpop.xlane.xlu1 %4166 }
0x2b5f   :  { %v4179_v62 = vmul.f32 0.03125, %v4167_v26 }
0x2b61   :  { %v4185_v10 = vadd.f32 1e-05, %v4179_v62 }
0x2b62   :  { %v4170_v12 = vpop.xlane.xlu0 %4169  ;;  %v3987_v38 = vpop.permute.xlu1 %3986 }
0x2b63   :  { %5798 = vrsqrt.f32 %v4185_v10  ;;  %v4180_v36 = vmul.f32 0.03125, %v4170_v12 }
0x2b65   :  { %v4186_v33 = vadd.f32 1e-05, %v4180_v36 }
0x2b66   :  { %v3975_v28 = vpop.permute.xlu0 %3974 }
0x2b67   :  { %5800 = vrsqrt.f32 %v4186_v33  ;;  %v3996_v61 = vsel %vm101_vm0, %v3993_v34, %v3975_v28  ;;  %vm4509_vm0 = vcmask 1040384  }
0x2b68   :  { %v3999_v30 = vsel %vm1140_vm1, %v3996_v61, %v3987_v38 }
0x2b69   :  { %v4006_v3 = vrot.slane %v3999_v30, 3 }
0x2b6b   :  { %v4007_v9 = vsel %vm218_vm7, %v4004_v15, %v4006_v3 }
0x2b6c   :  { %v4015_v48 = vpack.c.bf16 %v4006_v3, %v4007_v9 }
0x2b6d   :  { %v5799_v16 = vpop.eup %5798 }
0x2b6e   :  { %v4197_v2 = vmul.f32 %v5799_v16, %v7108_v23  ;;  %5349 = vmatmul.mubr.msk.bf16.gmra.mrb[100].mxu1 %vm235_vm5, %v4015_v48 }
0x2b6f   :  { %5384 = vmatprep.mubr.msk.bf16.mxu1 %vm5823_vm10, %v5822_v7 }
0x2b70   :  { %v4209_v18 = vmul.f32 %v7121_v51, %v4197_v2 }
0x2b71   :  { %v5801_v19 = vpop.eup %5800 }
0x2b72   :  { %v4198_v0 = vmul.f32 %v5801_v19, %v7112_v56  ;;  %v4221_v60 = vadd.f32 %v7129_v41, %v4209_v18 }
0x2b74   :  { %v4210_v6 = vmul.f32 %v7121_v51, %v4198_v0 }
0x2b76   :  { %v4222_v15 = vadd.f32 %v7129_v41, %v4210_v6 }
0x2b78   :  { %v4226_v27 = vpack.c.bf16 %v4222_v15, %v4221_v60 }
0x2b7a   :  { %5361 = vmatmul.mubr.msk.bf16.gmra.mrb[104].mxu0 %vm235_vm5, %v4226_v27 }
0x2b7b   :  { %5364 = vmatprep.mubr.msk.bf16.mxu0 %vm5823_vm10, %v5822_v7 }
0x2bbc   :  { %v4296_v40 = vpop.f32.mrb[100].mxu0 }
0x2bbd   :  { %v4297_v54 = vadd.f32 %v7192_v35, %v4296_v40  ;;  %v5358_v11 = vpop.f32.mrb[101].mxu0 }
0x2bbe   :  { %v4299_v23 = vpop.f32.mrb[102].mxu0 }
0x2bbf   :  { %v4325_v55 = vmul.f32 0.044715, %v4297_v54  ;;  %v4300_v44 = vadd.f32 %v7192_v35, %v4299_v23  ;;  %v5359_v46 = vpop.f32.mrb[103].mxu0  ;;  %v4319_v5 = vmul.f32 0.5, %v4297_v54 }
0x2bc1   :  { %v4331_v56 = vmul.f32 %v4325_v55, %v4297_v54  ;;  %v4326_v32 = vmul.f32 0.044715, %v4300_v44  ;;  %v4320_v63 = vmul.f32 0.5, %v4300_v44 }
0x2bc3   :  { %v4337_v1 = vmul.f32 %v4331_v56, %v4297_v54  ;;  %v4332_v37 = vmul.f32 %v4326_v32, %v4300_v44 }
0x2bc5   :  { %v4343_v31 = vadd.f32 %v4337_v1, %v4297_v54  ;;  %v4338_v43 = vmul.f32 %v4332_v37, %v4300_v44 }
0x2bc7   :  { %v4349_v24 = vmul.f32 0.7978846, %v4343_v31  ;;  %v4344_v25 = vadd.f32 %v4338_v43, %v4300_v44 }
0x2bc9   :  { %5802 = vtanh.f32 %v4349_v24  ;;  %v4350_v14 = vmul.f32 0.7978846, %v4344_v25 }
0x2bcb   :  { %5804 = vtanh.f32 %v4350_v14 }
0x2bd3   :  { %v5803_v58 = vpop.eup %5802 }
0x2bd4   :  { %v4361_v42 = vadd.f32 1.0, %v5803_v58 }
0x2bd5   :  { %v5805_v13 = vpop.eup %5804 }
0x2bd6   :  { %v4362_v29 = vadd.f32 1.0, %v5805_v13  ;;  %v4367_v49 = vmul.f32 %v4361_v42, %v4319_v5 }
0x2bd8   :  { %v4368_v50 = vmul.f32 %v4362_v29, %v4320_v63  ;;  %v4782_v63 = vld [vmem:[%s7262_s16 + $0x1] ss:$0 sm:$0xff] }
0x2bda   :  { %v4373_v52 = vpack.c.bf16 %v4368_v50, %v4367_v49 }
0x2bdc   :  { %5385 = vmatmul.mubr.bf16.vlgmr.msra.gmra.mrb[104].mxu1 %v4373_v52 }
0x2bdd   :  { %5388 = vmatprep.mubr.msk.bf16.mxu1 %vm5823_vm10, %v5822_v7 }
0x2c41   :  { %v4092_v53 = vpop.f32.mrb[100].mxu1 }
0x2c42   :  { %v4103_v8 = vadd.f32 %v4092_v53, %v6674_v4  ;;  %v5350_v59 = vpop.f32.mrb[101].mxu1 }
0x2c43   :  { %v4095_v21 = vpop.f32.mrb[102].mxu1 }
0x2c44   :  { %v4117_v22 = vadd.f32 %v7050_v39, %v4103_v8  ;;  %v4104_v20 = vadd.f32 %v4095_v21, %v6679_v17  ;;  %v5351_v57 = vpop.f32.mrb[103].mxu1 }
0x2c46   :  { %v4118_v26 = vadd.f32 %v7050_v39, %v4104_v20  ;;  %v4135_v62 = vsel %vm235_vm5, %v4117_v22, 0.0 }
0x2c47   :  { %4136 = vadd.xlane.f32.xlu1 %v4135_v62 }
0x2c48   :  { %v4138_v10 = vsel %vm251_vm9, %v4118_v26, 0.0 }
0x2c49   :  { %4139 = vadd.xlane.f32.xlu0 %v4138_v10 }
0x2c4d   :  { %v4304_v12 = vpop.f32.mrb[104].mxu0 }
0x2c4e   :  { %v4305_v36 = vadd.f32 %v7192_v35, %v4304_v12  ;;  %v5362_v33 = vpop.f32.mrb[105].mxu0 }
0x2c4f   :  { %v4307_v4 = vpop.f32.mrb[106].mxu0 }
0x2c50   :  { %v4327_v34 = vmul.f32 0.044715, %v4305_v36  ;;  %v4308_v28 = vadd.f32 %v7192_v35, %v4307_v4  ;;  %v5363_v38 = vpop.f32.mrb[107].mxu0  ;;  %v4321_v6 = vmul.f32 0.5, %v4305_v36 }
0x2c52   :  { %v4333_v61 = vmul.f32 %v4327_v34, %v4305_v36  ;;  %v4328_v17 = vmul.f32 0.044715, %v4308_v28  ;;  %v4322_v60 = vmul.f32 0.5, %v4308_v28 }
0x2c54   :  { %v4339_v30 = vmul.f32 %v4333_v61, %v4305_v36  ;;  %v4334_v3 = vmul.f32 %v4328_v17, %v4308_v28 }
0x2c56   :  { %v4340_v39 = vmul.f32 %v4334_v3, %v4308_v28  ;;  %v4345_v9 = vadd.f32 %v4339_v30, %v4305_v36 }
0x2c58   :  { %v4346_v48 = vadd.f32 %v4340_v39, %v4308_v28  ;;  %v4351_v16 = vmul.f32 0.7978846, %v4345_v9 }
0x2c5a   :  { %v4352_v2 = vmul.f32 0.7978846, %v4346_v48  ;;  %5806 = vtanh.f32 %v4351_v16 }
0x2c5c   :  { %5808 = vtanh.f32 %v4352_v2 }
0x2c64   :  { %v5807_v19 = vpop.eup %5806 }
0x2c65   :  { %v4363_v0 = vadd.f32 1.0, %v5807_v19 }
0x2c66   :  { %v5809_v18 = vpop.eup %5808 }
0x2c67   :  { %v4364_v15 = vadd.f32 1.0, %v5809_v18  ;;  %v4369_v27 = vmul.f32 %v4363_v0, %v4321_v6 }
0x2c69   :  { %v4370_v40 = vmul.f32 %v4364_v15, %v4322_v60 }
0x2c6b   :  { %v4374_v54 = vpack.c.bf16 %v4370_v40, %v4369_v27 }
0x2c6d   :  { %5389 = vmatmul.mubr.bf16.gmra.mrb[108].mxu1 %v4374_v54 }
0x2c6e   :  { %5392 = vmatprep.mubr.msk.bf16.mxu1 %vm5823_vm10, %v5822_v7 }
0x2caf   :  { %v4475_v11 = vpop.f32.mrb[104].mxu1 }
0x2cb0   :  { %v5386_v23 = vpop.f32.mrb[105].mxu1  ;;  %v4494_v42 = vadd.f32 %v4475_v11, %v7056_v47 }
0x2cb1   :  { %v4478_v55 = vpop.f32.mrb[106].mxu1 }
0x2cb2   :  { %v5387_v44 = vpop.f32.mrb[107].mxu1  ;;  %v4504_v52 = vadd.f32 %v4782_v63, %v4494_v42  ;;  %v4784_v42 = vld [vmem:[%s7265_s18] ss:$0 sm:$0xff] }
0x2cd4   :  { %v4137_v46 = vpop.xlane.xlu1 %4136 }
0x2cd5   :  { %v4145_v56 = vmul.f32 0.03125, %v4137_v46 }
0x2cd6   :  { %v4140_v32 = vpop.xlane.xlu0 %4139 }
0x2cd7   :  { %v4151_v1 = vsub.f32 %v4117_v22, %v4145_v56  ;;  %v4146_v37 = vmul.f32 0.03125, %v4140_v32 }
0x2cd9   :  { %v4152_v31 = vsub.f32 %v4118_v26, %v4146_v37  ;;  %v4157_v43 = vmul.f32 %v4151_v1, %v4151_v1 }
0x2cdb   :  { %v4171_v24 = vsel %vm235_vm5, %v4157_v43, 0.0  ;;  %v4158_v25 = vmul.f32 %v4152_v31, %v4152_v31 }
0x2cdc   :  { %4172 = vadd.xlane.f32.xlu0 %v4171_v24 }
0x2cdd   :  { %v4174_v14 = vsel %vm251_vm9, %v4158_v25, 0.0 }
0x2cde   :  { %4175 = vadd.xlane.f32.xlu1 %v4174_v14  ;;  %v4783_v14 = vld [vmem:[%s7264_s17] ss:$0 sm:$0xff] }
0x2d40   :  { %v4482_v58 = vpop.f32.mrb[108].mxu1 }
0x2d41   :  { %v4495_v13 = vadd.f32 %v4482_v58, %v7091_v45  ;;  %v5390_v5 = vpop.f32.mrb[109].mxu1 }
0x2d42   :  { %v4485_v29 = vpop.f32.mrb[110].mxu1 }
0x2d43   :  { %v4505_v49 = vadd.f32 %v4782_v63, %v4495_v13  ;;  %v5391_v50 = vpop.f32.mrb[111].mxu1 }
0x2d45   :  { %v4507_v53 = vrot.slane %v4505_v49, 4 }
0x2d47   :  { %v4510_v8 = vsel %vm4509_vm0, %v4504_v52, %v4507_v53  ;;  %v4785_v53 = vld [vmem:[%s7266_s20] ss:$0 sm:$0xff] }
0x2d48   :  { %v4513_v59 = vsel %vm251_vm9, %v4510_v8, 0.0 }
0x2d49   :  { %4514 = vadd.xlane.f32.xlu0 %v4513_v59 }
0x2d69   :  { %v4173_v21 = vpop.xlane.xlu0 %4172 }
0x2d6a   :  { %v4181_v22 = vmul.f32 0.03125, %v4173_v21 }
0x2d6b   :  { %v4176_v47 = vpop.xlane.xlu1 %4175 }
0x2d6c   :  { %v4187_v20 = vadd.f32 1e-05, %v4181_v22  ;;  %v4182_v45 = vmul.f32 0.03125, %v4176_v47 }
0x2d6e   :  { %5810 = vrsqrt.f32 %v4187_v20  ;;  %v4188_v57 = vadd.f32 1e-05, %v4182_v45 }
0x2d70   :  { %5812 = vrsqrt.f32 %v4188_v57 }
0x2d78   :  { %v5811_v26 = vpop.eup %5810 }
0x2d79   :  { %v4199_v62 = vmul.f32 %v5811_v26, %v4151_v1 }
0x2d7a   :  { %v5813_v10 = vpop.eup %5812 }
0x2d7b   :  { %v4200_v12 = vmul.f32 %v5813_v10, %v4152_v31  ;;  %v4211_v36 = vmul.f32 %v7121_v51, %v4199_v62 }
0x2d7d   :  { %v4212_v33 = vmul.f32 %v7121_v51, %v4200_v12  ;;  %v4223_v4 = vadd.f32 %v7129_v41, %v4211_v36  ;;  %v5552_v51 = vld [vmem:[%s7263_s19] sm:$0xff]  }
0x2d7e   :  { %5397 = vmatpush3.bf16.msra.mxu0 %v5552_v51 }
0x2d7f   :  { %v4224_v34 = vadd.f32 %v7129_v41, %v4212_v33  ;;  %5398 = vmatprep.subr.bf16.mxu0 %v5822_v7  ;;  %v5553_v41 = vld [vmem:[%s7263_s19 + $0x8] sm:$0xff]  }
0x2d81   :  { %v4227_v28 = vpack.c.bf16 %v4224_v34, %v4223_v4 }
0x2d82   :  { %5399 = vmatpush3.bf16.msra.mxu0 %v5553_v41 }
0x2d83   :  { %5365 = vmatmul.mubr.msk.bf16.gmra.mrb[108].mxu0 %vm235_vm5, %v4227_v28 }
0x2d84   :  { %5400 = vmatprep.mubr.msk.bf16.mxu0 %vm5823_vm10, %v5822_v7 }
0x2dd6   :  { %v4515_v38 = vpop.xlane.xlu0 %4514 }
0x2dd7   :  { %v4516_v61 = vmul.f32 0.03125, %v4515_v38 }
0x2dd9   :  { %v4517_v17 = vsub.f32 %v4510_v8, %v4516_v61 }
0x2ddb   :  { %v4518_v30 = vmul.f32 %v4517_v17, %v4517_v17 }
0x2ddd   :  { %v4519_v3 = vsel %vm251_vm9, %v4518_v30, 0.0 }
0x2dde   :  { %4520 = vadd.xlane.f32.xlu1 %v4519_v3 }
0x2e56   :  { %v4312_v39 = vpop.f32.mrb[108].mxu0 }
0x2e57   :  { %v4313_v9 = vadd.f32 %v7192_v35, %v4312_v39  ;;  %v5366_v48 = vpop.f32.mrb[109].mxu0 }
0x2e58   :  { %v4315_v16 = vpop.f32.mrb[110].mxu0 }
0x2e59   :  { %v4329_v2 = vmul.f32 0.044715, %v4313_v9  ;;  %v4316_v19 = vadd.f32 %v7192_v35, %v4315_v16  ;;  %v5367_v0 = vpop.f32.mrb[111].mxu0  ;;  %v4323_v35 = vmul.f32 0.5, %v4313_v9 }
0x2e5b   :  { %v4335_v18 = vmul.f32 %v4329_v2, %v4313_v9  ;;  %v4330_v6 = vmul.f32 0.044715, %v4316_v19  ;;  %v4324_v1 = vmul.f32 0.5, %v4316_v19 }
0x2e5d   :  { %v4341_v60 = vmul.f32 %v4335_v18, %v4313_v9  ;;  %v4336_v15 = vmul.f32 %v4330_v6, %v4316_v19 }
0x2e5f   :  { %v4342_v27 = vmul.f32 %v4336_v15, %v4316_v19  ;;  %v4347_v7 = vadd.f32 %v4341_v60, %v4313_v9 }
0x2e61   :  { %v4348_v40 = vadd.f32 %v4342_v27, %v4316_v19  ;;  %v4353_v54 = vmul.f32 0.7978846, %v4347_v7 }
0x2e63   :  { %v4354_v11 = vmul.f32 0.7978846, %v4348_v40  ;;  %5814 = vtanh.f32 %v4353_v54 }
0x2e65   :  { %5816 = vtanh.f32 %v4354_v11 }
0x2e6b   :  { %v4521_v23 = vpop.xlane.xlu1 %4520 }
0x2e6c   :  { %v4522_v55 = vmul.f32 0.03125, %v4521_v23 }
0x2e6d   :  { %v5815_v44 = vpop.eup %5814 }
0x2e6e   :  { %v4523_v46 = vadd.f32 1e-05, %v4522_v55  ;;  %v4365_v56 = vadd.f32 1.0, %v5815_v44 }
0x2e6f   :  { %v5817_v32 = vpop.eup %5816 }
0x2e70   :  { %5818 = vrsqrt.f32 %v4523_v46  ;;  %v4366_v37 = vadd.f32 1.0, %v5817_v32  ;;  %v4371_v31 = vmul.f32 %v4365_v56, %v4323_v35 }
0x2e72   :  { %v4372_v43 = vmul.f32 %v4366_v37, %v4324_v1 }
0x2e74   :  { %v4375_v24 = vpack.c.bf16 %v4372_v43, %v4371_v31 }
0x2e76   :  { %5393 = vmatmul.mubr.bf16.gmra.mrb[112].mxu1 %v4375_v24 }
0x2e7a   :  { %v5819_v25 = vpop.eup %5818 }
0x2e7b   :  { %v4525_v58 = vmul.f32 %v5819_v25, %v4517_v17 }
0x2e7d   :  { %v4532_v13 = vmul.f32 %v4783_v14, %v4525_v58 }
0x2e7f   :  { %v4539_v5 = vadd.f32 %v4784_v42, %v4532_v13 }
0x2e81   :  { %v4540_v63 = vpack.c.bf16 %v4539_v5, %v4539_v5 }
0x2e83   :  { %5401 = vmatmul.mubr.msk.bf16.vlgmr.msra.gmra.mrb[112].mxu0 %vm235_vm5, %v4540_v63 }
0x2f49   :  { %v4489_v29 = vpop.f32.mrb[112].mxu1 }
0x2f4a   :  { %v5394_v49 = vpop.f32.mrb[113].mxu1 }
0x2f4b   :  { %v4491_v50 = vpop.f32.mrb[114].mxu1 }
0x2f4c   :  { %v5395_v52 = vpop.f32.mrb[115].mxu1 }
0x2f56   :  { %v4601_v8 = vpop.f32.mrb[112].mxu0 }
0x2f57   :  { %v4602_v59 = vadd.f32 %v4785_v53, %v4601_v8  ;;  %v5402_v21 = vpop.f32.mrb[113].mxu0 }
0x2f58   :  { %v4604_v22 = vpop.f32.mrb[114].mxu0 }
0x2f59   :  { %4607 = vst [vmem:[%s7267_s21] sm:$0x3] %v4602_v59  ;;  %v5403_v47 = vpop.f32.mrb[115].mxu0 }

</bundles_post_ra>
